<compile_context>
chip_gen: v7x
topology: tpu7x:2x2x1
jax: 0.10.0
libtpu: 0.0.40
codegen_flags: <defaults>
</compile_context>

<pallas_src>
import functools

import jax
import jax.numpy as jnp
from jax import lax
from jax.experimental import pallas as pl
from jax.experimental.pallas import tpu as pltpu


# ----------------------------------------------------------------------------
# Small helpers
# ----------------------------------------------------------------------------
def _round_up(x, m):
    return ((x + m - 1) // m) * m


def _num_tensorcores():
    """Best-effort TensorCore-per-chip count (1 on v5e/v6e, 2 on v7x)."""
    try:
        info = pltpu.get_tpu_info()
    except Exception:
        return 1
    for attr in ("num_cores", "num_tensorcores", "tensorcore_count",
                 "cores_per_chip", "core_count"):
        v = getattr(info, attr, None)
        if v is None:
            continue
        try:
            v = int(v)
        except (TypeError, ValueError):
            continue
        if v > 0:
            return v
    return 1


_VMEM_LIMIT = 32 * 1024 * 1024   # explicit, safe on v5e/v6e/v7x


# ----------------------------------------------------------------------------
# Stem: tiled matmul kernel (im2col fed), bias + ReLU epilogue
# ----------------------------------------------------------------------------
def _matmul_bias_relu_kernel(x_ref, w_ref, b_ref, o_ref, acc_ref, *, relu):
    """out = relu_opt(x @ w + bias); grid = (m_tiles, k_tiles), K axis last."""
    k = pl.program_id(1)

    @pl.when(k == 0)
    def _():
        acc_ref[...] = jnp.zeros_like(acc_ref)

    acc_ref[...] += jnp.dot(x_ref[...], w_ref[...],
                            preferred_element_type=jnp.float32)

    @pl.when(k == pl.num_programs(1) - 1)
    def _():
        out = acc_ref[...] + b_ref[...]
        if relu:
            out = jnp.maximum(out, 0.0)
        o_ref[...] = out.astype(o_ref.dtype)


def matmul_bias_act(x, w, bias, *, relu, out_dtype=jnp.bfloat16):
    """out = relu_opt(x @ w + bias). bf16 MXU operands, f32 accumulate.

    K and the output dim are zero-padded to multiples of 128 (lane-dense weight
    blocks and unmasked output stores).  Returns (out[M, N_pad], N_pad).
    """
    M, K = x.shape
    K2, N = w.shape
    assert K == K2
    x = x.astype(jnp.bfloat16)
    w = w.astype(jnp.bfloat16)
    bias = bias.astype(jnp.float32)

    K_pad = _round_up(K, 128)
    N_pad = _round_up(N, 128)
    if K_pad != K:
        x = jnp.pad(x, ((0, 0), (0, K_pad - K)))
        w = jnp.pad(w, ((0, K_pad - K), (0, 0)))
    if N_pad != N:
        w = jnp.pad(w, ((0, 0), (0, N_pad - N)))
        bias = jnp.pad(bias, (0, N_pad - N))
    bias2 = bias.reshape(1, N_pad)

    # Row tile: big tiles on 1-TC parts; only halve to get a second "parallel"
    # grid step when a second TensorCore actually exists (v7x megacore).
    if M >= 512:
        tm = 256
    else:
        tm = min(128, _round_up(M, 8))
    M_pad = _round_up(M, tm)
    if _num_tensorcores() >= 2 and M_pad // tm == 1 and tm % 16 == 0:
        tm //= 2
    if M_pad != M:
        x = jnp.pad(x, ((0, M_pad - M), (0, 0)))

    # K tile: largest multiple-of-128 divisor of K_pad that is <= 512.
    tk = 128
    d = 128
    while d <= min(K_pad, 512):
        if K_pad % d == 0:
            tk = d
        d += 128

    grid = (M_pad // tm, K_pad // tk)
    out = pl.pallas_call(
        functools.partial(_matmul_bias_relu_kernel, relu=relu),
        out_shape=jax.ShapeDtypeStruct((M_pad, N_pad), out_dtype),
        grid=grid,
        in_specs=[
            pl.BlockSpec((tm, tk), lambda i, k: (i, k)),
            pl.BlockSpec((tk, N_pad), lambda i, k: (k, 0)),
            pl.BlockSpec((1, N_pad), lambda i, k: (0, 0)),
        ],
        out_specs=pl.BlockSpec((tm, N_pad), lambda i, k: (i, 0)),
        scratch_shapes=[pltpu.VMEM((tm, N_pad), jnp.float32)],
        compiler_params=pltpu.CompilerParams(
            dimension_semantics=("parallel", "arbitrary"),
            vmem_limit_bytes=_VMEM_LIMIT),
    )(x, w, bias2)
    if M_pad != M:
        out = out[:M]
    return out, N_pad


def im2col(x, ksize, stride, padding):
    """x: (N,H,W,C) -> (N*Hout*Wout, ksize*ksize*C) with (kh, kw, c) ordering."""
    N, H, W, C = x.shape
    if padding:
        x = jnp.pad(x, ((0, 0), (padding, padding), (padding, padding), (0, 0)))
    Hout = (H + 2 * padding - ksize) // stride + 1
    Wout = (W + 2 * padding - ksize) // stride + 1
    cols = []
    for kh in range(ksize):
        for kw in range(ksize):
            cols.append(x[:, kh:kh + stride * Hout:stride,
                          kw:kw + stride * Wout:stride, :])
    patches = jnp.concatenate(cols, axis=-1)
    return patches.reshape(N * Hout * Wout, ksize * ksize * C), (N, Hout, Wout)


def conv2d_im2col(x, w, bias, *, stride, padding, relu):
    """Stem conv via bf16 im2col feeding the tiled matmul kernel.

    Output channels are zero-padded to a multiple of 128 (lane-dense stores);
    the padded channels are exactly zero and flow into the next block through
    zero-padded weight rows (no slice / extra copy).
    """
    # TODO(synk): fold the 11x11 im2col into the kernel (tap-reduction grid)
    # for large resolutions; at this size the im2col buffer is ~100 KB.
    K, _, Cin, Cout = w.shape
    patches, (N, Hout, Wout) = im2col(x.astype(jnp.bfloat16), K, stride, padding)
    wmat = w.reshape(K * K * Cin, Cout)
    out, cpad = matmul_bias_act(patches, wmat, bias, relu=relu)
    return out.reshape(N, Hout, Wout, cpad)


def fold_bn(conv_bias, gamma, beta, mean, var, eps=1e-5):
    # Eval-mode BatchNorm folded onto the conv output: y = z*scale + bias
    s = gamma / jnp.sqrt(var + eps)
    return s, (conv_bias - mean) * s + beta


# ----------------------------------------------------------------------------
# Fused residual block kernel (c1+BN+ReLU, skip, c2+BN+ReLU, residual[, head])
# ----------------------------------------------------------------------------
def _block_kernel(*refs, hout, wout, stride, has_head):
    it = iter(refs)
    xp_ref = next(it)     # (1, S2, Hs, Ws, Cin) bf16 phase-split padded x0
    w1_ref = next(it)     # (3, 3, Cin, Cout) bf16
    s1_ref = next(it)     # (1, Cout) f32 folded BN scale
    b1_ref = next(it)     # (1, Cout) f32 folded BN bias
    wsk_ref = next(it)    # (Cin, Cout) bf16 1x1 skip weight
    bsk_ref = next(it)    # (1, Cout) f32
    w2_ref = next(it)     # (3, 3, Cout, Cout) bf16
    s2_ref = next(it)     # (1, Cout) f32
    b2_ref = next(it)     # (1, Cout) f32
    if has_head:
        wh_ref = next(it)  # (Cout, Cls_pad) bf16
        bh_ref = next(it)  # (1, Cls_pad) f32
    o_ref = next(it)
    x1pad_ref = next(it)  # VMEM scratch (hout+2, wout+2, Cout) bf16

    cin = xp_ref.shape[-1]
    cout = w1_ref.shape[-1]
    m = hout * wout
    ksize = 3

    # --- c1: 3x3 / stride conv, taps unrolled over the phase-split input ----
    # (m and cout are tiny here, so a live f32 accumulator is fine; a tap-grid
    # + VMEM accumulator is the plan for large resolutions.)
    acc1 = jnp.zeros((m, cout), jnp.float32)
    for kh in range(ksize):
        for kw in range(ksize):
            ph = (kh % stride) * stride + (kw % stride)
            q = kh // stride
            p = kw // stride
            xw = xp_ref[0, ph, q:q + hout, p:p + wout, :]     # (hout, wout, cin)
            acc1 = acc1 + jnp.dot(xw.reshape(m, cin), w1_ref[kh, kw, :, :],
                                  preferred_element_type=jnp.float32)
    x1 = jnp.maximum(acc1 * s1_ref[...] + b1_ref[...], 0.0)   # (m, cout) f32

    # --- skip: 1x1 / stride conv (reads the SAME padded, phase-split x0) ----
    spq = 1 // stride                            # c1 padding == 1
    sph = (1 % stride) * stride + (1 % stride)
    xs = xp_ref[0, sph, spq:spq + hout, spq:spq + wout, :]
    skip = jnp.dot(xs.reshape(m, cin), wsk_ref[...],
                   preferred_element_type=jnp.float32) + bsk_ref[...]

    # --- c2: 3x3 / stride 1 on x1, zero-padded by 1 via VMEM scratch ---------
    x1pad_ref[...] = jnp.zeros_like(x1pad_ref)
    x1b = x1.astype(x1pad_ref.dtype)
    for i in range(hout):
        x1pad_ref[1 + i, 1:1 + wout, :] = x1b[i * wout:(i + 1) * wout, :]

    acc2 = jnp.zeros((m, cout), jnp.float32)
    for kh in range(ksize):
        for kw in range(ksize):
            xw = x1pad_ref[kh:kh + hout, kw:kw + wout, :]     # (hout, wout, cout)
            acc2 = acc2 + jnp.dot(xw.reshape(m, cout), w2_ref[kh, kw, :, :],
                                  preferred_element_type=jnp.float32)
    x2 = jnp.maximum(acc2 * s2_ref[...] + b2_ref[...], 0.0)

    out = skip + x2                                           # (m, cout) f32

    if has_head:
        # 1x1 head conv then global mean (they commute; conv first so the mean
        # is taken in f32 over the matmul results).
        logits = jnp.dot(out.astype(jnp.bfloat16), wh_ref[...],
                         preferred_element_type=jnp.float32)  # (m, cls_pad)
        o_ref[0] = jnp.mean(logits, axis=0, keepdims=True) + bh_ref[...]
    else:
        o_ref[0] = out.astype(o_ref.dtype)


def block_forward(x, blk, *, head=None):
    """One CNNClassifier.Block (stride=2, channel-doubling) as ONE pallas_call.

    x: (N, H, W, Cin) NHWC (Cin a multiple of 128 via upstream lane padding).
    If `head=(w, b)` is given, the 1x1 head conv + global mean is fused into the
    epilogue and (N, num_classes) f32 logits are returned; otherwise the block
    activation (N, Hout, Wout, Cout) bf16 is returned.
    """
    N, H, W, Cin = x.shape
    stride, pad = 2, 1
    Cout = blk["c1_w"].shape[-1]
    Hout = (H + 2 * pad - 3) // stride + 1
    Wout = (W + 2 * pad - 3) // stride + 1
    M1 = Hout * Wout
    S2 = stride * stride

    # Pad + stride-phase split of x0, ONCE per block (shared by c1 and skip).
    Hp2 = _round_up(H + 2 * pad, stride)
    Wp2 = _round_up(W + 2 * pad, stride)
    xpad = jnp.pad(x.astype(jnp.bfloat16),
                   ((0, 0), (pad, pad + Hp2 - H - 2 * pad),
                    (pad, pad + Wp2 - W - 2 * pad), (0, 0)))
    Hs, Ws = Hp2 // stride, Wp2 // stride
    xp = xpad.reshape(N, Hs, stride, Ws, stride, Cin)
    xp = jnp.transpose(xp, (0, 2, 4, 1, 3, 5)).reshape(N, S2, Hs, Ws, Cin)

    def pad_cin(w):
        cw = w.shape[2]
        if cw != Cin:
            w = jnp.pad(w, ((0, 0), (0, 0), (0, Cin - cw), (0, 0)))
        return w.astype(jnp.bfloat16)

    w1 = pad_cin(blk["c1_w"])
    wsk = pad_cin(blk["skip_w"]).reshape(Cin, Cout)
    w2 = blk["c2_w"].astype(jnp.bfloat16)
    s1, b1 = fold_bn(blk["c1_b"], *blk["n1"])
    s2, b2 = fold_bn(blk["c2_b"], *blk["n2"])

    def vec(v):
        return v.reshape(1, Cout).astype(jnp.float32)

    args = [xp, w1, vec(s1), vec(b1), wsk, vec(blk["skip_b"]),
            w2, vec(s2), vec(b2)]
    in_specs = [
        pl.BlockSpec((1, S2, Hs, Ws, Cin), lambda b: (b, 0, 0, 0, 0)),
        pl.BlockSpec((3, 3, Cin, Cout), lambda b: (0, 0, 0, 0)),
        pl.BlockSpec((1, Cout), lambda b: (0, 0)),
        pl.BlockSpec((1, Cout), lambda b: (0, 0)),
        pl.BlockSpec((Cin, Cout), lambda b: (0, 0)),
        pl.BlockSpec((1, Cout), lambda b: (0, 0)),
        pl.BlockSpec((3, 3, Cout, Cout), lambda b: (0, 0, 0, 0)),
        pl.BlockSpec((1, Cout), lambda b: (0, 0)),
        pl.BlockSpec((1, Cout), lambda b: (0, 0)),
    ]

    has_head = head is not None
    if has_head:
        hw, hb = head
        ncls = hb.shape[0]
        cls_pad = _round_up(max(ncls, 128), 128)
        whp = jnp.zeros((Cout, cls_pad), jnp.bfloat16).at[:, :ncls].set(
            hw.reshape(Cout, ncls).astype(jnp.bfloat16))
        bhp = jnp.zeros((1, cls_pad), jnp.float32).at[0, :ncls].set(
            hb.astype(jnp.float32))
        args += [whp, bhp]
        in_specs += [pl.BlockSpec((Cout, cls_pad), lambda b: (0, 0)),
                     pl.BlockSpec((1, cls_pad), lambda b: (0, 0))]
        out_shape = jax.ShapeDtypeStruct((N, 1, cls_pad), jnp.float32)
        out_specs = pl.BlockSpec((1, 1, cls_pad), lambda b: (b, 0, 0))
    else:
        out_shape = jax.ShapeDtypeStruct((N, M1, Cout), jnp.bfloat16)
        out_specs = pl.BlockSpec((1, M1, Cout), lambda b: (b, 0, 0))

    kernel = functools.partial(_block_kernel, hout=Hout, wout=Wout,
                               stride=stride, has_head=has_head)
    out = pl.pallas_call(
        kernel,
        out_shape=out_shape,
        grid=(N,),
        in_specs=in_specs,
        out_specs=out_specs,
        scratch_shapes=[pltpu.VMEM((Hout + 2, Wout + 2, Cout), jnp.bfloat16)],
        compiler_params=pltpu.CompilerParams(
            dimension_semantics=("parallel",),
            vmem_limit_bytes=_VMEM_LIMIT),
    )(*args)

    if has_head:
        return out[:, 0, :ncls]
    return out.reshape(N, Hout, Wout, Cout)


# ----------------------------------------------------------------------------
# Parameters (deterministic init, shapes per CNNClassifier.__init__)
# ----------------------------------------------------------------------------
def _conv_params(key, k, cin, cout):
    kw_, kb_ = jax.random.split(key)
    bound = 1.0 / jnp.sqrt(jnp.float32(cin * k * k))
    w = jax.random.uniform(kw_, (k, k, cin, cout), jnp.float32, -bound, bound)
    b = jax.random.uniform(kb_, (cout,), jnp.float32, -bound, bound)
    return w, b


def _bn_params(key, c):
    k1, k2, k3, k4 = jax.random.split(key, 4)
    gamma = 1.0 + 0.1 * jax.random.normal(k1, (c,), jnp.float32)
    beta = 0.1 * jax.random.normal(k2, (c,), jnp.float32)
    mean = 0.1 * jax.random.normal(k3, (c,), jnp.float32)
    var = 0.5 + jnp.abs(jax.random.normal(k4, (c,), jnp.float32))
    return gamma, beta, mean, var


def init_params(key, in_channels=3, num_classes=10):
    ks = jax.random.split(key, 12)
    params = {}
    w, b = _conv_params(ks[0], 11, in_channels, 64)
    params["stem"] = {"w": w, "b": b}
    blocks = []
    c1 = 64
    for bi in range(2):
        c2 = c1 * 2
        kk = jax.random.split(ks[1 + bi], 6)
        c1w, c1b = _conv_params(kk[0], 3, c1, c2)
        n1 = _bn_params(kk[1], c2)
        c2w, c2b = _conv_params(kk[2], 3, c2, c2)
        n2 = _bn_params(kk[3], c2)
        skw, skb = _conv_params(kk[4], 1, c1, c2)
        blocks.append({
            "c1_w": c1w, "c1_b": c1b, "n1": n1,
            "c2_w": c2w, "c2_b": c2b, "n2": n2,
            "skip_w": skw, "skip_b": skb,
        })
        c1 = c2
    params["blocks"] = blocks
    hw, hb = _conv_params(ks[5], 1, c1, num_classes)
    params["head"] = {"w": hw, "b": hb}
    return params


# ----------------------------------------------------------------------------
# Forward pass (Pallas) and pure-JAX f32 reference
# ----------------------------------------------------------------------------
def cnn_forward(params, x_nchw):
    x = jnp.transpose(x_nchw, (0, 2, 3, 1))                   # NCHW -> NHWC
    p = params["stem"]
    x = conv2d_im2col(x, p["w"], p["b"], stride=2, padding=5, relu=True)
    # x: (N, H/2, W/2, 128) bf16; channels 64..127 are exact zeros (lane pad).

    nblk = len(params["blocks"])
    for i, blk in enumerate(params["blocks"]):
        if i == nblk - 1:
            h = params["head"]
            return block_forward(x, blk, head=(h["w"], h["b"]))
        x = block_forward(x, blk)


def _ref_conv(x, w, b, stride, padding):
    return lax.conv_general_dilated(
        x, w, window_strides=(stride, stride),
        padding=[(padding, padding), (padding, padding)],
        dimension_numbers=("NHWC", "HWIO", "NHWC")) + b


def cnn_forward_ref(params, x_nchw):
    x = jnp.transpose(x_nchw, (0, 2, 3, 1)).astype(jnp.float32)
    p = params["stem"]
    x = jnp.maximum(_ref_conv(x, p["w"], p["b"], 2, 5), 0.0)
    for blk in params["blocks"]:
        x0 = x
        s1, b1 = fold_bn(blk["c1_b"], *blk["n1"])
        x1 = jnp.maximum(_ref_conv(x0, blk["c1_w"], 0.0, 2, 1) * s1 + b1, 0.0)
        skip = _ref_conv(x0, blk["skip_w"], blk["skip_b"], 2, 0)
        s2, b2 = fold_bn(blk["c2_b"], *blk["n2"])
        x2 = jnp.maximum(_ref_conv(x1, blk["c2_w"], 0.0, 1, 1) * s2 + b2, 0.0)
        x = skip + x2
    p = params["head"]
    x = _ref_conv(x, p["w"], p["b"], 1, 0)
    return jnp.mean(x, axis=(1, 2))


# ----------------------------------------------------------------------------
if __name__ == "__main__":
    key = jax.random.PRNGKey(0)
    k_params, k_x = jax.random.split(key)
    params = init_params(k_params, in_channels=3, num_classes=10)

    x = jax.random.normal(k_x, (2, 3, 16, 16), jnp.float32)   # (b, 3, h, w)

    logits = jax.block_until_ready(jax.jit(cnn_forward)(params, x))
    assert logits.shape == (2, 10), logits.shape
    assert logits.dtype == jnp.float32

    ref = jax.block_until_ready(cnn_forward_ref(params, x))
    err = jnp.abs(logits - ref)
    tol = 5e-2 + 5e-2 * jnp.abs(ref)   # bf16 MXU operands, f32 accumulate
    assert bool(jnp.isfinite(logits).all())
    assert bool(jnp.all(err <= tol)), \
        f"max abs error vs reference: {float(jnp.max(err))}"

    print("KERNEL_OK")
</pallas_src>

<mosaic_0001>
module attributes {stable_mosaic.version = 11 : i64} {
  func.func @_matmul_bias_relu_kernel(%arg0: i32, %arg1: i32, %arg2: memref<128x384xbf16, #tpu.memory_space<vmem>>, %arg3: memref<384x128xbf16, #tpu.memory_space<vmem>>, %arg4: memref<1x128xf32, #tpu.memory_space<vmem>>, %arg5: memref<128x128xbf16, #tpu.memory_space<vmem>>, %arg6: memref<128x128xf32, #tpu.memory_space<vmem>>) attributes {dimension_semantics = [#tpu.dimension_semantics<parallel>, #tpu.dimension_semantics<arbitrary>], iteration_bounds = array<i64: 1, 1>, scalar_prefetch = 0 : i64, scratch_operands = 1 : i64, tpu.core_type = #tpu.core_type<tc>, window_params = [{transform_indices = @transform_0, window_bounds = array<i64: 128, 384>}, {transform_indices = @transform_1, window_bounds = array<i64: 384, 128>}, {pipeline_mode = #tpu.pipeline_mode<synchronous>, transform_indices = @transform_2, window_bounds = array<i64: 1, 128>}, {transform_indices = @transform_3, window_bounds = array<i64: 128, 128>}]} {
    %c0_i32 = arith.constant 0 : i32
    %0 = arith.cmpi eq, %arg1, %c0_i32 : i32
    %1 = arith.extui %0 : i1 to i32
    %c0_i32_0 = arith.constant 0 : i32
    %2 = arith.cmpi ne, %1, %c0_i32_0 : i32
    scf.if %2 {
      %cst_10 = arith.constant 0.000000e+00 : f32
      %12 = vector.broadcast %cst_10 : f32 to vector<128x128xf32>
      %c0_11 = arith.constant 0 : index
      %c0_12 = arith.constant 0 : index
      %13 = vector.load %arg6[%c0_11, %c0_12] : memref<128x128xf32, #tpu.memory_space<vmem>>, vector<128x128xf32>
      tpu.vector_store %arg6[%c0_11, %c0_12], %12 {strides = array<i32>} : memref<128x128xf32, #tpu.memory_space<vmem>>, vector<128x128xf32>,
    } else {
    }
    %c0 = arith.constant 0 : index
    %c0_1 = arith.constant 0 : index
    %3 = vector.load %arg6[%c0, %c0_1] : memref<128x128xf32, #tpu.memory_space<vmem>>, vector<128x128xf32>
    %c0_2 = arith.constant 0 : index
    %c0_3 = arith.constant 0 : index
    %4 = vector.load %arg2[%c0_2, %c0_3] : memref<128x384xbf16, #tpu.memory_space<vmem>>, vector<128x384xbf16>
    %c0_4 = arith.constant 0 : index
    %c0_5 = arith.constant 0 : index
    %5 = vector.load %arg3[%c0_4, %c0_5] : memref<384x128xbf16, #tpu.memory_space<vmem>>, vector<384x128xbf16>
    %cst = arith.constant dense<0.000000e+00> : vector<128x128xf32>
    %6 = tpu.matmul %4, %5, %cst {dimension_numbers = #tpu.dot_dimension_numbers<[1], [0], [0], [1], [0, 0, 1, 1], [], []>} : vector<128x384xbf16>, vector<384x128xbf16>, vector<128x128xf32> -> vector<128x128xf32>
    %7 = arith.addf %3, %6 : vector<128x128xf32>
    %c0_6 = arith.constant 0 : index
    %c0_7 = arith.constant 0 : index
    %8 = vector.load %arg6[%c0_6, %c0_7] : memref<128x128xf32, #tpu.memory_space<vmem>>, vector<128x128xf32>
    tpu.vector_store %arg6[%c0_6, %c0_7], %7 {strides = array<i32>} : memref<128x128xf32, #tpu.memory_space<vmem>>, vector<128x128xf32>,
    %c0_i32_8 = arith.constant 0 : i32
    %9 = arith.cmpi eq, %arg1, %c0_i32_8 : i32
    %10 = arith.extui %9 : i1 to i32
    %c0_i32_9 = arith.constant 0 : i32
    %11 = arith.cmpi ne, %10, %c0_i32_9 : i32
    scf.if %11 {
      %c0_10 = arith.constant 0 : index
      %c0_11 = arith.constant 0 : index
      %12 = vector.load %arg6[%c0_10, %c0_11] : memref<128x128xf32, #tpu.memory_space<vmem>>, vector<128x128xf32>
      %c0_12 = arith.constant 0 : index
      %c0_13 = arith.constant 0 : index
      %13 = vector.load %arg4[%c0_12, %c0_13] : memref<1x128xf32, #tpu.memory_space<vmem>>, vector<1x128xf32>
      %14 = vector.broadcast %13 : vector<1x128xf32> to vector<128x128xf32>
      %15 = arith.addf %12, %14 : vector<128x128xf32>
      %cst_14 = arith.constant 0.000000e+00 : f32
      %16 = vector.broadcast %cst_14 : f32 to vector<128x128xf32>
      %17 = arith.maximumf %15, %16 : vector<128x128xf32>
      %18 = arith.truncf %17 : vector<128x128xf32> to vector<128x128xbf16>
      %c0_15 = arith.constant 0 : index
      %c0_16 = arith.constant 0 : index
      %19 = vector.load %arg5[%c0_15, %c0_16] : memref<128x128xbf16, #tpu.memory_space<vmem>>, vector<128x128xbf16>
      tpu.vector_store %arg5[%c0_15, %c0_16], %18 {strides = array<i32>} : memref<128x128xbf16, #tpu.memory_space<vmem>>, vector<128x128xbf16>,
    } else {
    }
    return
  }
  func.func @transform_0(%arg0: i32, %arg1: i32) -> (i32, i32) {
    %c0_i32 = arith.constant 0 : i32
    return %arg0, %arg1 : i32, i32
  }
  func.func @transform_1(%arg0: i32, %arg1: i32) -> (i32, i32) {
    %c0_i32 = arith.constant 0 : i32
    %c0_i32_0 = arith.constant 0 : i32
    return %arg1, %c0_i32 : i32, i32
  }
  func.func @transform_2(%arg0: i32, %arg1: i32) -> (i32, i32) {
    %c0_i32 = arith.constant 0 : i32
    %c0_i32_0 = arith.constant 0 : i32
    %c0_i32_1 = arith.constant 0 : i32
    return %c0_i32, %c0_i32_0 : i32, i32
  }
  func.func @transform_3(%arg0: i32, %arg1: i32) -> (i32, i32) {
    %c0_i32 = arith.constant 0 : i32
    %c0_i32_0 = arith.constant 0 : i32
    return %arg0, %c0_i32 : i32, i32
  }
}

module attributes {stable_mosaic.version = 11 : i64} {
  func.func @_block_kernel(%arg0: i32, %arg1: memref<1x4x5x5x128xbf16, #tpu.memory_space<vmem>>, %arg2: memref<3x3x128x128xbf16, #tpu.memory_space<vmem>>, %arg3: memref<1x128xf32, #tpu.memory_space<vmem>>, %arg4: memref<1x128xf32, #tpu.memory_space<vmem>>, %arg5: memref<128x128xbf16, #tpu.memory_space<vmem>>, %arg6: memref<1x128xf32, #tpu.memory_space<vmem>>, %arg7: memref<3x3x128x128xbf16, #tpu.memory_space<vmem>>, %arg8: memref<1x128xf32, #tpu.memory_space<vmem>>, %arg9: memref<1x128xf32, #tpu.memory_space<vmem>>, %arg10: memref<1x16x128xbf16, #tpu.memory_space<vmem>>, %arg11: memref<6x6x128xbf16, #tpu.memory_space<vmem>>) attributes {dimension_semantics = [#tpu.dimension_semantics<parallel>], iteration_bounds = array<i64: 2>, scalar_prefetch = 0 : i64, scratch_operands = 1 : i64, tpu.core_type = #tpu.core_type<tc>, window_params = [{transform_indices = @transform_0, window_bounds = array<i64: 1, 4, 5, 5, 128>}, {pipeline_mode = #tpu.pipeline_mode<synchronous>, transform_indices = @transform_1, window_bounds = array<i64: 3, 3, 128, 128>}, {pipeline_mode = #tpu.pipeline_mode<synchronous>, transform_indices = @transform_2, window_bounds = array<i64: 1, 128>}, {pipeline_mode = #tpu.pipeline_mode<synchronous>, transform_indices = @transform_3, window_bounds = array<i64: 1, 128>}, {pipeline_mode = #tpu.pipeline_mode<synchronous>, transform_indices = @transform_4, window_bounds = array<i64: 128, 128>}, {pipeline_mode = #tpu.pipeline_mode<synchronous>, transform_indices = @transform_5, window_bounds = array<i64: 1, 128>}, {pipeline_mode = #tpu.pipeline_mode<synchronous>, transform_indices = @transform_6, window_bounds = array<i64: 3, 3, 128, 128>}, {pipeline_mode = #tpu.pipeline_mode<synchronous>, transform_indices = @transform_7, window_bounds = array<i64: 1, 128>}, {pipeline_mode = #tpu.pipeline_mode<synchronous>, transform_indices = @transform_8, window_bounds = array<i64: 1, 128>}, {transform_indices = @transform_9, window_bounds = array<i64: 1, 16, 128>}]} {
    %cst = arith.constant 0.000000e+00 : f32
    %0 = vector.broadcast %cst : f32 to vector<16x128xf32>
    %c0 = arith.constant 0 : index
    %c0_0 = arith.constant 0 : index
    %c0_1 = arith.constant 0 : index
    %c0_2 = arith.constant 0 : index
    %c0_3 = arith.constant 0 : index
    %1 = vector.load %arg1[%c0, %c0_0, %c0_1, %c0_2, %c0_3] : memref<1x4x5x5x128xbf16, #tpu.memory_space<vmem>>, vector<1x1x4x4x128xbf16>
    %2 = vector.shape_cast %1 : vector<1x1x4x4x128xbf16> to vector<4x4x128xbf16>
    %3 = vector.shape_cast %2 : vector<4x4x128xbf16> to vector<16x128xbf16>
    %c0_4 = arith.constant 0 : index
    %c0_5 = arith.constant 0 : index
    %c0_6 = arith.constant 0 : index
    %c0_7 = arith.constant 0 : index
    %4 = vector.load %arg2[%c0_4, %c0_5, %c0_6, %c0_7] : memref<3x3x128x128xbf16, #tpu.memory_space<vmem>>, vector<1x1x128x128xbf16>
    %5 = vector.shape_cast %4 : vector<1x1x128x128xbf16> to vector<128x128xbf16>
    %cst_8 = arith.constant dense<0.000000e+00> : vector<16x128xf32>
    %6 = tpu.matmul %3, %5, %cst_8 {dimension_numbers = #tpu.dot_dimension_numbers<[1], [0], [0], [1], [0, 0, 1, 1], [], []>} : vector<16x128xbf16>, vector<128x128xbf16>, vector<16x128xf32> -> vector<16x128xf32>
    %7 = arith.addf %0, %6 : vector<16x128xf32>
    %c0_9 = arith.constant 0 : index
    %c1 = arith.constant 1 : index
    %c0_10 = arith.constant 0 : index
    %c0_11 = arith.constant 0 : index
    %c0_12 = arith.constant 0 : index
    %8 = vector.load %arg1[%c0_9, %c1, %c0_10, %c0_11, %c0_12] : memref<1x4x5x5x128xbf16, #tpu.memory_space<vmem>>, vector<1x1x4x4x128xbf16>
    %9 = vector.shape_cast %8 : vector<1x1x4x4x128xbf16> to vector<4x4x128xbf16>
    %10 = vector.shape_cast %9 : vector<4x4x128xbf16> to vector<16x128xbf16>
    %c0_13 = arith.constant 0 : index
    %c1_14 = arith.constant 1 : index
    %c0_15 = arith.constant 0 : index
    %c0_16 = arith.constant 0 : index
    %11 = vector.load %arg2[%c0_13, %c1_14, %c0_15, %c0_16] : memref<3x3x128x128xbf16, #tpu.memory_space<vmem>>, vector<1x1x128x128xbf16>
    %12 = vector.shape_cast %11 : vector<1x1x128x128xbf16> to vector<128x128xbf16>
    %cst_17 = arith.constant dense<0.000000e+00> : vector<16x128xf32>
    %13 = tpu.matmul %10, %12, %cst_17 {dimension_numbers = #tpu.dot_dimension_numbers<[1], [0], [0], [1], [0, 0, 1, 1], [], []>} : vector<16x128xbf16>, vector<128x128xbf16>, vector<16x128xf32> -> vector<16x128xf32>
    %14 = arith.addf %7, %13 : vector<16x128xf32>
    %c0_18 = arith.constant 0 : index
    %c0_19 = arith.constant 0 : index
    %c0_20 = arith.constant 0 : index
    %c1_21 = arith.constant 1 : index
    %c0_22 = arith.constant 0 : index
    %15 = vector.load %arg1[%c0_18, %c0_19, %c0_20, %c1_21, %c0_22] : memref<1x4x5x5x128xbf16, #tpu.memory_space<vmem>>, vector<1x1x4x4x128xbf16>
    %16 = vector.shape_cast %15 : vector<1x1x4x4x128xbf16> to vector<4x4x128xbf16>
    %17 = vector.shape_cast %16 : vector<4x4x128xbf16> to vector<16x128xbf16>
    %c0_23 = arith.constant 0 : index
    %c2 = arith.constant 2 : index
    %c0_24 = arith.constant 0 : index
    %c0_25 = arith.constant 0 : index
    %18 = vector.load %arg2[%c0_23, %c2, %c0_24, %c0_25] : memref<3x3x128x128xbf16, #tpu.memory_space<vmem>>, vector<1x1x128x128xbf16>
    %19 = vector.shape_cast %18 : vector<1x1x128x128xbf16> to vector<128x128xbf16>
    %cst_26 = arith.constant dense<0.000000e+00> : vector<16x128xf32>
    %20 = tpu.matmul %17, %19, %cst_26 {dimension_numbers = #tpu.dot_dimension_numbers<[1], [0], [0], [1], [0, 0, 1, 1], [], []>} : vector<16x128xbf16>, vector<128x128xbf16>, vector<16x128xf32> -> vector<16x128xf32>
    %21 = arith.addf %14, %20 : vector<16x128xf32>
    %c0_27 = arith.constant 0 : index
    %c2_28 = arith.constant 2 : index
    %c0_29 = arith.constant 0 : index
    %c0_30 = arith.constant 0 : index
    %c0_31 = arith.constant 0 : index
    %22 = vector.load %arg1[%c0_27, %c2_28, %c0_29, %c0_30, %c0_31] : memref<1x4x5x5x128xbf16, #tpu.memory_space<vmem>>, vector<1x1x4x4x128xbf16>
    %23 = vector.shape_cast %22 : vector<1x1x4x4x128xbf16> to vector<4x4x128xbf16>
    %24 = vector.shape_cast %23 : vector<4x4x128xbf16> to vector<16x128xbf16>
    %c1_32 = arith.constant 1 : index
    %c0_33 = arith.constant 0 : index
    %c0_34 = arith.constant 0 : index
    %c0_35 = arith.constant 0 : index
    %25 = vector.load %arg2[%c1_32, %c0_33, %c0_34, %c0_35] : memref<3x3x128x128xbf16, #tpu.memory_space<vmem>>, vector<1x1x128x128xbf16>
    %26 = vector.shape_cast %25 : vector<1x1x128x128xbf16> to vector<128x128xbf16>
    %cst_36 = arith.constant dense<0.000000e+00> : vector<16x128xf32>
    %27 = tpu.matmul %24, %26, %cst_36 {dimension_numbers = #tpu.dot_dimension_numbers<[1], [0], [0], [1], [0, 0, 1, 1], [], []>} : vector<16x128xbf16>, vector<128x128xbf16>, vector<16x128xf32> -> vector<16x128xf32>
    %28 = arith.addf %21, %27 : vector<16x128xf32>
    %c0_37 = arith.constant 0 : index
    %c3 = arith.constant 3 : index
    %c0_38 = arith.constant 0 : index
    %c0_39 = arith.constant 0 : index
    %c0_40 = arith.constant 0 : index
    %29 = vector.load %arg1[%c0_37, %c3, %c0_38, %c0_39, %c0_40] : memref<1x4x5x5x128xbf16, #tpu.memory_space<vmem>>, vector<1x1x4x4x128xbf16>
    %30 = vector.shape_cast %29 : vector<1x1x4x4x128xbf16> to vector<4x4x128xbf16>
    %31 = vector.shape_cast %30 : vector<4x4x128xbf16> to vector<16x128xbf16>
    %c1_41 = arith.constant 1 : index
    %c1_42 = arith.constant 1 : index
    %c0_43 = arith.constant 0 : index
    %c0_44 = arith.constant 0 : index
    %32 = vector.load %arg2[%c1_41, %c1_42, %c0_43, %c0_44] : memref<3x3x128x128xbf16, #tpu.memory_space<vmem>>, vector<1x1x128x128xbf16>
    %33 = vector.shape_cast %32 : vector<1x1x128x128xbf16> to vector<128x128xbf16>
    %cst_45 = arith.constant dense<0.000000e+00> : vector<16x128xf32>
    %34 = tpu.matmul %31, %33, %cst_45 {dimension_numbers = #tpu.dot_dimension_numbers<[1], [0], [0], [1], [0, 0, 1, 1], [], []>} : vector<16x128xbf16>, vector<128x128xbf16>, vector<16x128xf32> -> vector<16x128xf32>
    %35 = arith.addf %28, %34 : vector<16x128xf32>
    %c0_46 = arith.constant 0 : index
    %c2_47 = arith.constant 2 : index
    %c0_48 = arith.constant 0 : index
    %c1_49 = arith.constant 1 : index
    %c0_50 = arith.constant 0 : index
    %36 = vector.load %arg1[%c0_46, %c2_47, %c0_48, %c1_49, %c0_50] : memref<1x4x5x5x128xbf16, #tpu.memory_space<vmem>>, vector<1x1x4x4x128xbf16>
    %37 = vector.shape_cast %36 : vector<1x1x4x4x128xbf16> to vector<4x4x128xbf16>
    %38 = vector.shape_cast %37 : vector<4x4x128xbf16> to vector<16x128xbf16>
    %c1_51 = arith.constant 1 : index
    %c2_52 = arith.constant 2 : index
    %c0_53 = arith.constant 0 : index
    %c0_54 = arith.constant 0 : index
    %39 = vector.load %arg2[%c1_51, %c2_52, %c0_53, %c0_54] : memref<3x3x128x128xbf16, #tpu.memory_space<vmem>>, vector<1x1x128x128xbf16>
    %40 = vector.shape_cast %39 : vector<1x1x128x128xbf16> to vector<128x128xbf16>
    %cst_55 = arith.constant dense<0.000000e+00> : vector<16x128xf32>
    %41 = tpu.matmul %38, %40, %cst_55 {dimension_numbers = #tpu.dot_dimension_numbers<[1], [0], [0], [1], [0, 0, 1, 1], [], []>} : vector<16x128xbf16>, vector<128x128xbf16>, vector<16x128xf32> -> vector<16x128xf32>
    %42 = arith.addf %35, %41 : vector<16x128xf32>
    %c0_56 = arith.constant 0 : index
    %c0_57 = arith.constant 0 : index
    %c1_58 = arith.constant 1 : index
    %c0_59 = arith.constant 0 : index
    %c0_60 = arith.constant 0 : index
    %43 = vector.load %arg1[%c0_56, %c0_57, %c1_58, %c0_59, %c0_60] : memref<1x4x5x5x128xbf16, #tpu.memory_space<vmem>>, vector<1x1x4x4x128xbf16>
    %44 = vector.shape_cast %43 : vector<1x1x4x4x128xbf16> to vector<4x4x128xbf16>
    %45 = vector.shape_cast %44 : vector<4x4x128xbf16> to vector<16x128xbf16>
    %c2_61 = arith.constant 2 : index
    %c0_62 = arith.constant 0 : index
    %c0_63 = arith.constant 0 : index
    %c0_64 = arith.constant 0 : index
    %46 = vector.load %arg2[%c2_61, %c0_62, %c0_63, %c0_64] : memref<3x3x128x128xbf16, #tpu.memory_space<vmem>>, vector<1x1x128x128xbf16>
    %47 = vector.shape_cast %46 : vector<1x1x128x128xbf16> to vector<128x128xbf16>
    %cst_65 = arith.constant dense<0.000000e+00> : vector<16x128xf32>
    %48 = tpu.matmul %45, %47, %cst_65 {dimension_numbers = #tpu.dot_dimension_numbers<[1], [0], [0], [1], [0, 0, 1, 1], [], []>} : vector<16x128xbf16>, vector<128x128xbf16>, vector<16x128xf32> -> vector<16x128xf32>
    %49 = arith.addf %42, %48 : vector<16x128xf32>
    %c0_66 = arith.constant 0 : index
    %c1_67 = arith.constant 1 : index
    %c1_68 = arith.constant 1 : index
    %c0_69 = arith.constant 0 : index
    %c0_70 = arith.constant 0 : index
    %50 = vector.load %arg1[%c0_66, %c1_67, %c1_68, %c0_69, %c0_70] : memref<1x4x5x5x128xbf16, #tpu.memory_space<vmem>>, vector<1x1x4x4x128xbf16>
    %51 = vector.shape_cast %50 : vector<1x1x4x4x128xbf16> to vector<4x4x128xbf16>
    %52 = vector.shape_cast %51 : vector<4x4x128xbf16> to vector<16x128xbf16>
    %c2_71 = arith.constant 2 : index
    %c1_72 = arith.constant 1 : index
    %c0_73 = arith.constant 0 : index
    %c0_74 = arith.constant 0 : index
    %53 = vector.load %arg2[%c2_71, %c1_72, %c0_73, %c0_74] : memref<3x3x128x128xbf16, #tpu.memory_space<vmem>>, vector<1x1x128x128xbf16>
    %54 = vector.shape_cast %53 : vector<1x1x128x128xbf16> to vector<128x128xbf16>
    %cst_75 = arith.constant dense<0.000000e+00> : vector<16x128xf32>
    %55 = tpu.matmul %52, %54, %cst_75 {dimension_numbers = #tpu.dot_dimension_numbers<[1], [0], [0], [1], [0, 0, 1, 1], [], []>} : vector<16x128xbf16>, vector<128x128xbf16>, vector<16x128xf32> -> vector<16x128xf32>
    %56 = arith.addf %49, %55 : vector<16x128xf32>
    %c0_76 = arith.constant 0 : index
    %c0_77 = arith.constant 0 : index
    %c1_78 = arith.constant 1 : index
    %c1_79 = arith.constant 1 : index
    %c0_80 = arith.constant 0 : index
    %57 = vector.load %arg1[%c0_76, %c0_77, %c1_78, %c1_79, %c0_80] : memref<1x4x5x5x128xbf16, #tpu.memory_space<vmem>>, vector<1x1x4x4x128xbf16>
    %58 = vector.shape_cast %57 : vector<1x1x4x4x128xbf16> to vector<4x4x128xbf16>
    %59 = vector.shape_cast %58 : vector<4x4x128xbf16> to vector<16x128xbf16>
    %c2_81 = arith.constant 2 : index
    %c2_82 = arith.constant 2 : index
    %c0_83 = arith.constant 0 : index
    %c0_84 = arith.constant 0 : index
    %60 = vector.load %arg2[%c2_81, %c2_82, %c0_83, %c0_84] : memref<3x3x128x128xbf16, #tpu.memory_space<vmem>>, vector<1x1x128x128xbf16>
    %61 = vector.shape_cast %60 : vector<1x1x128x128xbf16> to vector<128x128xbf16>
    %cst_85 = arith.constant dense<0.000000e+00> : vector<16x128xf32>
    %62 = tpu.matmul %59, %61, %cst_85 {dimension_numbers = #tpu.dot_dimension_numbers<[1], [0], [0], [1], [0, 0, 1, 1], [], []>} : vector<16x128xbf16>, vector<128x128xbf16>, vector<16x128xf32> -> vector<16x128xf32>
    %63 = arith.addf %56, %62 : vector<16x128xf32>
    %c0_86 = arith.constant 0 : index
    %c0_87 = arith.constant 0 : index
    %64 = vector.load %arg3[%c0_86, %c0_87] : memref<1x128xf32, #tpu.memory_space<vmem>>, vector<1x128xf32>
    %65 = vector.broadcast %64 : vector<1x128xf32> to vector<16x128xf32>
    %66 = arith.mulf %63, %65 : vector<16x128xf32>
    %c0_88 = arith.constant 0 : index
    %c0_89 = arith.constant 0 : index
    %67 = vector.load %arg4[%c0_88, %c0_89] : memref<1x128xf32, #tpu.memory_space<vmem>>, vector<1x128xf32>
    %68 = vector.broadcast %67 : vector<1x128xf32> to vector<16x128xf32>
    %69 = arith.addf %66, %68 : vector<16x128xf32>
    %cst_90 = arith.constant 0.000000e+00 : f32
    %70 = vector.broadcast %cst_90 : f32 to vector<16x128xf32>
    %71 = arith.maximumf %69, %70 : vector<16x128xf32>
    %c0_91 = arith.constant 0 : index
    %c3_92 = arith.constant 3 : index
    %c0_93 = arith.constant 0 : index
    %c0_94 = arith.constant 0 : index
    %c0_95 = arith.constant 0 : index
    %72 = vector.load %arg1[%c0_91, %c3_92, %c0_93, %c0_94, %c0_95] : memref<1x4x5x5x128xbf16, #tpu.memory_space<vmem>>, vector<1x1x4x4x128xbf16>
    %73 = vector.shape_cast %72 : vector<1x1x4x4x128xbf16> to vector<4x4x128xbf16>
    %74 = vector.shape_cast %73 : vector<4x4x128xbf16> to vector<16x128xbf16>
    %c0_96 = arith.constant 0 : index
    %c0_97 = arith.constant 0 : index
    %75 = vector.load %arg5[%c0_96, %c0_97] : memref<128x128xbf16, #tpu.memory_space<vmem>>, vector<128x128xbf16>
    %cst_98 = arith.constant dense<0.000000e+00> : vector<16x128xf32>
    %76 = tpu.matmul %74, %75, %cst_98 {dimension_numbers = #tpu.dot_dimension_numbers<[1], [0], [0], [1], [0, 0, 1, 1], [], []>} : vector<16x128xbf16>, vector<128x128xbf16>, vector<16x128xf32> -> vector<16x128xf32>
    %c0_99 = arith.constant 0 : index
    %c0_100 = arith.constant 0 : index
    %77 = vector.load %arg6[%c0_99, %c0_100] : memref<1x128xf32, #tpu.memory_space<vmem>>, vector<1x128xf32>
    %78 = vector.broadcast %77 : vector<1x128xf32> to vector<16x128xf32>
    %79 = arith.addf %76, %78 : vector<16x128xf32>
    %cst_101 = arith.constant 0.000000e+00 : bf16
    %80 = vector.broadcast %cst_101 : bf16 to vector<6x6x128xbf16>
    %c0_102 = arith.constant 0 : index
    %c0_103 = arith.constant 0 : index
    %c0_104 = arith.constant 0 : index
    %81 = vector.load %arg11[%c0_102, %c0_103, %c0_104] : memref<6x6x128xbf16, #tpu.memory_space<vmem>>, vector<6x6x128xbf16>
    tpu.vector_store %arg11[%c0_102, %c0_103, %c0_104], %80 {strides = array<i32>} : memref<6x6x128xbf16, #tpu.memory_space<vmem>>, vector<6x6x128xbf16>,
    %82 = arith.truncf %71 : vector<16x128xf32> to vector<16x128xbf16>
    %83 = vector.extract_strided_slice %82 {offsets = [0, 0], sizes = [4, 128], strides = [1, 1]} : vector<16x128xbf16> to vector<4x128xbf16>
    %c1_105 = arith.constant 1 : index
    %c1_106 = arith.constant 1 : index
    %c0_107 = arith.constant 0 : index
    %84 = vector.load %arg11[%c1_105, %c1_106, %c0_107] : memref<6x6x128xbf16, #tpu.memory_space<vmem>>, vector<1x4x128xbf16>
    %85 = vector.shape_cast %84 : vector<1x4x128xbf16> to vector<4x128xbf16>
    %86 = vector.shape_cast %83 : vector<4x128xbf16> to vector<1x4x128xbf16>
    tpu.vector_store %arg11[%c1_105, %c1_106, %c0_107], %86 {strides = array<i32>} : memref<6x6x128xbf16, #tpu.memory_space<vmem>>, vector<1x4x128xbf16>,
    %87 = vector.extract_strided_slice %82 {offsets = [4, 0], sizes = [4, 128], strides = [1, 1]} : vector<16x128xbf16> to vector<4x128xbf16>
    %c2_108 = arith.constant 2 : index
    %c1_109 = arith.constant 1 : index
    %c0_110 = arith.constant 0 : index
    %88 = vector.load %arg11[%c2_108, %c1_109, %c0_110] : memref<6x6x128xbf16, #tpu.memory_space<vmem>>, vector<1x4x128xbf16>
    %89 = vector.shape_cast %88 : vector<1x4x128xbf16> to vector<4x128xbf16>
    %90 = vector.shape_cast %87 : vector<4x128xbf16> to vector<1x4x128xbf16>
    tpu.vector_store %arg11[%c2_108, %c1_109, %c0_110], %90 {strides = array<i32>} : memref<6x6x128xbf16, #tpu.memory_space<vmem>>, vector<1x4x128xbf16>,
    %91 = vector.extract_strided_slice %82 {offsets = [8, 0], sizes = [4, 128], strides = [1, 1]} : vector<16x128xbf16> to vector<4x128xbf16>
    %c3_111 = arith.constant 3 : index
    %c1_112 = arith.constant 1 : index
    %c0_113 = arith.constant 0 : index
    %92 = vector.load %arg11[%c3_111, %c1_112, %c0_113] : memref<6x6x128xbf16, #tpu.memory_space<vmem>>, vector<1x4x128xbf16>
    %93 = vector.shape_cast %92 : vector<1x4x128xbf16> to vector<4x128xbf16>
    %94 = vector.shape_cast %91 : vector<4x128xbf16> to vector<1x4x128xbf16>
    tpu.vector_store %arg11[%c3_111, %c1_112, %c0_113], %94 {strides = array<i32>} : memref<6x6x128xbf16, #tpu.memory_space<vmem>>, vector<1x4x128xbf16>,
    %95 = vector.extract_strided_slice %82 {offsets = [12, 0], sizes = [4, 128], strides = [1, 1]} : vector<16x128xbf16> to vector<4x128xbf16>
    %c4 = arith.constant 4 : index
    %c1_114 = arith.constant 1 : index
    %c0_115 = arith.constant 0 : index
    %96 = vector.load %arg11[%c4, %c1_114, %c0_115] : memref<6x6x128xbf16, #tpu.memory_space<vmem>>, vector<1x4x128xbf16>
    %97 = vector.shape_cast %96 : vector<1x4x128xbf16> to vector<4x128xbf16>
    %98 = vector.shape_cast %95 : vector<4x128xbf16> to vector<1x4x128xbf16>
    tpu.vector_store %arg11[%c4, %c1_114, %c0_115], %98 {strides = array<i32>} : memref<6x6x128xbf16, #tpu.memory_space<vmem>>, vector<1x4x128xbf16>,
    %cst_116 = arith.constant 0.000000e+00 : f32
    %99 = vector.broadcast %cst_116 : f32 to vector<16x128xf32>
    %c0_117 = arith.constant 0 : index
    %c0_118 = arith.constant 0 : index
    %c0_119 = arith.constant 0 : index
    %100 = vector.load %arg11[%c0_117, %c0_118, %c0_119] : memref<6x6x128xbf16, #tpu.memory_space<vmem>>, vector<4x4x128xbf16>
    %101 = vector.shape_cast %100 : vector<4x4x128xbf16> to vector<16x128xbf16>
    %c0_120 = arith.constant 0 : index
    %c0_121 = arith.constant 0 : index
    %c0_122 = arith.constant 0 : index
    %c0_123 = arith.constant 0 : index
    %102 = vector.load %arg7[%c0_120, %c0_121, %c0_122, %c0_123] : memref<3x3x128x128xbf16, #tpu.memory_space<vmem>>, vector<1x1x128x128xbf16>
    %103 = vector.shape_cast %102 : vector<1x1x128x128xbf16> to vector<128x128xbf16>
    %cst_124 = arith.constant dense<0.000000e+00> : vector<16x128xf32>
    %104 = tpu.matmul %101, %103, %cst_124 {dimension_numbers = #tpu.dot_dimension_numbers<[1], [0], [0], [1], [0, 0, 1, 1], [], []>} : vector<16x128xbf16>, vector<128x128xbf16>, vector<16x128xf32> -> vector<16x128xf32>
    %105 = arith.addf %99, %104 : vector<16x128xf32>
    %c0_125 = arith.constant 0 : index
    %c1_126 = arith.constant 1 : index
    %c0_127 = arith.constant 0 : index
    %106 = vector.load %arg11[%c0_125, %c1_126, %c0_127] : memref<6x6x128xbf16, #tpu.memory_space<vmem>>, vector<4x4x128xbf16>
    %107 = vector.shape_cast %106 : vector<4x4x128xbf16> to vector<16x128xbf16>
    %c0_128 = arith.constant 0 : index
    %c1_129 = arith.constant 1 : index
    %c0_130 = arith.constant 0 : index
    %c0_131 = arith.constant 0 : index
    %108 = vector.load %arg7[%c0_128, %c1_129, %c0_130, %c0_131] : memref<3x3x128x128xbf16, #tpu.memory_space<vmem>>, vector<1x1x128x128xbf16>
    %109 = vector.shape_cast %108 : vector<1x1x128x128xbf16> to vector<128x128xbf16>
    %cst_132 = arith.constant dense<0.000000e+00> : vector<16x128xf32>
    %110 = tpu.matmul %107, %109, %cst_132 {dimension_numbers = #tpu.dot_dimension_numbers<[1], [0], [0], [1], [0, 0, 1, 1], [], []>} : vector<16x128xbf16>, vector<128x128xbf16>, vector<16x128xf32> -> vector<16x128xf32>
    %111 = arith.addf %105, %110 : vector<16x128xf32>
    %c0_133 = arith.constant 0 : index
    %c2_134 = arith.constant 2 : index
    %c0_135 = arith.constant 0 : index
    %112 = vector.load %arg11[%c0_133, %c2_134, %c0_135] : memref<6x6x128xbf16, #tpu.memory_space<vmem>>, vector<4x4x128xbf16>
    %113 = vector.shape_cast %112 : vector<4x4x128xbf16> to vector<16x128xbf16>
    %c0_136 = arith.constant 0 : index
    %c2_137 = arith.constant 2 : index
    %c0_138 = arith.constant 0 : index
    %c0_139 = arith.constant 0 : index
    %114 = vector.load %arg7[%c0_136, %c2_137, %c0_138, %c0_139] : memref<3x3x128x128xbf16, #tpu.memory_space<vmem>>, vector<1x1x128x128xbf16>
    %115 = vector.shape_cast %114 : vector<1x1x128x128xbf16> to vector<128x128xbf16>
    %cst_140 = arith.constant dense<0.000000e+00> : vector<16x128xf32>
    %116 = tpu.matmul %113, %115, %cst_140 {dimension_numbers = #tpu.dot_dimension_numbers<[1], [0], [0], [1], [0, 0, 1, 1], [], []>} : vector<16x128xbf16>, vector<128x128xbf16>, vector<16x128xf32> -> vector<16x128xf32>
    %117 = arith.addf %111, %116 : vector<16x128xf32>
    %c1_141 = arith.constant 1 : index
    %c0_142 = arith.constant 0 : index
    %c0_143 = arith.constant 0 : index
    %118 = vector.load %arg11[%c1_141, %c0_142, %c0_143] : memref<6x6x128xbf16, #tpu.memory_space<vmem>>, vector<4x4x128xbf16>
    %119 = vector.shape_cast %118 : vector<4x4x128xbf16> to vector<16x128xbf16>
    %c1_144 = arith.constant 1 : index
    %c0_145 = arith.constant 0 : index
    %c0_146 = arith.constant 0 : index
    %c0_147 = arith.constant 0 : index
    %120 = vector.load %arg7[%c1_144, %c0_145, %c0_146, %c0_147] : memref<3x3x128x128xbf16, #tpu.memory_space<vmem>>, vector<1x1x128x128xbf16>
    %121 = vector.shape_cast %120 : vector<1x1x128x128xbf16> to vector<128x128xbf16>
    %cst_148 = arith.constant dense<0.000000e+00> : vector<16x128xf32>
    %122 = tpu.matmul %119, %121, %cst_148 {dimension_numbers = #tpu.dot_dimension_numbers<[1], [0], [0], [1], [0, 0, 1, 1], [], []>} : vector<16x128xbf16>, vector<128x128xbf16>, vector<16x128xf32> -> vector<16x128xf32>
    %123 = arith.addf %117, %122 : vector<16x128xf32>
    %c1_149 = arith.constant 1 : index
    %c1_150 = arith.constant 1 : index
    %c0_151 = arith.constant 0 : index
    %124 = vector.load %arg11[%c1_149, %c1_150, %c0_151] : memref<6x6x128xbf16, #tpu.memory_space<vmem>>, vector<4x4x128xbf16>
    %125 = vector.shape_cast %124 : vector<4x4x128xbf16> to vector<16x128xbf16>
    %c1_152 = arith.constant 1 : index
    %c1_153 = arith.constant 1 : index
    %c0_154 = arith.constant 0 : index
    %c0_155 = arith.constant 0 : index
    %126 = vector.load %arg7[%c1_152, %c1_153, %c0_154, %c0_155] : memref<3x3x128x128xbf16, #tpu.memory_space<vmem>>, vector<1x1x128x128xbf16>
    %127 = vector.shape_cast %126 : vector<1x1x128x128xbf16> to vector<128x128xbf16>
    %cst_156 = arith.constant dense<0.000000e+00> : vector<16x128xf32>
    %128 = tpu.matmul %125, %127, %cst_156 {dimension_numbers = #tpu.dot_dimension_numbers<[1], [0], [0], [1], [0, 0, 1, 1], [], []>} : vector<16x128xbf16>, vector<128x128xbf16>, vector<16x128xf32> -> vector<16x128xf32>
    %129 = arith.addf %123, %128 : vector<16x128xf32>
    %c1_157 = arith.constant 1 : index
    %c2_158 = arith.constant 2 : index
    %c0_159 = arith.constant 0 : index
    %130 = vector.load %arg11[%c1_157, %c2_158, %c0_159] : memref<6x6x128xbf16, #tpu.memory_space<vmem>>, vector<4x4x128xbf16>
    %131 = vector.shape_cast %130 : vector<4x4x128xbf16> to vector<16x128xbf16>
    %c1_160 = arith.constant 1 : index
    %c2_161 = arith.constant 2 : index
    %c0_162 = arith.constant 0 : index
    %c0_163 = arith.constant 0 : index
    %132 = vector.load %arg7[%c1_160, %c2_161, %c0_162, %c0_163] : memref<3x3x128x128xbf16, #tpu.memory_space<vmem>>, vector<1x1x128x128xbf16>
    %133 = vector.shape_cast %132 : vector<1x1x128x128xbf16> to vector<128x128xbf16>
    %cst_164 = arith.constant dense<0.000000e+00> : vector<16x128xf32>
    %134 = tpu.matmul %131, %133, %cst_164 {dimension_numbers = #tpu.dot_dimension_numbers<[1], [0], [0], [1], [0, 0, 1, 1], [], []>} : vector<16x128xbf16>, vector<128x128xbf16>, vector<16x128xf32> -> vector<16x128xf32>
    %135 = arith.addf %129, %134 : vector<16x128xf32>
    %c2_165 = arith.constant 2 : index
    %c0_166 = arith.constant 0 : index
    %c0_167 = arith.constant 0 : index
    %136 = vector.load %arg11[%c2_165, %c0_166, %c0_167] : memref<6x6x128xbf16, #tpu.memory_space<vmem>>, vector<4x4x128xbf16>
    %137 = vector.shape_cast %136 : vector<4x4x128xbf16> to vector<16x128xbf16>
    %c2_168 = arith.constant 2 : index
    %c0_169 = arith.constant 0 : index
    %c0_170 = arith.constant 0 : index
    %c0_171 = arith.constant 0 : index
    %138 = vector.load %arg7[%c2_168, %c0_169, %c0_170, %c0_171] : memref<3x3x128x128xbf16, #tpu.memory_space<vmem>>, vector<1x1x128x128xbf16>
    %139 = vector.shape_cast %138 : vector<1x1x128x128xbf16> to vector<128x128xbf16>
    %cst_172 = arith.constant dense<0.000000e+00> : vector<16x128xf32>
    %140 = tpu.matmul %137, %139, %cst_172 {dimension_numbers = #tpu.dot_dimension_numbers<[1], [0], [0], [1], [0, 0, 1, 1], [], []>} : vector<16x128xbf16>, vector<128x128xbf16>, vector<16x128xf32> -> vector<16x128xf32>
    %141 = arith.addf %135, %140 : vector<16x128xf32>
    %c2_173 = arith.constant 2 : index
    %c1_174 = arith.constant 1 : index
    %c0_175 = arith.constant 0 : index
    %142 = vector.load %arg11[%c2_173, %c1_174, %c0_175] : memref<6x6x128xbf16, #tpu.memory_space<vmem>>, vector<4x4x128xbf16>
    %143 = vector.shape_cast %142 : vector<4x4x128xbf16> to vector<16x128xbf16>
    %c2_176 = arith.constant 2 : index
    %c1_177 = arith.constant 1 : index
    %c0_178 = arith.constant 0 : index
    %c0_179 = arith.constant 0 : index
    %144 = vector.load %arg7[%c2_176, %c1_177, %c0_178, %c0_179] : memref<3x3x128x128xbf16, #tpu.memory_space<vmem>>, vector<1x1x128x128xbf16>
    %145 = vector.shape_cast %144 : vector<1x1x128x128xbf16> to vector<128x128xbf16>
    %cst_180 = arith.constant dense<0.000000e+00> : vector<16x128xf32>
    %146 = tpu.matmul %143, %145, %cst_180 {dimension_numbers = #tpu.dot_dimension_numbers<[1], [0], [0], [1], [0, 0, 1, 1], [], []>} : vector<16x128xbf16>, vector<128x128xbf16>, vector<16x128xf32> -> vector<16x128xf32>
    %147 = arith.addf %141, %146 : vector<16x128xf32>
    %c2_181 = arith.constant 2 : index
    %c2_182 = arith.constant 2 : index
    %c0_183 = arith.constant 0 : index
    %148 = vector.load %arg11[%c2_181, %c2_182, %c0_183] : memref<6x6x128xbf16, #tpu.memory_space<vmem>>, vector<4x4x128xbf16>
    %149 = vector.shape_cast %148 : vector<4x4x128xbf16> to vector<16x128xbf16>
    %c2_184 = arith.constant 2 : index
    %c2_185 = arith.constant 2 : index
    %c0_186 = arith.constant 0 : index
    %c0_187 = arith.constant 0 : index
    %150 = vector.load %arg7[%c2_184, %c2_185, %c0_186, %c0_187] : memref<3x3x128x128xbf16, #tpu.memory_space<vmem>>, vector<1x1x128x128xbf16>
    %151 = vector.shape_cast %150 : vector<1x1x128x128xbf16> to vector<128x128xbf16>
    %cst_188 = arith.constant dense<0.000000e+00> : vector<16x128xf32>
    %152 = tpu.matmul %149, %151, %cst_188 {dimension_numbers = #tpu.dot_dimension_numbers<[1], [0], [0], [1], [0, 0, 1, 1], [], []>} : vector<16x128xbf16>, vector<128x128xbf16>, vector<16x128xf32> -> vector<16x128xf32>
    %153 = arith.addf %147, %152 : vector<16x128xf32>
    %c0_189 = arith.constant 0 : index
    %c0_190 = arith.constant 0 : index
    %154 = vector.load %arg8[%c0_189, %c0_190] : memref<1x128xf32, #tpu.memory_space<vmem>>, vector<1x128xf32>
    %155 = vector.broadcast %154 : vector<1x128xf32> to vector<16x128xf32>
    %156 = arith.mulf %153, %155 : vector<16x128xf32>
    %c0_191 = arith.constant 0 : index
    %c0_192 = arith.constant 0 : index
    %157 = vector.load %arg9[%c0_191, %c0_192] : memref<1x128xf32, #tpu.memory_space<vmem>>, vector<1x128xf32>
    %158 = vector.broadcast %157 : vector<1x128xf32> to vector<16x128xf32>
    %159 = arith.addf %156, %158 : vector<16x128xf32>
    %cst_193 = arith.constant 0.000000e+00 : f32
    %160 = vector.broadcast %cst_193 : f32 to vector<16x128xf32>
    %161 = arith.maximumf %159, %160 : vector<16x128xf32>
    %162 = arith.addf %79, %161 : vector<16x128xf32>
    %163 = arith.truncf %162 : vector<16x128xf32> to vector<16x128xbf16>
    %c0_194 = arith.constant 0 : index
    %c0_195 = arith.constant 0 : index
    %c0_196 = arith.constant 0 : index
    %164 = vector.load %arg10[%c0_194, %c0_195, %c0_196] : memref<1x16x128xbf16, #tpu.memory_space<vmem>>, vector<1x16x128xbf16>
    %165 = vector.shape_cast %164 : vector<1x16x128xbf16> to vector<16x128xbf16>
    %166 = vector.shape_cast %163 : vector<16x128xbf16> to vector<1x16x128xbf16>
    tpu.vector_store %arg10[%c0_194, %c0_195, %c0_196], %166 {strides = array<i32>} : memref<1x16x128xbf16, #tpu.memory_space<vmem>>, vector<1x16x128xbf16>,
    return
  }
  func.func @transform_0(%arg0: i32) -> (i32, i32, i32, i32, i32) {
    %c0_i32 = arith.constant 0 : i32
    %c0_i32_0 = arith.constant 0 : i32
    %c0_i32_1 = arith.constant 0 : i32
    %c0_i32_2 = arith.constant 0 : i32
    %c0_i32_3 = arith.constant 0 : i32
    return %arg0, %c0_i32, %c0_i32_0, %c0_i32_1, %c0_i32_2 : i32, i32, i32, i32, i32
  }
  func.func @transform_1(%arg0: i32) -> (i32, i32, i32, i32) {
    %c0_i32 = arith.constant 0 : i32
    %c0_i32_0 = arith.constant 0 : i32
    %c0_i32_1 = arith.constant 0 : i32
    %c0_i32_2 = arith.constant 0 : i32
    %c0_i32_3 = arith.constant 0 : i32
    return %c0_i32, %c0_i32_0, %c0_i32_1, %c0_i32_2 : i32, i32, i32, i32
  }
  func.func @transform_2(%arg0: i32) -> (i32, i32) {
    %c0_i32 = arith.constant 0 : i32
    %c0_i32_0 = arith.constant 0 : i32
    %c0_i32_1 = arith.constant 0 : i32
    return %c0_i32, %c0_i32_0 : i32, i32
  }
  func.func @transform_3(%arg0: i32) -> (i32, i32) {
    %c0_i32 = arith.constant 0 : i32
    %c0_i32_0 = arith.constant 0 : i32
    %c0_i32_1 = arith.constant 0 : i32
    return %c0_i32, %c0_i32_0 : i32, i32
  }
  func.func @transform_4(%arg0: i32) -> (i32, i32) {
    %c0_i32 = arith.constant 0 : i32
    %c0_i32_0 = arith.constant 0 : i32
    %c0_i32_1 = arith.constant 0 : i32
    return %c0_i32, %c0_i32_0 : i32, i32
  }
  func.func @transform_5(%arg0: i32) -> (i32, i32) {
    %c0_i32 = arith.constant 0 : i32
    %c0_i32_0 = arith.constant 0 : i32
    %c0_i32_1 = arith.constant 0 : i32
    return %c0_i32, %c0_i32_0 : i32, i32
  }
  func.func @transform_6(%arg0: i32) -> (i32, i32, i32, i32) {
    %c0_i32 = arith.constant 0 : i32
    %c0_i32_0 = arith.constant 0 : i32
    %c0_i32_1 = arith.constant 0 : i32
    %c0_i32_2 = arith.constant 0 : i32
    %c0_i32_3 = arith.constant 0 : i32
    return %c0_i32, %c0_i32_0, %c0_i32_1, %c0_i32_2 : i32, i32, i32, i32
  }
  func.func @transform_7(%arg0: i32) -> (i32, i32) {
    %c0_i32 = arith.constant 0 : i32
    %c0_i32_0 = arith.constant 0 : i32
    %c0_i32_1 = arith.constant 0 : i32
    return %c0_i32, %c0_i32_0 : i32, i32
  }
  func.func @transform_8(%arg0: i32) -> (i32, i32) {
    %c0_i32 = arith.constant 0 : i32
    %c0_i32_0 = arith.constant 0 : i32
    %c0_i32_1 = arith.constant 0 : i32
    return %c0_i32, %c0_i32_0 : i32, i32
  }
  func.func @transform_9(%arg0: i32) -> (i32, i32, i32) {
    %c0_i32 = arith.constant 0 : i32
    %c0_i32_0 = arith.constant 0 : i32
    %c0_i32_1 = arith.constant 0 : i32
    return %arg0, %c0_i32, %c0_i32_0 : i32, i32, i32
  }
}

module attributes {stable_mosaic.version = 11 : i64} {
  func.func @_block_kernel(%arg0: i32, %arg1: memref<1x4x3x3x128xbf16, #tpu.memory_space<vmem>>, %arg2: memref<3x3x128x256xbf16, #tpu.memory_space<vmem>>, %arg3: memref<1x256xf32, #tpu.memory_space<vmem>>, %arg4: memref<1x256xf32, #tpu.memory_space<vmem>>, %arg5: memref<128x256xbf16, #tpu.memory_space<vmem>>, %arg6: memref<1x256xf32, #tpu.memory_space<vmem>>, %arg7: memref<3x3x256x256xbf16, #tpu.memory_space<vmem>>, %arg8: memref<1x256xf32, #tpu.memory_space<vmem>>, %arg9: memref<1x256xf32, #tpu.memory_space<vmem>>, %arg10: memref<256x128xbf16, #tpu.memory_space<vmem>>, %arg11: memref<1x128xf32, #tpu.memory_space<vmem>>, %arg12: memref<1x1x128xf32, #tpu.memory_space<vmem>>, %arg13: memref<4x4x256xbf16, #tpu.memory_space<vmem>>) attributes {dimension_semantics = [#tpu.dimension_semantics<parallel>], iteration_bounds = array<i64: 2>, scalar_prefetch = 0 : i64, scratch_operands = 1 : i64, tpu.core_type = #tpu.core_type<tc>, window_params = [{transform_indices = @transform_0, window_bounds = array<i64: 1, 4, 3, 3, 128>}, {pipeline_mode = #tpu.pipeline_mode<synchronous>, transform_indices = @transform_1, window_bounds = array<i64: 3, 3, 128, 256>}, {pipeline_mode = #tpu.pipeline_mode<synchronous>, transform_indices = @transform_2, window_bounds = array<i64: 1, 256>}, {pipeline_mode = #tpu.pipeline_mode<synchronous>, transform_indices = @transform_3, window_bounds = array<i64: 1, 256>}, {pipeline_mode = #tpu.pipeline_mode<synchronous>, transform_indices = @transform_4, window_bounds = array<i64: 128, 256>}, {pipeline_mode = #tpu.pipeline_mode<synchronous>, transform_indices = @transform_5, window_bounds = array<i64: 1, 256>}, {pipeline_mode = #tpu.pipeline_mode<synchronous>, transform_indices = @transform_6, window_bounds = array<i64: 3, 3, 256, 256>}, {pipeline_mode = #tpu.pipeline_mode<synchronous>, transform_indices = @transform_7, window_bounds = array<i64: 1, 256>}, {pipeline_mode = #tpu.pipeline_mode<synchronous>, transform_indices = @transform_8, window_bounds = array<i64: 1, 256>}, {pipeline_mode = #tpu.pipeline_mode<synchronous>, transform_indices = @transform_9, window_bounds = array<i64: 256, 128>}, {pipeline_mode = #tpu.pipeline_mode<synchronous>, transform_indices = @transform_10, window_bounds = array<i64: 1, 128>}, {transform_indices = @transform_11, window_bounds = array<i64: 1, 1, 128>}]} {
    %cst = arith.constant 0.000000e+00 : f32
    %0 = vector.broadcast %cst : f32 to vector<4x256xf32>
    %c0 = arith.constant 0 : index
    %c0_0 = arith.constant 0 : index
    %c0_1 = arith.constant 0 : index
    %c0_2 = arith.constant 0 : index
    %c0_3 = arith.constant 0 : index
    %1 = vector.load %arg1[%c0, %c0_0, %c0_1, %c0_2, %c0_3] : memref<1x4x3x3x128xbf16, #tpu.memory_space<vmem>>, vector<1x1x2x2x128xbf16>
    %2 = vector.shape_cast %1 : vector<1x1x2x2x128xbf16> to vector<2x2x128xbf16>
    %3 = vector.shape_cast %2 : vector<2x2x128xbf16> to vector<4x128xbf16>
    %c0_4 = arith.constant 0 : index
    %c0_5 = arith.constant 0 : index
    %c0_6 = arith.constant 0 : index
    %c0_7 = arith.constant 0 : index
    %4 = vector.load %arg2[%c0_4, %c0_5, %c0_6, %c0_7] : memref<3x3x128x256xbf16, #tpu.memory_space<vmem>>, vector<1x1x128x256xbf16>
    %5 = vector.shape_cast %4 : vector<1x1x128x256xbf16> to vector<128x256xbf16>
    %cst_8 = arith.constant dense<0.000000e+00> : vector<4x256xf32>
    %6 = tpu.matmul %3, %5, %cst_8 {dimension_numbers = #tpu.dot_dimension_numbers<[1], [0], [0], [1], [0, 0, 1, 1], [], []>} : vector<4x128xbf16>, vector<128x256xbf16>, vector<4x256xf32> -> vector<4x256xf32>
    %7 = arith.addf %0, %6 : vector<4x256xf32>
    %c0_9 = arith.constant 0 : index
    %c1 = arith.constant 1 : index
    %c0_10 = arith.constant 0 : index
    %c0_11 = arith.constant 0 : index
    %c0_12 = arith.constant 0 : index
    %8 = vector.load %arg1[%c0_9, %c1, %c0_10, %c0_11, %c0_12] : memref<1x4x3x3x128xbf16, #tpu.memory_space<vmem>>, vector<1x1x2x2x128xbf16>
    %9 = vector.shape_cast %8 : vector<1x1x2x2x128xbf16> to vector<2x2x128xbf16>
    %10 = vector.shape_cast %9 : vector<2x2x128xbf16> to vector<4x128xbf16>
    %c0_13 = arith.constant 0 : index
    %c1_14 = arith.constant 1 : index
    %c0_15 = arith.constant 0 : index
    %c0_16 = arith.constant 0 : index
    %11 = vector.load %arg2[%c0_13, %c1_14, %c0_15, %c0_16] : memref<3x3x128x256xbf16, #tpu.memory_space<vmem>>, vector<1x1x128x256xbf16>
    %12 = vector.shape_cast %11 : vector<1x1x128x256xbf16> to vector<128x256xbf16>
    %cst_17 = arith.constant dense<0.000000e+00> : vector<4x256xf32>
    %13 = tpu.matmul %10, %12, %cst_17 {dimension_numbers = #tpu.dot_dimension_numbers<[1], [0], [0], [1], [0, 0, 1, 1], [], []>} : vector<4x128xbf16>, vector<128x256xbf16>, vector<4x256xf32> -> vector<4x256xf32>
    %14 = arith.addf %7, %13 : vector<4x256xf32>
    %c0_18 = arith.constant 0 : index
    %c0_19 = arith.constant 0 : index
    %c0_20 = arith.constant 0 : index
    %c1_21 = arith.constant 1 : index
    %c0_22 = arith.constant 0 : index
    %15 = vector.load %arg1[%c0_18, %c0_19, %c0_20, %c1_21, %c0_22] : memref<1x4x3x3x128xbf16, #tpu.memory_space<vmem>>, vector<1x1x2x2x128xbf16>
    %16 = vector.shape_cast %15 : vector<1x1x2x2x128xbf16> to vector<2x2x128xbf16>
    %17 = vector.shape_cast %16 : vector<2x2x128xbf16> to vector<4x128xbf16>
    %c0_23 = arith.constant 0 : index
    %c2 = arith.constant 2 : index
    %c0_24 = arith.constant 0 : index
    %c0_25 = arith.constant 0 : index
    %18 = vector.load %arg2[%c0_23, %c2, %c0_24, %c0_25] : memref<3x3x128x256xbf16, #tpu.memory_space<vmem>>, vector<1x1x128x256xbf16>
    %19 = vector.shape_cast %18 : vector<1x1x128x256xbf16> to vector<128x256xbf16>
    %cst_26 = arith.constant dense<0.000000e+00> : vector<4x256xf32>
    %20 = tpu.matmul %17, %19, %cst_26 {dimension_numbers = #tpu.dot_dimension_numbers<[1], [0], [0], [1], [0, 0, 1, 1], [], []>} : vector<4x128xbf16>, vector<128x256xbf16>, vector<4x256xf32> -> vector<4x256xf32>
    %21 = arith.addf %14, %20 : vector<4x256xf32>
    %c0_27 = arith.constant 0 : index
    %c2_28 = arith.constant 2 : index
    %c0_29 = arith.constant 0 : index
    %c0_30 = arith.constant 0 : index
    %c0_31 = arith.constant 0 : index
    %22 = vector.load %arg1[%c0_27, %c2_28, %c0_29, %c0_30, %c0_31] : memref<1x4x3x3x128xbf16, #tpu.memory_space<vmem>>, vector<1x1x2x2x128xbf16>
    %23 = vector.shape_cast %22 : vector<1x1x2x2x128xbf16> to vector<2x2x128xbf16>
    %24 = vector.shape_cast %23 : vector<2x2x128xbf16> to vector<4x128xbf16>
    %c1_32 = arith.constant 1 : index
    %c0_33 = arith.constant 0 : index
    %c0_34 = arith.constant 0 : index
    %c0_35 = arith.constant 0 : index
    %25 = vector.load %arg2[%c1_32, %c0_33, %c0_34, %c0_35] : memref<3x3x128x256xbf16, #tpu.memory_space<vmem>>, vector<1x1x128x256xbf16>
    %26 = vector.shape_cast %25 : vector<1x1x128x256xbf16> to vector<128x256xbf16>
    %cst_36 = arith.constant dense<0.000000e+00> : vector<4x256xf32>
    %27 = tpu.matmul %24, %26, %cst_36 {dimension_numbers = #tpu.dot_dimension_numbers<[1], [0], [0], [1], [0, 0, 1, 1], [], []>} : vector<4x128xbf16>, vector<128x256xbf16>, vector<4x256xf32> -> vector<4x256xf32>
    %28 = arith.addf %21, %27 : vector<4x256xf32>
    %c0_37 = arith.constant 0 : index
    %c3 = arith.constant 3 : index
    %c0_38 = arith.constant 0 : index
    %c0_39 = arith.constant 0 : index
    %c0_40 = arith.constant 0 : index
    %29 = vector.load %arg1[%c0_37, %c3, %c0_38, %c0_39, %c0_40] : memref<1x4x3x3x128xbf16, #tpu.memory_space<vmem>>, vector<1x1x2x2x128xbf16>
    %30 = vector.shape_cast %29 : vector<1x1x2x2x128xbf16> to vector<2x2x128xbf16>
    %31 = vector.shape_cast %30 : vector<2x2x128xbf16> to vector<4x128xbf16>
    %c1_41 = arith.constant 1 : index
    %c1_42 = arith.constant 1 : index
    %c0_43 = arith.constant 0 : index
    %c0_44 = arith.constant 0 : index
    %32 = vector.load %arg2[%c1_41, %c1_42, %c0_43, %c0_44] : memref<3x3x128x256xbf16, #tpu.memory_space<vmem>>, vector<1x1x128x256xbf16>
    %33 = vector.shape_cast %32 : vector<1x1x128x256xbf16> to vector<128x256xbf16>
    %cst_45 = arith.constant dense<0.000000e+00> : vector<4x256xf32>
    %34 = tpu.matmul %31, %33, %cst_45 {dimension_numbers = #tpu.dot_dimension_numbers<[1], [0], [0], [1], [0, 0, 1, 1], [], []>} : vector<4x128xbf16>, vector<128x256xbf16>, vector<4x256xf32> -> vector<4x256xf32>
    %35 = arith.addf %28, %34 : vector<4x256xf32>
    %c0_46 = arith.constant 0 : index
    %c2_47 = arith.constant 2 : index
    %c0_48 = arith.constant 0 : index
    %c1_49 = arith.constant 1 : index
    %c0_50 = arith.constant 0 : index
    %36 = vector.load %arg1[%c0_46, %c2_47, %c0_48, %c1_49, %c0_50] : memref<1x4x3x3x128xbf16, #tpu.memory_space<vmem>>, vector<1x1x2x2x128xbf16>
    %37 = vector.shape_cast %36 : vector<1x1x2x2x128xbf16> to vector<2x2x128xbf16>
    %38 = vector.shape_cast %37 : vector<2x2x128xbf16> to vector<4x128xbf16>
    %c1_51 = arith.constant 1 : index
    %c2_52 = arith.constant 2 : index
    %c0_53 = arith.constant 0 : index
    %c0_54 = arith.constant 0 : index
    %39 = vector.load %arg2[%c1_51, %c2_52, %c0_53, %c0_54] : memref<3x3x128x256xbf16, #tpu.memory_space<vmem>>, vector<1x1x128x256xbf16>
    %40 = vector.shape_cast %39 : vector<1x1x128x256xbf16> to vector<128x256xbf16>
    %cst_55 = arith.constant dense<0.000000e+00> : vector<4x256xf32>
    %41 = tpu.matmul %38, %40, %cst_55 {dimension_numbers = #tpu.dot_dimension_numbers<[1], [0], [0], [1], [0, 0, 1, 1], [], []>} : vector<4x128xbf16>, vector<128x256xbf16>, vector<4x256xf32> -> vector<4x256xf32>
    %42 = arith.addf %35, %41 : vector<4x256xf32>
    %c0_56 = arith.constant 0 : index
    %c0_57 = arith.constant 0 : index
    %c1_58 = arith.constant 1 : index
    %c0_59 = arith.constant 0 : index
    %c0_60 = arith.constant 0 : index
    %43 = vector.load %arg1[%c0_56, %c0_57, %c1_58, %c0_59, %c0_60] : memref<1x4x3x3x128xbf16, #tpu.memory_space<vmem>>, vector<1x1x2x2x128xbf16>
    %44 = vector.shape_cast %43 : vector<1x1x2x2x128xbf16> to vector<2x2x128xbf16>
    %45 = vector.shape_cast %44 : vector<2x2x128xbf16> to vector<4x128xbf16>
    %c2_61 = arith.constant 2 : index
    %c0_62 = arith.constant 0 : index
    %c0_63 = arith.constant 0 : index
    %c0_64 = arith.constant 0 : index
    %46 = vector.load %arg2[%c2_61, %c0_62, %c0_63, %c0_64] : memref<3x3x128x256xbf16, #tpu.memory_space<vmem>>, vector<1x1x128x256xbf16>
    %47 = vector.shape_cast %46 : vector<1x1x128x256xbf16> to vector<128x256xbf16>
    %cst_65 = arith.constant dense<0.000000e+00> : vector<4x256xf32>
    %48 = tpu.matmul %45, %47, %cst_65 {dimension_numbers = #tpu.dot_dimension_numbers<[1], [0], [0], [1], [0, 0, 1, 1], [], []>} : vector<4x128xbf16>, vector<128x256xbf16>, vector<4x256xf32> -> vector<4x256xf32>
    %49 = arith.addf %42, %48 : vector<4x256xf32>
    %c0_66 = arith.constant 0 : index
    %c1_67 = arith.constant 1 : index
    %c1_68 = arith.constant 1 : index
    %c0_69 = arith.constant 0 : index
    %c0_70 = arith.constant 0 : index
    %50 = vector.load %arg1[%c0_66, %c1_67, %c1_68, %c0_69, %c0_70] : memref<1x4x3x3x128xbf16, #tpu.memory_space<vmem>>, vector<1x1x2x2x128xbf16>
    %51 = vector.shape_cast %50 : vector<1x1x2x2x128xbf16> to vector<2x2x128xbf16>
    %52 = vector.shape_cast %51 : vector<2x2x128xbf16> to vector<4x128xbf16>
    %c2_71 = arith.constant 2 : index
    %c1_72 = arith.constant 1 : index
    %c0_73 = arith.constant 0 : index
    %c0_74 = arith.constant 0 : index
    %53 = vector.load %arg2[%c2_71, %c1_72, %c0_73, %c0_74] : memref<3x3x128x256xbf16, #tpu.memory_space<vmem>>, vector<1x1x128x256xbf16>
    %54 = vector.shape_cast %53 : vector<1x1x128x256xbf16> to vector<128x256xbf16>
    %cst_75 = arith.constant dense<0.000000e+00> : vector<4x256xf32>
    %55 = tpu.matmul %52, %54, %cst_75 {dimension_numbers = #tpu.dot_dimension_numbers<[1], [0], [0], [1], [0, 0, 1, 1], [], []>} : vector<4x128xbf16>, vector<128x256xbf16>, vector<4x256xf32> -> vector<4x256xf32>
    %56 = arith.addf %49, %55 : vector<4x256xf32>
    %c0_76 = arith.constant 0 : index
    %c0_77 = arith.constant 0 : index
    %c1_78 = arith.constant 1 : index
    %c1_79 = arith.constant 1 : index
    %c0_80 = arith.constant 0 : index
    %57 = vector.load %arg1[%c0_76, %c0_77, %c1_78, %c1_79, %c0_80] : memref<1x4x3x3x128xbf16, #tpu.memory_space<vmem>>, vector<1x1x2x2x128xbf16>
    %58 = vector.shape_cast %57 : vector<1x1x2x2x128xbf16> to vector<2x2x128xbf16>
    %59 = vector.shape_cast %58 : vector<2x2x128xbf16> to vector<4x128xbf16>
    %c2_81 = arith.constant 2 : index
    %c2_82 = arith.constant 2 : index
    %c0_83 = arith.constant 0 : index
    %c0_84 = arith.constant 0 : index
    %60 = vector.load %arg2[%c2_81, %c2_82, %c0_83, %c0_84] : memref<3x3x128x256xbf16, #tpu.memory_space<vmem>>, vector<1x1x128x256xbf16>
    %61 = vector.shape_cast %60 : vector<1x1x128x256xbf16> to vector<128x256xbf16>
    %cst_85 = arith.constant dense<0.000000e+00> : vector<4x256xf32>
    %62 = tpu.matmul %59, %61, %cst_85 {dimension_numbers = #tpu.dot_dimension_numbers<[1], [0], [0], [1], [0, 0, 1, 1], [], []>} : vector<4x128xbf16>, vector<128x256xbf16>, vector<4x256xf32> -> vector<4x256xf32>
    %63 = arith.addf %56, %62 : vector<4x256xf32>
    %c0_86 = arith.constant 0 : index
    %c0_87 = arith.constant 0 : index
    %64 = vector.load %arg3[%c0_86, %c0_87] : memref<1x256xf32, #tpu.memory_space<vmem>>, vector<1x256xf32>
    %65 = vector.broadcast %64 : vector<1x256xf32> to vector<4x256xf32>
    %66 = arith.mulf %63, %65 : vector<4x256xf32>
    %c0_88 = arith.constant 0 : index
    %c0_89 = arith.constant 0 : index
    %67 = vector.load %arg4[%c0_88, %c0_89] : memref<1x256xf32, #tpu.memory_space<vmem>>, vector<1x256xf32>
    %68 = vector.broadcast %67 : vector<1x256xf32> to vector<4x256xf32>
    %69 = arith.addf %66, %68 : vector<4x256xf32>
    %cst_90 = arith.constant 0.000000e+00 : f32
    %70 = vector.broadcast %cst_90 : f32 to vector<4x256xf32>
    %71 = arith.maximumf %69, %70 : vector<4x256xf32>
    %c0_91 = arith.constant 0 : index
    %c3_92 = arith.constant 3 : index
    %c0_93 = arith.constant 0 : index
    %c0_94 = arith.constant 0 : index
    %c0_95 = arith.constant 0 : index
    %72 = vector.load %arg1[%c0_91, %c3_92, %c0_93, %c0_94, %c0_95] : memref<1x4x3x3x128xbf16, #tpu.memory_space<vmem>>, vector<1x1x2x2x128xbf16>
    %73 = vector.shape_cast %72 : vector<1x1x2x2x128xbf16> to vector<2x2x128xbf16>
    %74 = vector.shape_cast %73 : vector<2x2x128xbf16> to vector<4x128xbf16>
    %c0_96 = arith.constant 0 : index
    %c0_97 = arith.constant 0 : index
    %75 = vector.load %arg5[%c0_96, %c0_97] : memref<128x256xbf16, #tpu.memory_space<vmem>>, vector<128x256xbf16>
    %cst_98 = arith.constant dense<0.000000e+00> : vector<4x256xf32>
    %76 = tpu.matmul %74, %75, %cst_98 {dimension_numbers = #tpu.dot_dimension_numbers<[1], [0], [0], [1], [0, 0, 1, 1], [], []>} : vector<4x128xbf16>, vector<128x256xbf16>, vector<4x256xf32> -> vector<4x256xf32>
    %c0_99 = arith.constant 0 : index
    %c0_100 = arith.constant 0 : index
    %77 = vector.load %arg6[%c0_99, %c0_100] : memref<1x256xf32, #tpu.memory_space<vmem>>, vector<1x256xf32>
    %78 = vector.broadcast %77 : vector<1x256xf32> to vector<4x256xf32>
    %79 = arith.addf %76, %78 : vector<4x256xf32>
    %cst_101 = arith.constant 0.000000e+00 : bf16
    %80 = vector.broadcast %cst_101 : bf16 to vector<4x4x256xbf16>
    %c0_102 = arith.constant 0 : index
    %c0_103 = arith.constant 0 : index
    %c0_104 = arith.constant 0 : index
    %81 = vector.load %arg13[%c0_102, %c0_103, %c0_104] : memref<4x4x256xbf16, #tpu.memory_space<vmem>>, vector<4x4x256xbf16>
    tpu.vector_store %arg13[%c0_102, %c0_103, %c0_104], %80 {strides = array<i32>} : memref<4x4x256xbf16, #tpu.memory_space<vmem>>, vector<4x4x256xbf16>,
    %82 = arith.truncf %71 : vector<4x256xf32> to vector<4x256xbf16>
    %83 = vector.extract_strided_slice %82 {offsets = [0, 0], sizes = [2, 256], strides = [1, 1]} : vector<4x256xbf16> to vector<2x256xbf16>
    %c1_105 = arith.constant 1 : index
    %c1_106 = arith.constant 1 : index
    %c0_107 = arith.constant 0 : index
    %84 = vector.load %arg13[%c1_105, %c1_106, %c0_107] : memref<4x4x256xbf16, #tpu.memory_space<vmem>>, vector<1x2x256xbf16>
    %85 = vector.shape_cast %84 : vector<1x2x256xbf16> to vector<2x256xbf16>
    %86 = vector.shape_cast %83 : vector<2x256xbf16> to vector<1x2x256xbf16>
    tpu.vector_store %arg13[%c1_105, %c1_106, %c0_107], %86 {strides = array<i32>} : memref<4x4x256xbf16, #tpu.memory_space<vmem>>, vector<1x2x256xbf16>,
    %87 = vector.extract_strided_slice %82 {offsets = [2, 0], sizes = [2, 256], strides = [1, 1]} : vector<4x256xbf16> to vector<2x256xbf16>
    %c2_108 = arith.constant 2 : index
    %c1_109 = arith.constant 1 : index
    %c0_110 = arith.constant 0 : index
    %88 = vector.load %arg13[%c2_108, %c1_109, %c0_110] : memref<4x4x256xbf16, #tpu.memory_space<vmem>>, vector<1x2x256xbf16>
    %89 = vector.shape_cast %88 : vector<1x2x256xbf16> to vector<2x256xbf16>
    %90 = vector.shape_cast %87 : vector<2x256xbf16> to vector<1x2x256xbf16>
    tpu.vector_store %arg13[%c2_108, %c1_109, %c0_110], %90 {strides = array<i32>} : memref<4x4x256xbf16, #tpu.memory_space<vmem>>, vector<1x2x256xbf16>,
    %cst_111 = arith.constant 0.000000e+00 : f32
    %91 = vector.broadcast %cst_111 : f32 to vector<4x256xf32>
    %c0_112 = arith.constant 0 : index
    %c0_113 = arith.constant 0 : index
    %c0_114 = arith.constant 0 : index
    %92 = vector.load %arg13[%c0_112, %c0_113, %c0_114] : memref<4x4x256xbf16, #tpu.memory_space<vmem>>, vector<2x2x256xbf16>
    %93 = vector.shape_cast %92 : vector<2x2x256xbf16> to vector<4x256xbf16>
    %c0_115 = arith.constant 0 : index
    %c0_116 = arith.constant 0 : index
    %c0_117 = arith.constant 0 : index
    %c0_118 = arith.constant 0 : index
    %94 = vector.load %arg7[%c0_115, %c0_116, %c0_117, %c0_118] : memref<3x3x256x256xbf16, #tpu.memory_space<vmem>>, vector<1x1x256x256xbf16>
    %95 = vector.shape_cast %94 : vector<1x1x256x256xbf16> to vector<256x256xbf16>
    %cst_119 = arith.constant dense<0.000000e+00> : vector<4x256xf32>
    %96 = tpu.matmul %93, %95, %cst_119 {dimension_numbers = #tpu.dot_dimension_numbers<[1], [0], [0], [1], [0, 0, 1, 1], [], []>} : vector<4x256xbf16>, vector<256x256xbf16>, vector<4x256xf32> -> vector<4x256xf32>
    %97 = arith.addf %91, %96 : vector<4x256xf32>
    %c0_120 = arith.constant 0 : index
    %c1_121 = arith.constant 1 : index
    %c0_122 = arith.constant 0 : index
    %98 = vector.load %arg13[%c0_120, %c1_121, %c0_122] : memref<4x4x256xbf16, #tpu.memory_space<vmem>>, vector<2x2x256xbf16>
    %99 = vector.shape_cast %98 : vector<2x2x256xbf16> to vector<4x256xbf16>
    %c0_123 = arith.constant 0 : index
    %c1_124 = arith.constant 1 : index
    %c0_125 = arith.constant 0 : index
    %c0_126 = arith.constant 0 : index
    %100 = vector.load %arg7[%c0_123, %c1_124, %c0_125, %c0_126] : memref<3x3x256x256xbf16, #tpu.memory_space<vmem>>, vector<1x1x256x256xbf16>
    %101 = vector.shape_cast %100 : vector<1x1x256x256xbf16> to vector<256x256xbf16>
    %cst_127 = arith.constant dense<0.000000e+00> : vector<4x256xf32>
    %102 = tpu.matmul %99, %101, %cst_127 {dimension_numbers = #tpu.dot_dimension_numbers<[1], [0], [0], [1], [0, 0, 1, 1], [], []>} : vector<4x256xbf16>, vector<256x256xbf16>, vector<4x256xf32> -> vector<4x256xf32>
    %103 = arith.addf %97, %102 : vector<4x256xf32>
    %c0_128 = arith.constant 0 : index
    %c2_129 = arith.constant 2 : index
    %c0_130 = arith.constant 0 : index
    %104 = vector.load %arg13[%c0_128, %c2_129, %c0_130] : memref<4x4x256xbf16, #tpu.memory_space<vmem>>, vector<2x2x256xbf16>
    %105 = vector.shape_cast %104 : vector<2x2x256xbf16> to vector<4x256xbf16>
    %c0_131 = arith.constant 0 : index
    %c2_132 = arith.constant 2 : index
    %c0_133 = arith.constant 0 : index
    %c0_134 = arith.constant 0 : index
    %106 = vector.load %arg7[%c0_131, %c2_132, %c0_133, %c0_134] : memref<3x3x256x256xbf16, #tpu.memory_space<vmem>>, vector<1x1x256x256xbf16>
    %107 = vector.shape_cast %106 : vector<1x1x256x256xbf16> to vector<256x256xbf16>
    %cst_135 = arith.constant dense<0.000000e+00> : vector<4x256xf32>
    %108 = tpu.matmul %105, %107, %cst_135 {dimension_numbers = #tpu.dot_dimension_numbers<[1], [0], [0], [1], [0, 0, 1, 1], [], []>} : vector<4x256xbf16>, vector<256x256xbf16>, vector<4x256xf32> -> vector<4x256xf32>
    %109 = arith.addf %103, %108 : vector<4x256xf32>
    %c1_136 = arith.constant 1 : index
    %c0_137 = arith.constant 0 : index
    %c0_138 = arith.constant 0 : index
    %110 = vector.load %arg13[%c1_136, %c0_137, %c0_138] : memref<4x4x256xbf16, #tpu.memory_space<vmem>>, vector<2x2x256xbf16>
    %111 = vector.shape_cast %110 : vector<2x2x256xbf16> to vector<4x256xbf16>
    %c1_139 = arith.constant 1 : index
    %c0_140 = arith.constant 0 : index
    %c0_141 = arith.constant 0 : index
    %c0_142 = arith.constant 0 : index
    %112 = vector.load %arg7[%c1_139, %c0_140, %c0_141, %c0_142] : memref<3x3x256x256xbf16, #tpu.memory_space<vmem>>, vector<1x1x256x256xbf16>
    %113 = vector.shape_cast %112 : vector<1x1x256x256xbf16> to vector<256x256xbf16>
    %cst_143 = arith.constant dense<0.000000e+00> : vector<4x256xf32>
    %114 = tpu.matmul %111, %113, %cst_143 {dimension_numbers = #tpu.dot_dimension_numbers<[1], [0], [0], [1], [0, 0, 1, 1], [], []>} : vector<4x256xbf16>, vector<256x256xbf16>, vector<4x256xf32> -> vector<4x256xf32>
    %115 = arith.addf %109, %114 : vector<4x256xf32>
    %c1_144 = arith.constant 1 : index
    %c1_145 = arith.constant 1 : index
    %c0_146 = arith.constant 0 : index
    %116 = vector.load %arg13[%c1_144, %c1_145, %c0_146] : memref<4x4x256xbf16, #tpu.memory_space<vmem>>, vector<2x2x256xbf16>
    %117 = vector.shape_cast %116 : vector<2x2x256xbf16> to vector<4x256xbf16>
    %c1_147 = arith.constant 1 : index
    %c1_148 = arith.constant 1 : index
    %c0_149 = arith.constant 0 : index
    %c0_150 = arith.constant 0 : index
    %118 = vector.load %arg7[%c1_147, %c1_148, %c0_149, %c0_150] : memref<3x3x256x256xbf16, #tpu.memory_space<vmem>>, vector<1x1x256x256xbf16>
    %119 = vector.shape_cast %118 : vector<1x1x256x256xbf16> to vector<256x256xbf16>
    %cst_151 = arith.constant dense<0.000000e+00> : vector<4x256xf32>
    %120 = tpu.matmul %117, %119, %cst_151 {dimension_numbers = #tpu.dot_dimension_numbers<[1], [0], [0], [1], [0, 0, 1, 1], [], []>} : vector<4x256xbf16>, vector<256x256xbf16>, vector<4x256xf32> -> vector<4x256xf32>
    %121 = arith.addf %115, %120 : vector<4x256xf32>
    %c1_152 = arith.constant 1 : index
    %c2_153 = arith.constant 2 : index
    %c0_154 = arith.constant 0 : index
    %122 = vector.load %arg13[%c1_152, %c2_153, %c0_154] : memref<4x4x256xbf16, #tpu.memory_space<vmem>>, vector<2x2x256xbf16>
    %123 = vector.shape_cast %122 : vector<2x2x256xbf16> to vector<4x256xbf16>
    %c1_155 = arith.constant 1 : index
    %c2_156 = arith.constant 2 : index
    %c0_157 = arith.constant 0 : index
    %c0_158 = arith.constant 0 : index
    %124 = vector.load %arg7[%c1_155, %c2_156, %c0_157, %c0_158] : memref<3x3x256x256xbf16, #tpu.memory_space<vmem>>, vector<1x1x256x256xbf16>
    %125 = vector.shape_cast %124 : vector<1x1x256x256xbf16> to vector<256x256xbf16>
    %cst_159 = arith.constant dense<0.000000e+00> : vector<4x256xf32>
    %126 = tpu.matmul %123, %125, %cst_159 {dimension_numbers = #tpu.dot_dimension_numbers<[1], [0], [0], [1], [0, 0, 1, 1], [], []>} : vector<4x256xbf16>, vector<256x256xbf16>, vector<4x256xf32> -> vector<4x256xf32>
    %127 = arith.addf %121, %126 : vector<4x256xf32>
    %c2_160 = arith.constant 2 : index
    %c0_161 = arith.constant 0 : index
    %c0_162 = arith.constant 0 : index
    %128 = vector.load %arg13[%c2_160, %c0_161, %c0_162] : memref<4x4x256xbf16, #tpu.memory_space<vmem>>, vector<2x2x256xbf16>
    %129 = vector.shape_cast %128 : vector<2x2x256xbf16> to vector<4x256xbf16>
    %c2_163 = arith.constant 2 : index
    %c0_164 = arith.constant 0 : index
    %c0_165 = arith.constant 0 : index
    %c0_166 = arith.constant 0 : index
    %130 = vector.load %arg7[%c2_163, %c0_164, %c0_165, %c0_166] : memref<3x3x256x256xbf16, #tpu.memory_space<vmem>>, vector<1x1x256x256xbf16>
    %131 = vector.shape_cast %130 : vector<1x1x256x256xbf16> to vector<256x256xbf16>
    %cst_167 = arith.constant dense<0.000000e+00> : vector<4x256xf32>
    %132 = tpu.matmul %129, %131, %cst_167 {dimension_numbers = #tpu.dot_dimension_numbers<[1], [0], [0], [1], [0, 0, 1, 1], [], []>} : vector<4x256xbf16>, vector<256x256xbf16>, vector<4x256xf32> -> vector<4x256xf32>
    %133 = arith.addf %127, %132 : vector<4x256xf32>
    %c2_168 = arith.constant 2 : index
    %c1_169 = arith.constant 1 : index
    %c0_170 = arith.constant 0 : index
    %134 = vector.load %arg13[%c2_168, %c1_169, %c0_170] : memref<4x4x256xbf16, #tpu.memory_space<vmem>>, vector<2x2x256xbf16>
    %135 = vector.shape_cast %134 : vector<2x2x256xbf16> to vector<4x256xbf16>
    %c2_171 = arith.constant 2 : index
    %c1_172 = arith.constant 1 : index
    %c0_173 = arith.constant 0 : index
    %c0_174 = arith.constant 0 : index
    %136 = vector.load %arg7[%c2_171, %c1_172, %c0_173, %c0_174] : memref<3x3x256x256xbf16, #tpu.memory_space<vmem>>, vector<1x1x256x256xbf16>
    %137 = vector.shape_cast %136 : vector<1x1x256x256xbf16> to vector<256x256xbf16>
    %cst_175 = arith.constant dense<0.000000e+00> : vector<4x256xf32>
    %138 = tpu.matmul %135, %137, %cst_175 {dimension_numbers = #tpu.dot_dimension_numbers<[1], [0], [0], [1], [0, 0, 1, 1], [], []>} : vector<4x256xbf16>, vector<256x256xbf16>, vector<4x256xf32> -> vector<4x256xf32>
    %139 = arith.addf %133, %138 : vector<4x256xf32>
    %c2_176 = arith.constant 2 : index
    %c2_177 = arith.constant 2 : index
    %c0_178 = arith.constant 0 : index
    %140 = vector.load %arg13[%c2_176, %c2_177, %c0_178] : memref<4x4x256xbf16, #tpu.memory_space<vmem>>, vector<2x2x256xbf16>
    %141 = vector.shape_cast %140 : vector<2x2x256xbf16> to vector<4x256xbf16>
    %c2_179 = arith.constant 2 : index
    %c2_180 = arith.constant 2 : index
    %c0_181 = arith.constant 0 : index
    %c0_182 = arith.constant 0 : index
    %142 = vector.load %arg7[%c2_179, %c2_180, %c0_181, %c0_182] : memref<3x3x256x256xbf16, #tpu.memory_space<vmem>>, vector<1x1x256x256xbf16>
    %143 = vector.shape_cast %142 : vector<1x1x256x256xbf16> to vector<256x256xbf16>
    %cst_183 = arith.constant dense<0.000000e+00> : vector<4x256xf32>
    %144 = tpu.matmul %141, %143, %cst_183 {dimension_numbers = #tpu.dot_dimension_numbers<[1], [0], [0], [1], [0, 0, 1, 1], [], []>} : vector<4x256xbf16>, vector<256x256xbf16>, vector<4x256xf32> -> vector<4x256xf32>
    %145 = arith.addf %139, %144 : vector<4x256xf32>
    %c0_184 = arith.constant 0 : index
    %c0_185 = arith.constant 0 : index
    %146 = vector.load %arg8[%c0_184, %c0_185] : memref<1x256xf32, #tpu.memory_space<vmem>>, vector<1x256xf32>
    %147 = vector.broadcast %146 : vector<1x256xf32> to vector<4x256xf32>
    %148 = arith.mulf %145, %147 : vector<4x256xf32>
    %c0_186 = arith.constant 0 : index
    %c0_187 = arith.constant 0 : index
    %149 = vector.load %arg9[%c0_186, %c0_187] : memref<1x256xf32, #tpu.memory_space<vmem>>, vector<1x256xf32>
    %150 = vector.broadcast %149 : vector<1x256xf32> to vector<4x256xf32>
    %151 = arith.addf %148, %150 : vector<4x256xf32>
    %cst_188 = arith.constant 0.000000e+00 : f32
    %152 = vector.broadcast %cst_188 : f32 to vector<4x256xf32>
    %153 = arith.maximumf %151, %152 : vector<4x256xf32>
    %154 = arith.addf %79, %153 : vector<4x256xf32>
    %155 = arith.truncf %154 : vector<4x256xf32> to vector<4x256xbf16>
    %c0_189 = arith.constant 0 : index
    %c0_190 = arith.constant 0 : index
    %156 = vector.load %arg10[%c0_189, %c0_190] : memref<256x128xbf16, #tpu.memory_space<vmem>>, vector<256x128xbf16>
    %cst_191 = arith.constant dense<0.000000e+00> : vector<4x128xf32>
    %157 = tpu.matmul %155, %156, %cst_191 {dimension_numbers = #tpu.dot_dimension_numbers<[1], [0], [0], [1], [0, 0, 1, 1], [], []>} : vector<4x256xbf16>, vector<256x128xbf16>, vector<4x128xf32> -> vector<4x128xf32>
    %cst_192 = arith.constant dense<0.000000e+00> : vector<128xf32>
    %158 = vector.multi_reduction <add>, %157, %cst_192 [0] : vector<4x128xf32> to vector<128xf32>
    %159 = vector.shape_cast %158 : vector<128xf32> to vector<1x128xf32>
    %cst_193 = arith.constant 4.000000e+00 : f32
    %160 = vector.broadcast %cst_193 : f32 to vector<1x128xf32>
    %161 = arith.divf %159, %160 : vector<1x128xf32>
    %c0_194 = arith.constant 0 : index
    %c0_195 = arith.constant 0 : index
    %162 = vector.load %arg11[%c0_194, %c0_195] : memref<1x128xf32, #tpu.memory_space<vmem>>, vector<1x128xf32>
    %163 = arith.addf %161, %162 : vector<1x128xf32>
    %c0_196 = arith.constant 0 : index
    %c0_197 = arith.constant 0 : index
    %c0_198 = arith.constant 0 : index
    %164 = vector.load %arg12[%c0_196, %c0_197, %c0_198] : memref<1x1x128xf32, #tpu.memory_space<vmem>>, vector<1x1x128xf32>
    %165 = vector.shape_cast %164 : vector<1x1x128xf32> to vector<1x128xf32>
    %166 = vector.shape_cast %163 : vector<1x128xf32> to vector<1x1x128xf32>
    tpu.vector_store %arg12[%c0_196, %c0_197, %c0_198], %166 {strides = array<i32>} : memref<1x1x128xf32, #tpu.memory_space<vmem>>, vector<1x1x128xf32>,
    return
  }
  func.func @transform_0(%arg0: i32) -> (i32, i32, i32, i32, i32) {
    %c0_i32 = arith.constant 0 : i32
    %c0_i32_0 = arith.constant 0 : i32
    %c0_i32_1 = arith.constant 0 : i32
    %c0_i32_2 = arith.constant 0 : i32
    %c0_i32_3 = arith.constant 0 : i32
    return %arg0, %c0_i32, %c0_i32_0, %c0_i32_1, %c0_i32_2 : i32, i32, i32, i32, i32
  }
  func.func @transform_1(%arg0: i32) -> (i32, i32, i32, i32) {
    %c0_i32 = arith.constant 0 : i32
    %c0_i32_0 = arith.constant 0 : i32
    %c0_i32_1 = arith.constant 0 : i32
    %c0_i32_2 = arith.constant 0 : i32
    %c0_i32_3 = arith.constant 0 : i32
    return %c0_i32, %c0_i32_0, %c0_i32_1, %c0_i32_2 : i32, i32, i32, i32
  }
  func.func @transform_2(%arg0: i32) -> (i32, i32) {
    %c0_i32 = arith.constant 0 : i32
    %c0_i32_0 = arith.constant 0 : i32
    %c0_i32_1 = arith.constant 0 : i32
    return %c0_i32, %c0_i32_0 : i32, i32
  }
  func.func @transform_3(%arg0: i32) -> (i32, i32) {
    %c0_i32 = arith.constant 0 : i32
    %c0_i32_0 = arith.constant 0 : i32
    %c0_i32_1 = arith.constant 0 : i32
    return %c0_i32, %c0_i32_0 : i32, i32
  }
  func.func @transform_4(%arg0: i32) -> (i32, i32) {
    %c0_i32 = arith.constant 0 : i32
    %c0_i32_0 = arith.constant 0 : i32
    %c0_i32_1 = arith.constant 0 : i32
    return %c0_i32, %c0_i32_0 : i32, i32
  }
  func.func @transform_5(%arg0: i32) -> (i32, i32) {
    %c0_i32 = arith.constant 0 : i32
    %c0_i32_0 = arith.constant 0 : i32
    %c0_i32_1 = arith.constant 0 : i32
    return %c0_i32, %c0_i32_0 : i32, i32
  }
  func.func @transform_6(%arg0: i32) -> (i32, i32, i32, i32) {
    %c0_i32 = arith.constant 0 : i32
    %c0_i32_0 = arith.constant 0 : i32
    %c0_i32_1 = arith.constant 0 : i32
    %c0_i32_2 = arith.constant 0 : i32
    %c0_i32_3 = arith.constant 0 : i32
    return %c0_i32, %c0_i32_0, %c0_i32_1, %c0_i32_2 : i32, i32, i32, i32
  }
  func.func @transform_7(%arg0: i32) -> (i32, i32) {
    %c0_i32 = arith.constant 0 : i32
    %c0_i32_0 = arith.constant 0 : i32
    %c0_i32_1 = arith.constant 0 : i32
    return %c0_i32, %c0_i32_0 : i32, i32
  }
  func.func @transform_8(%arg0: i32) -> (i32, i32) {
    %c0_i32 = arith.constant 0 : i32
    %c0_i32_0 = arith.constant 0 : i32
    %c0_i32_1 = arith.constant 0 : i32
    return %c0_i32, %c0_i32_0 : i32, i32
  }
  func.func @transform_9(%arg0: i32) -> (i32, i32) {
    %c0_i32 = arith.constant 0 : i32
    %c0_i32_0 = arith.constant 0 : i32
    %c0_i32_1 = arith.constant 0 : i32
    return %c0_i32, %c0_i32_0 : i32, i32
  }
  func.func @transform_10(%arg0: i32) -> (i32, i32) {
    %c0_i32 = arith.constant 0 : i32
    %c0_i32_0 = arith.constant 0 : i32
    %c0_i32_1 = arith.constant 0 : i32
    return %c0_i32, %c0_i32_0 : i32, i32
  }
  func.func @transform_11(%arg0: i32) -> (i32, i32, i32) {
    %c0_i32 = arith.constant 0 : i32
    %c0_i32_0 = arith.constant 0 : i32
    %c0_i32_1 = arith.constant 0 : i32
    return %arg0, %c0_i32, %c0_i32_0 : i32, i32, i32
  }
}

</mosaic_0001>

<bundles_post_ra>
// kernel: cnn_forward.3
= control target key start
LH: loop header
LB: loop body
LE: loop exit
PB: predicated region body
PF: predicated region fallthrough
CT: control target
= control target key end

     0   :  { %s1276_s1 = inlined_call_operand.vmem [shape: bf16[384,128], index: 1, kind: input, shape index: {}]   ;;  %s1277_s0 = inlined_call_operand.vmem [shape: bf16[128,384], index: 0, kind: input, shape index: {}]   ;;  %s1278_s2 = inlined_call_operand.vmem [shape: f32[1,128], index: 2, kind: input, shape index: {}]   ;;  %s1279_s3 = inlined_call_operand.vmem [shape: bf16[128,128], index: 3, kind: output, shape index: {}]  }
   0x1   :  { %v1011_v0 = vld [vmem:[%s1276_s1 + $0x40] sm:$0xff]   ;;  %v1014_v3 = vld [vmem:[%s1276_s1 + $0x48] sm:$0xff]   ;;  %v1017_v6 = vld [vmem:[%s1276_s1 + $0x50] sm:$0xff]  }
   0x2   :  { %v1012_v1 = vld [vmem:[%s1276_s1] sm:$0xff]   ;;  %899 = vmatprep.subr.bf16.mxu0 %v1011_v0  ;;  %v1015_v4 = vld [vmem:[%s1276_s1 + $0x8] sm:$0xff]   ;;  %v1018_v7 = vld [vmem:[%s1276_s1 + $0x10] sm:$0xff]  }
   0x3   :  { %v1013_v2 = vld [vmem:[%s1276_s1 + $0x80] sm:$0xff]   ;;  %900 = vmatpush3.bf16.msra.mxu0 %v1012_v1  ;;  %v1016_v5 = vld [vmem:[%s1276_s1 + $0x88] sm:$0xff]   ;;  %v1019_v8 = vld [vmem:[%s1276_s1 + $0x90] sm:$0xff]  }
   0x4   :  { %979 = vmatprep.subr.bf16.mxu1 %v1013_v2  ;;  %901 = vmatprep.subr.bf16.mxu0 %v1014_v3  ;;  %v1020_v9 = vld [vmem:[%s1276_s1 + $0x58] sm:$0xff]   ;;  %v1023_v12 = vld [vmem:[%s1276_s1 + $0x60] sm:$0xff]   ;;  %v1026_v15 = vld [vmem:[%s1276_s1 + $0x68] sm:$0xff]  }
   0x5   :  { %980 = vmatpush3.bf16.msra.mxu1 %v1013_v2  ;;  %v1021_v10 = vld [vmem:[%s1276_s1 + $0x18] sm:$0xff]   ;;  %v1025_v13 = vld [vmem:[%s1276_s1 + $0xa0] sm:$0xff]   ;;  %v1028_v16 = vld [vmem:[%s1276_s1 + $0xa8] sm:$0xff]  }
   0x6   :  { %981 = vmatprep.subr.bf16.mxu1 %v1016_v5  ;;  %v1022_v11 = vld [vmem:[%s1276_s1 + $0x98] sm:$0xff]   ;;  %v1024_v14 = vld [vmem:[%s1276_s1 + $0x20] sm:$0xff]   ;;  %v1027_v17 = vld [vmem:[%s1276_s1 + $0x28] sm:$0xff]  }
   0x7   :  { %902 = vmatpush3.bf16.msra.mxu0 %v1015_v4  ;;  %v1029_v18 = vld [vmem:[%s1276_s1 + $0x70] sm:$0xff]   ;;  %v1032_v21 = vld [vmem:[%s1276_s1 + $0x78] sm:$0xff]   ;;  %v1035_v26 = vld [vmem:[%s1277_s0] ss:$12 sps:$4 sm:$0xff]  }
   0x8   :  { %903 = vmatprep.subr.bf16.mxu0 %v1017_v6  ;;  %v1030_v19 = vld [vmem:[%s1276_s1 + $0x30] sm:$0xff]   ;;  %v1034_v22 = vld [vmem:[%s1276_s1 + $0xb8] sm:$0xff]   ;;  %v1039_v28 = vld [vmem:[%s1277_s0 + $0x20] ss:$12 sps:$4 sm:$0xff]  }
   0x9   :  { %982 = vmatpush3.bf16.msra.mxu1 %v1016_v5  ;;  %v1031_v20 = vld [vmem:[%s1276_s1 + $0xb0] sm:$0xff]   ;;  %v1033_v25 = vld [vmem:[%s1276_s1 + $0x38] sm:$0xff]   ;;  %v1055_v36 = vld [vmem:[%s1277_s0 + $0x80] ss:$12 sps:$4 sm:$0xff]  }
   0xa   :  { %983 = vmatprep.subr.bf16.mxu1 %v1019_v8  ;;  %v1037_v23 = vld [vmem:[%s1277_s0 + $0x4] ss:$12 sps:$4 sm:$0xff]   ;;  %v1038_v24 = vld [vmem:[%s1277_s0 + $0x8] ss:$12 sps:$4 sm:$0xff]   ;;  %v1048_v35 = vld [vmem:[%s1277_s0 + $0x4c] ss:$12 sps:$4 sm:$0xff]  }
   0xb   :  { %904 = vmatpush3.bf16.msra.mxu0 %v1018_v7  ;;  %435 = vmatprep.mubr.bf16.mxu0 %v1037_v23  ;;  %v1040_v27 = vld [vmem:[%s1277_s0 + $0x1c] ss:$12 sps:$4 sm:$0xff]   ;;  %v1046_v29 = vld [vmem:[%s1277_s0 + $0x38] ss:$12 sps:$4 sm:$0xff]   ;;  %v1043_v31 = vld [vmem:[%s1277_s0 + $0x34] ss:$12 sps:$4 sm:$0xff]  }
   0xc   :  { %905 = vmatprep.subr.bf16.mxu0 %v1020_v9  ;;  %995 = vmatprep.mubr.bf16.mxu1 %v1038_v24  ;;  %v1042_v30 = vld [vmem:[%s1277_s0 + $0x18] ss:$12 sps:$4 sm:$0xff]   ;;  %v1047_v32 = vld [vmem:[%s1277_s0 + $0x50] ss:$12 sps:$4 sm:$0xff]   ;;  %v1054_v33 = vld [vmem:[%s1277_s0 + $0x68] ss:$12 sps:$4 sm:$0xff]  }
   0xd   :  { %984 = vmatpush3.bf16.msra.mxu1 %v1019_v8  ;;  %v1045_v34 = vld [vmem:[%s1277_s0 + $0x30] ss:$12 sps:$4 sm:$0xff]   ;;  %v1062_v37 = vld [vmem:[%s1277_s0 + $0x98] ss:$12 sps:$4 sm:$0xff]   ;;  %v1050_v38 = vld [vmem:[%s1277_s0 + $0x48] ss:$12 sps:$4 sm:$0xff]  }
   0xe   :  { %985 = vmatprep.subr.bf16.mxu1 %v1022_v11  ;;  %v1051_v39 = vld [vmem:[%s1277_s0 + $0x64] ss:$12 sps:$4 sm:$0xff]   ;;  %v1053_v41 = vld [vmem:[%s1277_s0 + $0x60] ss:$12 sps:$4 sm:$0xff]   ;;  %v1056_v42 = vld [vmem:[%s1277_s0 + $0x7c] ss:$12 sps:$4 sm:$0xff]  }
   0xf   :  { %906 = vmatpush3.bf16.msra.mxu0 %v1021_v10  ;;  %v1063_v40 = vld [vmem:[%s1277_s0 + $0xb0] ss:$12 sps:$4 sm:$0xff]   ;;  %v1058_v43 = vld [vmem:[%s1277_s0 + $0x78] ss:$12 sps:$4 sm:$0xff]   ;;  %v1059_v44 = vld [vmem:[%s1277_s0 + $0x94] ss:$12 sps:$4 sm:$0xff]  }
  0x10   :  { %907 = vmatprep.subr.bf16.mxu0 %v1023_v12  ;;  %v1061_v45 = vld [vmem:[%s1277_s0 + $0x90] ss:$12 sps:$4 sm:$0xff]   ;;  %v1064_v46 = vld [vmem:[%s1277_s0 + $0xac] ss:$12 sps:$4 sm:$0xff]   ;;  %v1066_v47 = vld [vmem:[%s1277_s0 + $0xa8] ss:$12 sps:$4 sm:$0xff]  }
  0x11   :  { %986 = vmatpush3.bf16.msra.mxu1 %v1022_v11  ;;  %v1234_v55 = vld [vmem:[%s1278_s2] ss:$0 sm:$0xff] }
  0x12   :  { %987 = vmatprep.subr.bf16.mxu1 %v1025_v13 }
  0x13   :  { %908 = vmatpush3.bf16.msra.mxu0 %v1024_v14 }
  0x14   :  { %909 = vmatprep.subr.bf16.mxu0 %v1026_v15 }
  0x15   :  { %988 = vmatpush3.bf16.msra.mxu1 %v1025_v13 }
  0x16   :  { %989 = vmatprep.subr.bf16.mxu1 %v1028_v16 }
  0x17   :  { %910 = vmatpush3.bf16.msra.mxu0 %v1027_v17 }
  0x18   :  { %911 = vmatprep.subr.bf16.mxu0 %v1029_v18 }
  0x19   :  { %990 = vmatpush3.bf16.msra.mxu1 %v1028_v16 }
  0x1a   :  { %991 = vmatprep.subr.bf16.mxu1 %v1031_v20 }
  0x1b   :  { %912 = vmatpush3.bf16.msra.mxu0 %v1030_v19 }
  0x1c   :  { %913 = vmatprep.subr.bf16.mxu0 %v1032_v21 }
  0x1d   :  { %992 = vmatpush3.bf16.msra.mxu1 %v1031_v20 }
  0x1e   :  { %993 = vmatprep.subr.bf16.mxu1 %v1034_v22 }
  0x1f   :  { %914 = vmatpush3.bf16.msra.mxu0 %v1033_v25 }
  0x21   :  { %994 = vmatpush3.bf16.msra.mxu1 %v1034_v22 }
  0x22   :  { %436 = vmatmul.mubr.bf16.vlgmr.msra.gmra.mrb[0].mxu0 %v1035_v26 }
  0x23   :  { %443 = vmatprep.mubr.bf16.mxu0 %v1040_v27 }
  0x24   :  { %996 = vmatmul.mubr.bf16.vlgmr.msra.gmra.mrb[0].mxu1 %v1039_v28 }
  0x25   :  { %999 = vmatprep.mubr.bf16.mxu1 %v1046_v29 }
  0x2a   :  { %444 = vmatmul.mubr.bf16.gmra.mrb[4].mxu0 %v1042_v30 }
  0x2b   :  { %451 = vmatprep.mubr.bf16.mxu0 %v1043_v31 }
  0x2c   :  { %1000 = vmatmul.mubr.bf16.gmra.mrb[4].mxu1 %v1047_v32 }
  0x2d   :  { %1003 = vmatprep.mubr.bf16.mxu1 %v1054_v33 }
  0x32   :  { %452 = vmatmul.mubr.bf16.gmra.mrb[8].mxu0 %v1045_v34 }
  0x33   :  { %459 = vmatprep.mubr.bf16.mxu0 %v1048_v35 }
  0x34   :  { %1004 = vmatmul.mubr.bf16.gmra.mrb[8].mxu1 %v1055_v36 }
  0x35   :  { %1007 = vmatprep.mubr.bf16.mxu1 %v1062_v37 }
  0x3a   :  { %460 = vmatmul.mubr.bf16.gmra.mrb[12].mxu0 %v1050_v38 }
  0x3b   :  { %467 = vmatprep.mubr.bf16.mxu0 %v1051_v39 }
  0x3c   :  { %1008 = vmatmul.mubr.bf16.gmra.mrb[12].mxu1 %v1063_v40 }
  0x42   :  { %468 = vmatmul.mubr.bf16.gmra.mrb[16].mxu0 %v1053_v41 }
  0x43   :  { %475 = vmatprep.mubr.bf16.mxu0 %v1056_v42 }
  0x4a   :  { %476 = vmatmul.mubr.bf16.gmra.mrb[20].mxu0 %v1058_v43 }
  0x4b   :  { %483 = vmatprep.mubr.bf16.mxu0 %v1059_v44 }
  0x52   :  { %484 = vmatmul.mubr.bf16.gmra.mrb[24].mxu0 %v1061_v45 }
  0x53   :  { %491 = vmatprep.mubr.bf16.mxu0 %v1064_v46 }
  0x5a   :  { %492 = vmatmul.mubr.bf16.gmra.mrb[28].mxu0 %v1066_v47 }
  0xf5   :  { %v915_v48 = vpop.f32.mrb[0].mxu0 }
  0xf6   :  { %v916_v49 = vpop.f32.mrb[1].mxu0 }
  0xf7   :  { %v917_v50 = vadd.f32 %v916_v49, %v915_v48  ;;  %v918_v51 = vpop.f32.mrb[2].mxu0  ;;  %v997_v52 = vpop.f32.mrb[0].mxu1 }
  0xf8   :  { %v919_v53 = vpop.f32.mrb[3].mxu0  ;;  %v534_v54 = vpop.f32.mrb[1].mxu1 }
  0xf9   :  { %v920_v56 = vadd.f32 %v919_v53, %v918_v51  ;;  %v535_v57 = vadd.f32 %v917_v50, %v534_v54  ;;  %v998_v58 = vpop.f32.mrb[2].mxu1 }
  0xfa   :  { %v537_v59 = vpop.f32.mrb[3].mxu1 }
  0xfb   :  { %v655_v60 = vadd.f32 %v1234_v55, %v535_v57  ;;  %v538_v61 = vadd.f32 %v920_v56, %v537_v59 }
  0xfd   :  { %v656_v62 = vadd.f32 %v1234_v55, %v538_v61  ;;  %v921_v63 = vpop.f32.mrb[4].mxu0  ;;  %v671_v1 = vmax.f32 %v655_v60, 0.0 }
  0xfe   :  { %v922_v0 = vpop.f32.mrb[5].mxu0 }
  0xff   :  { %v672_v2 = vmax.f32 %v656_v62, 0.0  ;;  %v923_v3 = vadd.f32 %v922_v0, %v921_v63  ;;  %v924_v4 = vpop.f32.mrb[6].mxu0  ;;  %v1001_v5 = vpop.f32.mrb[4].mxu1 }
 0x100   :  { %v925_v6 = vpop.f32.mrb[7].mxu0  ;;  %v550_v7 = vpop.f32.mrb[5].mxu1 }
 0x101   :  { %v855_v8 = vpack.c.bf16 %v672_v2, %v671_v1  ;;  %v543_v9 = vadd.f32 %v997_v52, %v923_v3  ;;  %v926_v10 = vadd.f32 %v925_v6, %v924_v4  ;;  %v1002_v11 = vpop.f32.mrb[6].mxu1 }
 0x102   :  { %v553_v12 = vpop.f32.mrb[7].mxu1 }
 0x103   :  { %856 = vst [vmem:[%s1279_s3] sm:$0xff] %v855_v8   ;;  %v657_v13 = vadd.f32 %v1234_v55, %v543_v9  ;;  %v546_v14 = vadd.f32 %v998_v58, %v926_v10 }
 0x105   :  { %v658_v15 = vadd.f32 %v1234_v55, %v546_v14  ;;  %v927_v16 = vpop.f32.mrb[8].mxu0  ;;  %v673_v18 = vmax.f32 %v657_v13, 0.0 }
 0x106   :  { %v928_v17 = vpop.f32.mrb[9].mxu0 }
 0x107   :  { %v674_v19 = vmax.f32 %v658_v15, 0.0  ;;  %v929_v20 = vadd.f32 %v928_v17, %v927_v16  ;;  %v930_v21 = vpop.f32.mrb[10].mxu0  ;;  %v1005_v22 = vpop.f32.mrb[8].mxu1 }
 0x108   :  { %v931_v23 = vpop.f32.mrb[11].mxu0  ;;  %v566_v24 = vpop.f32.mrb[9].mxu1 }
 0x109   :  { %v860_v25 = vpack.c.bf16 %v674_v19, %v673_v18  ;;  %v932_v26 = vadd.f32 %v931_v23, %v930_v21  ;;  %v551_v27 = vadd.f32 %v929_v20, %v550_v7  ;;  %v1006_v28 = vpop.f32.mrb[10].mxu1 }
 0x10a   :  { %v569_v29 = vpop.f32.mrb[11].mxu1 }
 0x10b   :  { %892 = vst [vmem:[%s1279_s3 + $0x8] sm:$0xff] %v860_v25   ;;  %v659_v30 = vadd.f32 %v1234_v55, %v551_v27  ;;  %v554_v31 = vadd.f32 %v932_v26, %v553_v12 }
 0x10d   :  { %v660_v32 = vadd.f32 %v1234_v55, %v554_v31  ;;  %v933_v33 = vpop.f32.mrb[12].mxu0  ;;  %v675_v35 = vmax.f32 %v659_v30, 0.0 }
 0x10e   :  { %v934_v34 = vpop.f32.mrb[13].mxu0 }
 0x10f   :  { %v676_v36 = vmax.f32 %v660_v32, 0.0  ;;  %v935_v37 = vadd.f32 %v934_v34, %v933_v33  ;;  %v936_v38 = vpop.f32.mrb[14].mxu0  ;;  %v1009_v39 = vpop.f32.mrb[12].mxu1 }
 0x110   :  { %v937_v40 = vpop.f32.mrb[15].mxu0  ;;  %v582_v41 = vpop.f32.mrb[13].mxu1 }
 0x111   :  { %v865_v42 = vpack.c.bf16 %v676_v36, %v675_v35  ;;  %v559_v43 = vadd.f32 %v1001_v5, %v935_v37  ;;  %v938_v44 = vadd.f32 %v937_v40, %v936_v38  ;;  %v1010_v45 = vpop.f32.mrb[14].mxu1 }
 0x112   :  { %v585_v46 = vpop.f32.mrb[15].mxu1 }
 0x113   :  { %893 = vst [vmem:[%s1279_s3 + $0x10] sm:$0xff] %v865_v42   ;;  %v661_v47 = vadd.f32 %v1234_v55, %v559_v43  ;;  %v562_v48 = vadd.f32 %v1002_v11, %v938_v44 }
 0x115   :  { %v662_v49 = vadd.f32 %v1234_v55, %v562_v48  ;;  %v939_v50 = vpop.f32.mrb[16].mxu0  ;;  %v677_v52 = vmax.f32 %v661_v47, 0.0 }
 0x116   :  { %v940_v51 = vpop.f32.mrb[17].mxu0 }
 0x117   :  { %v678_v53 = vmax.f32 %v662_v49, 0.0  ;;  %v941_v54 = vadd.f32 %v940_v51, %v939_v50  ;;  %v942_v56 = vpop.f32.mrb[18].mxu0 }
 0x118   :  { %v943_v57 = vpop.f32.mrb[19].mxu0 }
 0x119   :  { %v870_v58 = vpack.c.bf16 %v678_v53, %v677_v52  ;;  %v944_v59 = vadd.f32 %v943_v57, %v942_v56  ;;  %v567_v60 = vadd.f32 %v941_v54, %v566_v24 }
 0x11b   :  { %894 = vst [vmem:[%s1279_s3 + $0x18] sm:$0xff] %v870_v58   ;;  %v663_v61 = vadd.f32 %v1234_v55, %v567_v60  ;;  %v570_v62 = vadd.f32 %v944_v59, %v569_v29 }
 0x11d   :  { %v664_v63 = vadd.f32 %v1234_v55, %v570_v62  ;;  %v945_v0 = vpop.f32.mrb[20].mxu0  ;;  %v679_v2 = vmax.f32 %v663_v61, 0.0 }
 0x11e   :  { %v946_v1 = vpop.f32.mrb[21].mxu0 }
 0x11f   :  { %v680_v3 = vmax.f32 %v664_v63, 0.0  ;;  %v947_v4 = vadd.f32 %v946_v1, %v945_v0  ;;  %v948_v5 = vpop.f32.mrb[22].mxu0 }
 0x120   :  { %v949_v6 = vpop.f32.mrb[23].mxu0 }
 0x121   :  { %v875_v7 = vpack.c.bf16 %v680_v3, %v679_v2  ;;  %v575_v8 = vadd.f32 %v1005_v22, %v947_v4  ;;  %v950_v9 = vadd.f32 %v949_v6, %v948_v5 }
 0x123   :  { %895 = vst [vmem:[%s1279_s3 + $0x20] sm:$0xff] %v875_v7   ;;  %v665_v10 = vadd.f32 %v1234_v55, %v575_v8  ;;  %v578_v11 = vadd.f32 %v1006_v28, %v950_v9 }
 0x125   :  { %v666_v12 = vadd.f32 %v1234_v55, %v578_v11  ;;  %v951_v13 = vpop.f32.mrb[24].mxu0  ;;  %v681_v15 = vmax.f32 %v665_v10, 0.0 }
 0x126   :  { %v952_v14 = vpop.f32.mrb[25].mxu0 }
 0x127   :  { %v682_v16 = vmax.f32 %v666_v12, 0.0  ;;  %v953_v17 = vadd.f32 %v952_v14, %v951_v13  ;;  %v954_v18 = vpop.f32.mrb[26].mxu0 }
 0x128   :  { %v955_v19 = vpop.f32.mrb[27].mxu0 }
 0x129   :  { %v880_v20 = vpack.c.bf16 %v682_v16, %v681_v15  ;;  %v956_v21 = vadd.f32 %v955_v19, %v954_v18  ;;  %v583_v22 = vadd.f32 %v953_v17, %v582_v41 }
 0x12b   :  { %896 = vst [vmem:[%s1279_s3 + $0x28] sm:$0xff] %v880_v20   ;;  %v667_v23 = vadd.f32 %v1234_v55, %v583_v22  ;;  %v586_v24 = vadd.f32 %v956_v21, %v585_v46 }
 0x12d   :  { %v668_v25 = vadd.f32 %v1234_v55, %v586_v24  ;;  %v957_v26 = vpop.f32.mrb[28].mxu0  ;;  %v683_v28 = vmax.f32 %v667_v23, 0.0 }
 0x12e   :  { %v958_v27 = vpop.f32.mrb[29].mxu0 }
 0x12f   :  { %v684_v29 = vmax.f32 %v668_v25, 0.0  ;;  %v959_v30 = vadd.f32 %v958_v27, %v957_v26  ;;  %v960_v31 = vpop.f32.mrb[30].mxu0 }
 0x130   :  { %v961_v32 = vpop.f32.mrb[31].mxu0 }
 0x131   :  { %v885_v33 = vpack.c.bf16 %v684_v29, %v683_v28  ;;  %v591_v34 = vadd.f32 %v1009_v39, %v959_v30  ;;  %v962_v35 = vadd.f32 %v961_v32, %v960_v31 }
 0x133   :  { %897 = vst [vmem:[%s1279_s3 + $0x30] sm:$0xff] %v885_v33   ;;  %v669_v36 = vadd.f32 %v1234_v55, %v591_v34  ;;  %v594_v37 = vadd.f32 %v1010_v45, %v962_v35 }
 0x135   :  { %v670_v38 = vadd.f32 %v1234_v55, %v594_v37  ;;  %v685_v40 = vmax.f32 %v669_v36, 0.0 }
 0x137   :  { %v686_v41 = vmax.f32 %v670_v38, 0.0 }
 0x139   :  { %v890_v42 = vpack.c.bf16 %v686_v41, %v685_v40 }
 0x13b   :  { %898 = vst [vmem:[%s1279_s3 + $0x38] sm:$0xff] %v890_v42  }

// kernel: cnn_forward.4
= control target key start
LH: loop header
LB: loop body
LE: loop exit
PB: predicated region body
PF: predicated region fallthrough
CT: control target
= control target key end

     0   :  { %s5094_s30 = smov 0   ;;  %s5970_s0 = inlined_call_operand.vmem [shape: bf16[2,4,5,5,128], index: 0, kind: input, shape index: {}]   ;;  %s5971_s1 = inlined_call_operand.vmem [shape: bf16[3,3,128,128], index: 1, kind: input, shape index: {}]   ;;  %s5972_s2 = inlined_call_operand.vmem [shape: f32[1,128], index: 2, kind: input, shape index: {}]   ;;  %s5973_s3 = inlined_call_operand.vmem [shape: f32[1,128], index: 3, kind: input, shape index: {}]   ;;  %s5974_s4 = inlined_call_operand.vmem [shape: bf16[128,128], index: 4, kind: input, shape index: {}]   ;;  %s5975_s5 = inlined_call_operand.vmem [shape: f32[1,128], index: 5, kind: input, shape index: {}]   ;;  %s5976_s6 = inlined_call_operand.vmem [shape: bf16[3,3,128,128], index: 6, kind: input, shape index: {}]   ;;  %s5977_s7 = inlined_call_operand.vmem [shape: f32[1,128], index: 7, kind: input, shape index: {}]   ;;  %s5978_s8 = inlined_call_operand.vmem [shape: f32[1,128], index: 8, kind: input, shape index: {}]   ;;  %s5979_s9 = inlined_call_operand.vmem [shape: bf16[2,16,128], index: 9, kind: output, shape index: {}]  }
   0x1 LB: > { %s3703_s10 = sadd.s32 4294967295, %s5038_s30   ;;  %p3707_p0 = scmp.ge.s32.totalorder %s5038_s30, 1  ;;  %s5038_s30 = sphi %s5094_s30, %s19_s30  }
   0x2   : > { %p287_p1 = scmp.lt.s32.totalorder %s5038_s30, 3 }
   0x4   : > { %p288_p2 = pnand %p3707_p0, %p287_p1 }
   0x5   : > { %v4844_v0 = vld [vmem:[%s5971_s1 + $0x40] sm:$0xff] (!%p288_p2)   ;;  %v5040_v1 = vmov (!%p288_p2), 0.0   ;;  %v4845_v2 = vld [vmem:[%s5971_s1 + $0x48] sm:$0xff] (!%p288_p2)   ;;  %vm5041_vm0 = vmmov (!%p288_p2), 0   ;;  %p323_p3 = scmp.lt.s32.totalorder (!%p288_p2), %s3703_s10, 1  ;;  %v4846_v3 = vld [vmem:[%s5971_s1 + $0x50] sm:$0xff] (!%p288_p2)   ;;  %v385_v7 = vlaneseq (!%p288_p2) }
   0x6   : > { %291 = sbr.rel (%p288_p2) target bundleno = 1029 (0x405), region = 56  ;;  %4387 = vmatprep.subr.bf16.mxu0 (!%p288_p2), %v5040_v1  ;;  %4567 = vmatprep.subr.bf16.mxu1 (!%p288_p2), %v5040_v1  ;;  %v4847_v4 = vld [vmem:[%s5971_s1 + $0x58] sm:$0xff] (!%p288_p2)   ;;  %v5042_v5 = vmov (!%p288_p2), 1983009808   ;;  %v4848_v8 = vld [vmem:[%s5971_s1 + $0x60] sm:$0xff] (!%p288_p2)   ;;  %v4849_v11 = vld [vmem:[%s5971_s1 + $0x68] sm:$0xff] (!%p288_p2)  }
   0x7   : > { %4388 = vmatpush3.bf16.msra.mxu0 (!%p288_p2), %v4844_v0  ;;  %4403 = vmatprep.mubr.msk.bf16.mxu0 (!%p288_p2), %vm5041_vm0, %v5040_v1  ;;  %v383_v6 = vunpack.c.l.s4 (!%p288_p2), %v5042_v5  ;;  %v386_v10 = vshrl.u32 (!%p288_p2), %v385_v7, 7  ;;  %v4850_v15 = vld [vmem:[%s5971_s1 + $0x70] sm:$0xff] (!%p288_p2)   ;;  %v4851_v16 = vld [vmem:[%s5971_s1 + $0x78] sm:$0xff] (!%p288_p2)   ;;  %v4854_v18 = vld [vmem:[%s5971_s1] sm:$0xff] (!%p288_p2)   ;;  %vm638_vm1 = vsmask.f32 (!%p288_p2), 1280 }
   0x8   : > { %4389 = vmatprep.subr.bf16.mxu0 (!%p288_p2), %v5040_v1  ;;  %4583 = vmatprep.mubr.msk.bf16.mxu1 (!%p288_p2), %vm5041_vm0, %v5040_v1  ;;  %v4855_v19 = vld [vmem:[%s5971_s1 + $0x8] sm:$0xff] (!%p288_p2)   ;;  %v4856_v20 = vld [vmem:[%s5971_s1 + $0x10] sm:$0xff] (!%p288_p2)   ;;  %v4857_v21 = vld [vmem:[%s5971_s1 + $0x18] sm:$0xff] (!%p288_p2)   ;;  %vm639_vm2 = vsmask.f32 (!%p288_p2), 3336  ;;  %vm1962_vm8 = vcmask (!%p288_p2), 1042432  }
   0x9   : > { %v384_v9 = vunpack.c.0.s8 (!%p288_p2), %v383_v6  ;;  %v4858_v22 = vld [vmem:[%s5971_s1 + $0x20] sm:$0xff] (!%p288_p2)   ;;  %v4859_v23 = vld [vmem:[%s5971_s1 + $0x28] sm:$0xff] (!%p288_p2)   ;;  %v4860_v24 = vld [vmem:[%s5971_s1 + $0x30] sm:$0xff] (!%p288_p2)   ;;  %vm641_vm4 = vsmask.f32 (!%p288_p2), 5392  ;;  %vm2391_vm11 = vcmask (!%p288_p2), 1040384  }
   0xa   : > { %v4861_v28 = vld [vmem:[%s5971_s1 + $0x38] sm:$0xff] (!%p288_p2)   ;;  %v4864_v31 = vld [vmem:[%s5971_s1 + $0x80] sm:$0xff] (!%p288_p2)   ;;  %v4865_v42 = vld [vmem:[%s5971_s1 + $0x88] sm:$0xff] (!%p288_p2)   ;;  %vm643_vm5 = vsmask.f32 (!%p288_p2), 7448  ;;  %vm2392_vm12 = vcmask (!%p288_p2), 1042434  }
   0xb   : > { %4390 = vmatpush3.bf16.msra.mxu0 (!%p288_p2), %v4845_v2  ;;  %v5141_v14 = vsub.s32 (!%p288_p2), %v384_v9, %v386_v10  ;;  %v4866_v51 = vld [vmem:[%s5971_s1 + $0x90] sm:$0xff] (!%p288_p2)   ;;  %v4867_v62 = vld [vmem:[%s5971_s1 + $0x98] sm:$0xff] (!%p288_p2)   ;;  %vm640_vm3 = vmor (!%p288_p2), %vm638_vm1, %vm639_vm2  ;;  %vm1963_vm9 = vsmask.f32 (!%p288_p2), 2306  ;;  %vm2394_vm13 = vcmask (!%p288_p2), 1044484   ;;  %vm2396_vm15 = vcmask (!%p288_p2), 1046534  }
   0xc   : > { %4391 = vmatprep.subr.bf16.mxu0 (!%p288_p2), %v5040_v1  ;;  %vm642_vm6 = vmor (!%p288_p2), %vm640_vm3, %vm641_vm4 }
   0xd   : > { %s5989_s10 = smov (!%p323_p3, %s3703_s10), 1  ;;  %vm5215_vm7 = vmor %vm642_vm6, %vm643_vm5 }
   0xe   : > { %s4831_s17 = smul.u32 80, %s5989_s10  ;;  %vm5560_vm10 = vmand %vm1962_vm8, %vm1963_vm9  ;;  %s4206_s13 = sshll.u32 %s5989_s10, 3 }
   0xf   : > { %4392 = vmatpush3.bf16.msra.mxu0 %v4846_v3  ;;  %vm5586_vm14 = vmor %vm2391_vm11, %vm2392_vm12  ;;  %s332_s16 = scalar_lea.vmem %s5979_s9, %s4206_s13 }
  0x10   : > { %s5125_s20 = scalar_lea.vmem %s5970_s0, %s4831_s17  ;;  %4393 = vmatprep.subr.bf16.mxu0 %v5040_v1  ;;  %vm2395_vm1 = vmor %vm5586_vm14, %vm2394_vm13 }
  0x11   : > { %v5014_v12 = vld.sshfl [vmem:[%s5125_s20 + $0x14] sm:$0xf pattern:$0x76325410]  ;;  %vm5605_vm2 = vmor %vm2395_vm1, %vm2396_vm15 }
  0x12   : > { %v5015_v13 = vld.sshfl [vmem:[%s5125_s20 + $0x1c] sm:$0xf pattern:$0x76325410] }
  0x13   : > { %4394 = vmatpush3.bf16.msra.mxu0 %v4847_v4  ;;  %v396_v17 = vcombine.low %v5014_v12, %v5015_v13  ;;  %v5016_v25 = vld.sshfl [vmem:[%s5125_s20] sm:$0xf pattern:$0x76325410]  ;;  %v4869_v12 = vld [vmem:[%s5971_s1 + $0xa8] sm:$0xff]  }
  0x14   : > { %4395 = vmatprep.subr.bf16.mxu0 %v5040_v1  ;;  %v5017_v26 = vld.sshfl [vmem:[%s5125_s20 + $0x8] sm:$0xf pattern:$0x76325410] }
  0x15   : > { %v3747_v27 = vld.sshfl [vmem:[%s5125_s20] sm:$0x13 pattern:$0x76325410]  ;;  %v507_v30 = vcombine.low %v5016_v25, %v5017_v26  ;;  %v4873_v26 = vld [vmem:[%s5971_s1 + $0xc8] sm:$0xff]  }
  0x16   : > { %v3748_v29 = vld.sshfl [vmem:[%s5125_s20 + $0x4] sm:$0x13 pattern:$0x76325410]  ;;  %v646_v34 = vshrl.u32 %v3747_v27, 16  ;;  %v649_v35 = vshll.u32 %v3747_v27, 16  ;;  %v613_v38 = vcombine.high %v3747_v27, %v3747_v27 }
  0x17   : > { %4396 = vmatpush3.bf16.msra.mxu0 %v4848_v8  ;;  %v3749_v32 = vld.sshfl [vmem:[%s5125_s20 + $0x8] sm:$0x13 pattern:$0x76325410]  ;;  %v660_v36 = vshrl.u32 %v3748_v29, 16  ;;  %v663_v37 = vshll.u32 %v3748_v29, 16  ;;  %v621_v39 = vcombine.high %v3748_v29, %v3748_v29 }
  0x18   : > { %4397 = vmatprep.subr.bf16.mxu0 %v5040_v1  ;;  %v3750_v33 = vld.sshfl [vmem:[%s5125_s20 + $0xc] sm:$0x13 pattern:$0x76325410]  ;;  %v629_v40 = vcombine.high %v3749_v32, %v3749_v32  ;;  %v674_v43 = vshrl.u32 %v3749_v32, 16  ;;  %v677_v44 = vshll.u32 %v3749_v32, 16 }
  0x19   : > { %v637_v41 = vcombine.high %v3750_v33, %v3750_v33  ;;  %v688_v45 = vshrl.u32 %v3750_v33, 16  ;;  %v691_v46 = vshll.u32 %v3750_v33, 16  ;;  %v648_v47 = vrot.slane %v646_v34, 6  ;;  %v4868_v8 = vld [vmem:[%s5971_s1 + $0xa0] sm:$0xff]   ;;  %v4874_v27 = vld [vmem:[%s5971_s1 + $0xd0] sm:$0xff]   ;;  %v4879_v34 = vld [vmem:[%s5971_s1 + $0xf8] sm:$0xff]  }
  0x1a   : > { %v651_v48 = vrot.slane %v649_v35, 7  ;;  %v662_v49 = vrot.slane %v660_v36, 6  ;;  %v665_v50 = vrot.slane %v663_v37, 7  ;;  %v655_v52 = vshll.u32 %v613_v38, 16  ;;  %v4876_v29 = vld [vmem:[%s5971_s1 + $0xe0] sm:$0xff]   ;;  %v4878_v33 = vld [vmem:[%s5971_s1 + $0xf0] sm:$0xff]  }
  0x1b   : > { %4398 = vmatpush3.bf16.msra.mxu0 %v4849_v11  ;;  %v669_v53 = vshll.u32 %v621_v39, 16  ;;  %v676_v54 = vrot.slane %v674_v43, 6  ;;  %v679_v55 = vrot.slane %v677_v44, 7  ;;  %v690_v56 = vrot.slane %v688_v45, 6  ;;  %v4882_v35 = vld [vmem:[%s5971_s1 + $0x100] sm:$0xff]   ;;  %v4883_v37 = vld [vmem:[%s5971_s1 + $0x108] sm:$0xff]  }
  0x1c   : > { %4399 = vmatprep.subr.bf16.mxu0 %v5040_v1  ;;  %v693_v57 = vrot.slane %v691_v46, 7  ;;  %v652_v58 = vor.u32 %v651_v48, %v648_v47  ;;  %v666_v59 = vor.u32 %v665_v50, %v662_v49  ;;  %v683_v60 = vshll.u32 %v629_v40, 16  ;;  %v5019_v32 = vld.sshfl [vmem:[%s5125_s20 + $0x30] sm:$0xf pattern:$0x76325410] }
  0x1d   : > { %v697_v61 = vshll.u32 %v637_v41, 16  ;;  %v657_v63 = vrot.slane %v655_v52, 7  ;;  %v671_v0 = vrot.slane %v669_v53, 7  ;;  %v680_v2 = vor.u32 %v679_v55, %v676_v54  ;;  %v4884_v38 = vld [vmem:[%s5971_s1 + $0x110] sm:$0xff]   ;;  %v4885_v39 = vld [vmem:[%s5971_s1 + $0x118] sm:$0xff]   ;;  %v4886_v40 = vld [vmem:[%s5971_s1 + $0x120] sm:$0xff]  }
  0x1e   : > { %v694_v3 = vor.u32 %v693_v57, %v690_v56  ;;  %v653_v4 = vrot.slane %v652_v58, 2  ;;  %v667_v5 = vrot.slane %v666_v59, 2  ;;  %v685_v6 = vrot.slane %v683_v60, 7  ;;  %v4887_v41 = vld [vmem:[%s5971_s1 + $0x128] sm:$0xff]   ;;  %v4888_v44 = vld [vmem:[%s5971_s1 + $0x130] sm:$0xff]   ;;  %v4889_v45 = vld [vmem:[%s5971_s1 + $0x138] sm:$0xff]  }
  0x1f   : > { %4400 = vmatpush3.bf16.msra.mxu0 %v4850_v15  ;;  %v699_v7 = vrot.slane %v697_v61, 7  ;;  %v681_v9 = vrot.slane %v680_v2, 2  ;;  %v5021_v43 = vld.sshfl [vmem:[%s5125_s20 + $0x44] sm:$0xf pattern:$0x76325410] }
  0x20   : > { %4401 = vmatprep.subr.bf16.mxu0 %v5040_v1  ;;  %v695_v10 = vrot.slane %v694_v3, 2  ;;  %v658_v13 = vsel %vm5215_vm7, %v653_v4, %v657_v63  ;;  %v5226_v15 = vsel %vm5215_vm7, %v667_v5, %v671_v0  ;;  %v3835_v46 = vld.sshfl [vmem:[%s5125_s20 + $0x28] sm:$0x13 pattern:$0x76325410]  ;;  %v4892_v49 = vld [vmem:[%s5971_s1 + $0x140] sm:$0xff]  }
  0x21   : > { %v3836_v48 = vld.sshfl [vmem:[%s5125_s20 + $0x2c] sm:$0x13 pattern:$0x76325410]  ;;  %v1138_v52 = vshrl.u32 %v3835_v46, 16  ;;  %v1141_v53 = vshll.u32 %v3835_v46, 16  ;;  %v1112_v63 = vcombine.high %v3835_v46, %v3835_v46 }
  0x22   : > { %v3837_v50 = vld.sshfl [vmem:[%s5125_s20 + $0x30] sm:$0x13 pattern:$0x76325410]  ;;  %v1152_v54 = vshrl.u32 %v3836_v48, 16  ;;  %v1155_v55 = vshll.u32 %v3836_v48, 16  ;;  %v1120_v0 = vcombine.high %v3836_v48, %v3836_v48 }
  0x23   : > { %4402 = vmatpush3.bf16.msra.mxu0 %v4851_v16  ;;  %v5230_v16 = vsel %vm5215_vm7, %v681_v9, %v685_v6  ;;  %v4928_v56 = vld [vmem:[%s5974_s4] sm:$0xff]   ;;  %v4893_v57 = vld [vmem:[%s5971_s1 + $0x148] sm:$0xff]   ;;  %v1166_v58 = vshrl.u32 %v3837_v50, 16  ;;  %v1169_v59 = vshll.u32 %v3837_v50, 16  ;;  %v1128_v2 = vcombine.high %v3837_v50, %v3837_v50  ;;  %v4898_v48 = vld [vmem:[%s5971_s1 + $0x170] sm:$0xff]  }
  0x24   : > { %4407 = vmatprep.subr.bf16.mxu0 %v5040_v1  ;;  %4568 = vmatpush3.bf16.msra.mxu1 %v4928_v56  ;;  %v1140_v3 = vrot.slane %v1138_v52, 6  ;;  %v1143_v5 = vrot.slane %v1141_v53, 7  ;;  %v1154_v6 = vrot.slane %v1152_v54, 6  ;;  %v4899_v52 = vld [vmem:[%s5971_s1 + $0x178] sm:$0xff]   ;;  %v4900_v54 = vld [vmem:[%s5971_s1 + $0x180] sm:$0xff]   ;;  %v4902_v56 = vld [vmem:[%s5971_s1 + $0x190] sm:$0xff]  }
  0x25   : > { %4569 = vmatprep.subr.bf16.mxu1 %v5040_v1  ;;  %v1168_v9 = vrot.slane %v1166_v58, 6  ;;  %v4904_v58 = vld [vmem:[%s5971_s1 + $0x1a0] sm:$0xff]  }
  0x26   : > { %4404 = vmatmul.mubr.bf16.vlgmr.msra.gmra.mrb[0].mxu0 %v396_v17  ;;  %v5234_v17 = vsel %vm5215_vm7, %v695_v10, %v699_v7  ;;  %v1157_v7 = vrot.slane %v1155_v55, 7  ;;  %v1171_v10 = vrot.slane %v1169_v59, 7  ;;  %v4901_v55 = vld [vmem:[%s5971_s1 + $0x188] sm:$0xff]  }
  0x27   : > { %4408 = vmatpush3.bf16.msra.mxu0 %v4854_v18  ;;  %4423 = vmatprep.mubr.msk.bf16.mxu0 %vm5041_vm0, %v5040_v1  ;;  %v4870_v18 = vld [vmem:[%s5971_s1 + $0xb0] sm:$0xff]   ;;  %v4905_v59 = vld [vmem:[%s5971_s1 + $0x1a8] sm:$0xff]  }
  0x28   : > { %4409 = vmatprep.subr.bf16.mxu0 %v5040_v1 }
  0x2b   : > { %4410 = vmatpush3.bf16.msra.mxu0 %v4855_v19  ;;  %v718_v19 = vcombine.low %v658_v13, %v5226_v15 }
  0x2c   : > { %4411 = vmatprep.subr.bf16.mxu0 %v5040_v1 }
  0x2f   : > { %4412 = vmatpush3.bf16.msra.mxu0 %v4856_v20  ;;  %v719_v20 = vcombine.low %v5230_v16, %v5234_v17 }
  0x30   : > { %4413 = vmatprep.subr.bf16.mxu0 %v5040_v1 }
  0x33   : > { %4414 = vmatpush3.bf16.msra.mxu0 %v4857_v21  ;;  %v4871_v21 = vld [vmem:[%s5971_s1 + $0xb8] sm:$0xff]  }
  0x34   : > { %4415 = vmatprep.subr.bf16.mxu0 %v5040_v1 }
  0x37   : > { %4416 = vmatpush3.bf16.msra.mxu0 %v4858_v22  ;;  %v726_v22 = vrot.slane %v718_v19, %v5141_v14  ;;  %v1144_v19 = vor.u32 %v1143_v5, %v1140_v3  ;;  %v4911_v3 = vld [vmem:[%s5971_s1 + $0x1c8] sm:$0xff]   ;;  %v4913_v5 = vld [vmem:[%s5971_s1 + $0x1d8] sm:$0xff]  }
  0x38   : > { %4417 = vmatprep.subr.bf16.mxu0 %v5040_v1 }
  0x3b   : > { %4418 = vmatpush3.bf16.msra.mxu0 %v4859_v23  ;;  %v733_v23 = vrot.slane %v719_v20, %v5141_v14  ;;  %v1147_v20 = vshll.u32 %v1112_v63, 16  ;;  %v4907_v63 = vld [vmem:[%s5971_s1 + $0x1b8] sm:$0xff]  }
  0x3c   : > { %4419 = vmatprep.subr.bf16.mxu0 %v5040_v1 }
  0x3d   : > { %v734_v25 = vcombine.low %v726_v22, %v733_v23  ;;  %v1161_v22 = vshll.u32 %v1120_v0, 16  ;;  %v4895_v23 = vld [vmem:[%s5971_s1 + $0x158] sm:$0xff]  }
  0x3f   : > { %4420 = vmatpush3.bf16.msra.mxu0 %v4860_v24  ;;  %v4872_v24 = vld [vmem:[%s5971_s1 + $0xc0] sm:$0xff]  }
  0x40   : > { %4421 = vmatprep.subr.bf16.mxu0 %v5040_v1 }
  0x43   : > { %4422 = vmatpush3.bf16.msra.mxu0 %v4861_v28  ;;  %v4875_v28 = vld [vmem:[%s5971_s1 + $0xd8] sm:$0xff]  }
  0x44   : > { %4427 = vmatprep.subr.bf16.mxu0 %v5040_v1 }
  0x46   : > { %4424 = vmatmul.mubr.bf16.vlgmr.msra.gmra.mrb[0].mxu0 %v507_v30  ;;  %v4877_v30 = vld [vmem:[%s5971_s1 + $0xe8] sm:$0xff]  }
  0x47   : > { %4428 = vmatpush3.bf16.msra.mxu0 %v4864_v31  ;;  %4443 = vmatprep.mubr.msk.bf16.mxu0 %vm5041_vm0, %v5040_v1  ;;  %v5018_v31 = vld.sshfl [vmem:[%s5125_s20 + $0x28] sm:$0xf pattern:$0x76325410] }
  0x48   : > { %4429 = vmatprep.subr.bf16.mxu0 %v5040_v1  ;;  %v869_v36 = vcombine.low %v5018_v31, %v5019_v32  ;;  %v1163_v32 = vrot.slane %v1161_v22, 7 }
  0x4b   : > { %4430 = vmatpush3.bf16.msra.mxu0 %v4865_v42  ;;  %v5020_v42 = vld.sshfl [vmem:[%s5125_s20 + $0x3c] sm:$0xf pattern:$0x76325410] }
  0x4c   : > { %4431 = vmatprep.subr.bf16.mxu0 %v5040_v1  ;;  %v5323_v47 = vcombine.low %v5020_v42, %v5021_v43 }
  0x4f   : > { %4432 = vmatpush3.bf16.msra.mxu0 %v4866_v51  ;;  %v3838_v51 = vld.sshfl [vmem:[%s5125_s20 + $0x34] sm:$0x13 pattern:$0x76325410] }
  0x50   : > { %4433 = vmatprep.subr.bf16.mxu0 %v5040_v1  ;;  %v1180_v60 = vshrl.u32 %v3838_v51, 16  ;;  %v1183_v61 = vshll.u32 %v3838_v51, 16  ;;  %v1136_v4 = vcombine.high %v3838_v51, %v3838_v51 }
  0x52   : > { %v1185_v13 = vrot.slane %v1183_v61, 7  ;;  %v5023_v61 = vld.sshfl [vmem:[%s5125_s20 + $0xc] sm:$0xf pattern:$0x76325410] }
  0x53   : > { %4434 = vmatpush3.bf16.msra.mxu0 %v4867_v62  ;;  %v4929_v62 = vld [vmem:[%s5974_s4 + $0x8] sm:$0xff]  }
  0x54   : > { %4435 = vmatprep.subr.bf16.mxu0 %v5040_v1  ;;  %4570 = vmatpush3.bf16.msra.mxu1 %v4929_v62  ;;  %v4906_v62 = vld [vmem:[%s5971_s1 + $0x1b0] sm:$0xff]  }
  0x55   : > { %4571 = vmatprep.subr.bf16.mxu1 %v5040_v1 }
  0x57   : > { %4436 = vmatpush3.bf16.msra.mxu0 %v4868_v8  ;;  %v4894_v8 = vld [vmem:[%s5971_s1 + $0x150] sm:$0xff]  }
  0x58   : > { %4437 = vmatprep.subr.bf16.mxu0 %v5040_v1 }
  0x5b   : > { %4438 = vmatpush3.bf16.msra.mxu0 %v4869_v12  ;;  %v1182_v12 = vrot.slane %v1180_v60, 6  ;;  %v5022_v60 = vld.sshfl [vmem:[%s5125_s20 + $0x4] sm:$0xf pattern:$0x76325410] }
  0x5c   : > { %4439 = vmatprep.subr.bf16.mxu0 %v5040_v1  ;;  %v1361_v0 = vcombine.low %v5022_v60, %v5023_v61 }
  0x5f   : > { %4440 = vmatpush3.bf16.msra.mxu0 %v4870_v18  ;;  %v4930_v18 = vld [vmem:[%s5974_s4 + $0x10] sm:$0xff]  }
  0x60   : > { %4441 = vmatprep.subr.bf16.mxu0 %v5040_v1  ;;  %4572 = vmatpush3.bf16.msra.mxu1 %v4930_v18  ;;  %v4920_v18 = vld [vmem:[%s5971_s1 + $0x200] sm:$0xff]  }
  0x61   : > { %4573 = vmatprep.subr.bf16.mxu1 %v5040_v1 }
  0x63   : > { %4442 = vmatpush3.bf16.msra.mxu0 %v4871_v21  ;;  %v1158_v21 = vor.u32 %v1157_v7, %v1154_v6  ;;  %v4914_v6 = vld [vmem:[%s5971_s1 + $0x1e0] sm:$0xff]   ;;  %v4915_v7 = vld [vmem:[%s5971_s1 + $0x1e8] sm:$0xff]  }
  0x64   : > { %4447 = vmatprep.subr.bf16.mxu0 %v5040_v1 }
  0x65   : > { %v1159_v31 = vrot.slane %v1158_v21, 2 }
  0x66   : > { %4444 = vmatmul.mubr.bf16.vlgmr.msra.gmra.mrb[0].mxu0 %v734_v25  ;;  %v1175_v25 = vshll.u32 %v1128_v2, 16  ;;  %v4910_v2 = vld [vmem:[%s5971_s1 + $0x1c0] sm:$0xff]  }
  0x67   : > { %4448 = vmatpush3.bf16.msra.mxu0 %v4872_v24  ;;  %4463 = vmatprep.mubr.msk.bf16.mxu0 %vm5041_vm0, %v5040_v1  ;;  %v1172_v24 = vor.u32 %v1171_v10, %v1168_v9  ;;  %v5025_v9 = vld.sshfl [vmem:[%s5125_s20 + $0x20] sm:$0xf pattern:$0x76325410]  ;;  %v4916_v10 = vld [vmem:[%s5971_s1 + $0x1f0] sm:$0xff]  }
  0x68   : > { %4449 = vmatprep.subr.bf16.mxu0 %v5040_v1 }
  0x6b   : > { %4450 = vmatpush3.bf16.msra.mxu0 %v4873_v26  ;;  %v1186_v26 = vor.u32 %v1185_v13, %v1182_v12  ;;  %v4917_v12 = vld [vmem:[%s5971_s1 + $0x1f8] sm:$0xff]  }
  0x6c   : > { %4451 = vmatprep.subr.bf16.mxu0 %v5040_v1 }
  0x6f   : > { %4452 = vmatpush3.bf16.msra.mxu0 %v4874_v27  ;;  %v1189_v27 = vshll.u32 %v1136_v4, 16  ;;  %v4912_v4 = vld [vmem:[%s5971_s1 + $0x1d0] sm:$0xff]  }
  0x70   : > { %4453 = vmatprep.subr.bf16.mxu0 %v5040_v1 }
  0x73   : > { %4454 = vmatpush3.bf16.msra.mxu0 %v4875_v28  ;;  %v4931_v28 = vld [vmem:[%s5974_s4 + $0x18] sm:$0xff]  }
  0x74   : > { %4455 = vmatprep.subr.bf16.mxu0 %v5040_v1  ;;  %4574 = vmatpush3.bf16.msra.mxu1 %v4931_v28 }
  0x75   : > { %4575 = vmatprep.subr.bf16.mxu1 %v5040_v1 }
  0x77   : > { %4456 = vmatpush3.bf16.msra.mxu0 %v4876_v29  ;;  %v1145_v29 = vrot.slane %v1144_v19, 2  ;;  %v3926_v19 = vld.sshfl [vmem:[%s5125_s20 + $0x10] sm:$0x13 pattern:$0x76325410] }
  0x78   : > { %4457 = vmatprep.subr.bf16.mxu0 %v5040_v1  ;;  %v1672_v21 = vshrl.u32 %v3926_v19, 16  ;;  %v1675_v22 = vshll.u32 %v3926_v19, 16 }
  0x7b   : > { %4458 = vmatpush3.bf16.msra.mxu0 %v4877_v30  ;;  %v1149_v30 = vrot.slane %v1147_v20, 7  ;;  %v4921_v20 = vld [vmem:[%s5971_s1 + $0x208] sm:$0xff]  }
  0x7c   : > { %4459 = vmatprep.subr.bf16.mxu0 %v5040_v1 }
  0x7f   : > { %4460 = vmatpush3.bf16.msra.mxu0 %v4878_v33  ;;  %v4896_v33 = vld [vmem:[%s5971_s1 + $0x160] sm:$0xff]  }
  0x80   : > { %4461 = vmatprep.subr.bf16.mxu0 %v5040_v1 }
  0x83   : > { %4462 = vmatpush3.bf16.msra.mxu0 %v4879_v34  ;;  %v1173_v34 = vrot.slane %v1172_v24, 2  ;;  %v1628_v24 = vcombine.high %v3926_v19, %v3926_v19 }
  0x84   : > { %4467 = vmatprep.subr.bf16.mxu0 %v5040_v1 }
  0x86   : > { %4464 = vmatmul.mubr.bf16.vlgmr.msra.gmra.mrb[0].mxu0 %v869_v36  ;;  %v1187_v36 = vrot.slane %v1186_v26, 2  ;;  %v1677_v26 = vrot.slane %v1675_v22, 7 }
  0x87   : > { %4468 = vmatpush3.bf16.msra.mxu0 %v4882_v35  ;;  %4483 = vmatprep.mubr.msk.bf16.mxu0 %vm5041_vm0, %v5040_v1  ;;  %v1177_v35 = vrot.slane %v1175_v25, 7  ;;  %v1674_v25 = vrot.slane %v1672_v21, 6 }
  0x88   : > { %4469 = vmatprep.subr.bf16.mxu0 %v5040_v1 }
  0x89   : > { %v1178_v42 = vsel %vm5215_vm7, %v1173_v34, %v1177_v35  ;;  %v1678_v28 = vor.u32 %v1677_v26, %v1674_v25  ;;  %v1702_v35 = vcombine.low %v5226_v15, %v5230_v16  ;;  %v4935_v16 = vld [vmem:[%s5974_s4 + $0x38] sm:$0xff]  }
  0x8b   : > { %4470 = vmatpush3.bf16.msra.mxu0 %v4883_v37  ;;  %v1191_v37 = vrot.slane %v1189_v27, 7  ;;  %v4923_v27 = vld [vmem:[%s5971_s1 + $0x218] sm:$0xff]  }
  0x8c   : > { %4471 = vmatprep.subr.bf16.mxu0 %v5040_v1 }
  0x8d   : > { %v1192_v43 = vsel %vm5215_vm7, %v1187_v36, %v1191_v37  ;;  %v4926_v37 = vld [vmem:[%s5971_s1 + $0x230] sm:$0xff]  }
  0x8e   : > { %v1211_v46 = vcombine.low %v1178_v42, %v1192_v43  ;;  %v4937_v42 = vld [vmem:[%s5976_s6 + $0x48] sm:$0xff]   ;;  %v4939_v43 = vld [vmem:[%s5976_s6 + $0x58] sm:$0xff]  }
  0x8f   : > { %4472 = vmatpush3.bf16.msra.mxu0 %v4884_v38  ;;  %v4932_v38 = vld [vmem:[%s5974_s4 + $0x20] sm:$0xff]  }
  0x90   : > { %4473 = vmatprep.subr.bf16.mxu0 %v5040_v1  ;;  %4576 = vmatpush3.bf16.msra.mxu1 %v4932_v38  ;;  %v1225_v51 = vrot.slane %v1211_v46, %v5141_v14  ;;  %v1710_v38 = vrot.slane %v1702_v35, %v5141_v14  ;;  %v4942_v46 = vld [vmem:[%s5976_s6 + $0x70] sm:$0xff]  }
  0x91   : > { %4577 = vmatprep.subr.bf16.mxu1 %v5040_v1 }
  0x93   : > { %4474 = vmatpush3.bf16.msra.mxu0 %v4885_v39  ;;  %v4897_v39 = vld [vmem:[%s5971_s1 + $0x168] sm:$0xff]  }
  0x94   : > { %4475 = vmatprep.subr.bf16.mxu0 %v5040_v1 }
  0x97   : > { %4476 = vmatpush3.bf16.msra.mxu0 %v4886_v40  ;;  %v1150_v40 = vsel %vm5215_vm7, %v1145_v29, %v1149_v30  ;;  %v1681_v29 = vshll.u32 %v1628_v24, 16  ;;  %v4924_v30 = vld [vmem:[%s5971_s1 + $0x220] sm:$0xff]  }
  0x98   : > { %4477 = vmatprep.subr.bf16.mxu0 %v5040_v1 }
  0x9b   : > { %4478 = vmatpush3.bf16.msra.mxu0 %v4887_v41  ;;  %v1164_v41 = vsel %vm5215_vm7, %v1159_v31, %v1163_v32  ;;  %v1679_v31 = vrot.slane %v1678_v28, 2  ;;  %v1683_v32 = vrot.slane %v1681_v29, 7 }
  0x9c   : > { %4479 = vmatprep.subr.bf16.mxu0 %v5040_v1 }
  0x9d   : > { %v1684_v34 = vsel %vm5215_vm7, %v1679_v31, %v1683_v32 }
  0x9e   : > { %v1703_v36 = vcombine.low %v5234_v17, %v1684_v34  ;;  %v5043_v17 = vmov 0  }
  0x9f   : > { %4480 = vmatpush3.bf16.msra.mxu0 %v4888_v44  ;;  %v4933_v44 = vld [vmem:[%s5974_s4 + $0x28] sm:$0xff]   ;;  %1943 = vst [vmem:[#allocation2] sm:$0x7] %v5043_v17  ;;  %1944 = vst [vmem:[#allocation2 + $0x4] sm:$0x7] %v5043_v17 }
  0xa0   : > { %4481 = vmatprep.subr.bf16.mxu0 %v5040_v1  ;;  %4578 = vmatpush3.bf16.msra.mxu1 %v4933_v44  ;;  %1945 = vst [vmem:[#allocation2 + $0x8] sm:$0x7] %v5043_v17  ;;  %1948 = vst [vmem:[#allocation2 + $0x14] sm:$0x7] %v5043_v17  ;;  %v4940_v44 = vld [vmem:[%s5976_s6 + $0x60] sm:$0xff]  }
  0xa1   : > { %4579 = vmatprep.subr.bf16.mxu1 %v5040_v1  ;;  %1946 = vst [vmem:[#allocation2 + $0xc] sm:$0x7] %v5043_v17  ;;  %1947 = vst [vmem:[#allocation2 + $0x10] sm:$0x7] %v5043_v17 }
  0xa3   : > { %4482 = vmatpush3.bf16.msra.mxu0 %v4889_v45  ;;  %v1210_v45 = vcombine.low %v1150_v40, %v1164_v41  ;;  %v4927_v40 = vld [vmem:[%s5971_s1 + $0x238] sm:$0xff]   ;;  %v4936_v41 = vld [vmem:[%s5976_s6 + $0x40] sm:$0xff]  }
  0xa4   : > { %4487 = vmatprep.subr.bf16.mxu0 %v5040_v1 }
  0xa5   : > { %v1218_v50 = vrot.slane %v1210_v45, %v5141_v14  ;;  %v4941_v45 = vld [vmem:[%s5976_s6 + $0x68] sm:$0xff]  }
  0xa6   : > { %4484 = vmatmul.mubr.bf16.vlgmr.msra.gmra.mrb[0].mxu0 %v5323_v47  ;;  %v3964_v60 = vld.sshfl [vmem:[#allocation2] sm:$0x13 pattern:$0x76325410] }
  0xa7   : > { %4488 = vmatpush3.bf16.msra.mxu0 %v4892_v49  ;;  %4503 = vmatprep.mubr.msk.bf16.mxu0 %vm5041_vm0, %v5040_v1  ;;  %v4934_v49 = vld [vmem:[%s5974_s4 + $0x30] sm:$0xff]   ;;  %v1226_v53 = vcombine.low %v1218_v50, %v1225_v51  ;;  %v3952_v51 = vld [vmem:[%s5973_s3] ss:$0 sm:$0xff]  ;;  %v1974_v24 = vld [vmem:[#allocation2 + $0x8] sm:$0x7] }
  0xa8   : > { %4489 = vmatprep.subr.bf16.mxu0 %v5040_v1  ;;  %4580 = vmatpush3.bf16.msra.mxu1 %v4934_v49  ;;  %v3951_v49 = vld [vmem:[%s5972_s2] ss:$0 sm:$0xff]  ;;  %v1988_v25 = vld [vmem:[#allocation2 + $0xc] sm:$0x7]  ;;  %v1997_v34 = vld [vmem:[#allocation2 + $0x10] sm:$0x7] }
  0xa9   : > { %4581 = vmatprep.subr.bf16.mxu1 %v5040_v1 }
  0xab   : > { %4490 = vmatpush3.bf16.msra.mxu0 %v4893_v57  ;;  %v4903_v57 = vld [vmem:[%s5971_s1 + $0x198] sm:$0xff]  }
  0xac   : > { %4491 = vmatprep.subr.bf16.mxu0 %v5040_v1  ;;  %4582 = vmatpush3.bf16.msra.mxu1 %v4935_v16 }
  0xad   : > { %4587 = vmatprep.subr.bf16.mxu1 %v5040_v1 }
  0xaf   : > { %4492 = vmatpush3.bf16.msra.mxu0 %v4894_v8  ;;  %v5024_v8 = vld.sshfl [vmem:[%s5125_s20 + $0x18] sm:$0xf pattern:$0x76325410]  ;;  %4584 = vmatmul.mubr.bf16.vlgmr.msra.gmra.mrb[0].mxu1 %v5323_v47  ;;  %v4938_v47 = vld [vmem:[%s5976_s6 + $0x50] sm:$0xff]  }
  0xb0   : > { %4493 = vmatprep.subr.bf16.mxu0 %v5040_v1  ;;  %v1496_v13 = vcombine.low %v5024_v8, %v5025_v9  ;;  %4603 = vmatprep.mubr.msk.bf16.mxu1 %vm5041_vm0, %v5040_v1 }
  0xb1   : > { %4588 = vmatpush3.bf16.msra.mxu1 %v4936_v41  ;;  %v5576_v41 = vld.sshfl [vmem:[#allocation2 + $0x14] sm:$0x12 pattern:$0x76325410] }
  0xb2   : > { %4589 = vmatprep.subr.bf16.mxu1 %v5040_v1 }
  0xb3   : > { %4494 = vmatpush3.bf16.msra.mxu0 %v4895_v23  ;;  %v4922_v23 = vld [vmem:[%s5971_s1 + $0x210] sm:$0xff]  }
  0xb4   : > { %4495 = vmatprep.subr.bf16.mxu0 %v5040_v1 }
  0xb5   : > { %4590 = vmatpush3.bf16.msra.mxu1 %v4937_v42 }
  0xb6   : > { %4591 = vmatprep.subr.bf16.mxu1 %v5040_v1 }
  0xb7   : > { %4496 = vmatpush3.bf16.msra.mxu0 %v4896_v33  ;;  %v4925_v33 = vld [vmem:[%s5971_s1 + $0x228] sm:$0xff]  }
  0xb8   : > { %4497 = vmatprep.subr.bf16.mxu0 %v5040_v1 }
  0xb9   : > { %4592 = vmatpush3.bf16.msra.mxu1 %v4938_v47 }
  0xba   : > { %4593 = vmatprep.subr.bf16.mxu1 %v5040_v1 }
  0xbb   : > { %4498 = vmatpush3.bf16.msra.mxu0 %v4897_v39  ;;  %v1717_v39 = vrot.slane %v1703_v36, %v5141_v14 }
  0xbc   : > { %4499 = vmatprep.subr.bf16.mxu0 %v5040_v1 }
  0xbd   : > { %v1718_v15 = vcombine.low %v1710_v38, %v1717_v39  ;;  %4594 = vmatpush3.bf16.msra.mxu1 %v4939_v43 }
  0xbe   : > { %4595 = vmatprep.subr.bf16.mxu1 %v5040_v1 }
  0xbf   : > { %4500 = vmatpush3.bf16.msra.mxu0 %v4898_v48  ;;  %v4943_v48 = vld [vmem:[%s5976_s6 + $0x78] sm:$0xff]  }
  0xc0   : > { %4501 = vmatprep.subr.bf16.mxu0 %v5040_v1 }
  0xc1   : > { %4596 = vmatpush3.bf16.msra.mxu1 %v4940_v44 }
  0xc2   : > { %4597 = vmatprep.subr.bf16.mxu1 %v5040_v1 }
  0xc3   : > { %4502 = vmatpush3.bf16.msra.mxu0 %v4899_v52 }
  0xc4   : > { %4507 = vmatprep.subr.bf16.mxu0 %v5040_v1 }
  0xc5   : > { %4598 = vmatpush3.bf16.msra.mxu1 %v4941_v45 }
  0xc6   : > { %4504 = vmatmul.mubr.bf16.vlgmr.msra.gmra.mrb[0].mxu0 %v1226_v53  ;;  %4599 = vmatprep.subr.bf16.mxu1 %v5040_v1 }
  0xc7   : > { %4508 = vmatpush3.bf16.msra.mxu0 %v4900_v54  ;;  %4523 = vmatprep.mubr.msk.bf16.mxu0 %vm5041_vm0, %v5040_v1 }
  0xc8   : > { %4509 = vmatprep.subr.bf16.mxu0 %v5040_v1 }
  0xc9   : > { %4600 = vmatpush3.bf16.msra.mxu1 %v4942_v46 }
  0xca   : > { %4601 = vmatprep.subr.bf16.mxu1 %v5040_v1 }
  0xcb   : > { %4510 = vmatpush3.bf16.msra.mxu0 %v4901_v55 }
  0xcc   : > { %4511 = vmatprep.subr.bf16.mxu0 %v5040_v1 }
  0xcd   : > { %4602 = vmatpush3.bf16.msra.mxu1 %v4943_v48 }
  0xce   : > { %4607 = vmatprep.subr.bf16.mxu1 %v5040_v1 }
  0xcf   : > { %4512 = vmatpush3.bf16.msra.mxu0 %v4902_v56 }
  0xd0   : > { %4513 = vmatprep.subr.bf16.mxu0 %v5040_v1 }
  0xd3   : > { %4514 = vmatpush3.bf16.msra.mxu0 %v4903_v57 }
  0xd4   : > { %4515 = vmatprep.subr.bf16.mxu0 %v5040_v1 }
  0xd7   : > { %4516 = vmatpush3.bf16.msra.mxu0 %v4904_v58 }
  0xd8   : > { %4517 = vmatprep.subr.bf16.mxu0 %v5040_v1 }
  0xdb   : > { %4518 = vmatpush3.bf16.msra.mxu0 %v4905_v59 }
  0xdc   : > { %4519 = vmatprep.subr.bf16.mxu0 %v5040_v1 }
  0xdf   : > { %4520 = vmatpush3.bf16.msra.mxu0 %v4906_v62 }
  0xe0   : > { %4521 = vmatprep.subr.bf16.mxu0 %v5040_v1 }
  0xe3   : > { %4522 = vmatpush3.bf16.msra.mxu0 %v4907_v63  ;;  %v2061_v63 = vshrl.u32 %v3964_v60, 16 }
  0xe4   : > { %4527 = vmatprep.subr.bf16.mxu0 %v5040_v1 }
  0xe6   : > { %4524 = vmatmul.mubr.bf16.vlgmr.msra.gmra.mrb[0].mxu0 %v1361_v0  ;;  %v2064_v0 = vshll.u32 %v3964_v60, 16 }
  0xe7   : > { %4528 = vmatpush3.bf16.msra.mxu0 %v4910_v2  ;;  %4543 = vmatprep.mubr.msk.bf16.mxu0 %vm5041_vm0, %v5040_v1 }
  0xe8   : > { %4529 = vmatprep.subr.bf16.mxu0 %v5040_v1  ;;  %v2066_v19 = vrot.slane %v2064_v0, 7 }
  0xeb   : > { %4530 = vmatpush3.bf16.msra.mxu0 %v4911_v3 }
  0xec   : > { %4531 = vmatprep.subr.bf16.mxu0 %v5040_v1 }
  0xef   : > { %4532 = vmatpush3.bf16.msra.mxu0 %v4912_v4 }
  0xf0   : > { %4533 = vmatprep.subr.bf16.mxu0 %v5040_v1 }
  0xf3   : > { %4534 = vmatpush3.bf16.msra.mxu0 %v4913_v5 }
  0xf4   : > { %4535 = vmatprep.subr.bf16.mxu0 %v5040_v1 }
  0xf7   : > { %4536 = vmatpush3.bf16.msra.mxu0 %v4914_v6 }
  0xf8   : > { %4537 = vmatprep.subr.bf16.mxu0 %v5040_v1 }
  0xfb   : > { %4538 = vmatpush3.bf16.msra.mxu0 %v4915_v7 }
  0xfc   : > { %4539 = vmatprep.subr.bf16.mxu0 %v5040_v1 }
  0xff   : > { %4540 = vmatpush3.bf16.msra.mxu0 %v4916_v10  ;;  %v1965_v10 = vld [vmem:[#allocation2 + $0x4] sm:$0x7] }
 0x100   : > { %4541 = vmatprep.subr.bf16.mxu0 %v5040_v1 }
 0x103   : > { %4542 = vmatpush3.bf16.msra.mxu0 %v4917_v12 }
 0x104   : > { %4547 = vmatprep.subr.bf16.mxu0 %v5040_v1 }
 0x106   : > { %4544 = vmatmul.mubr.bf16.vlgmr.msra.gmra.mrb[0].mxu0 %v1496_v13  ;;  %v2035_v13 = vcombine.high %v3964_v60, %v3964_v60 }
 0x107   : > { %4548 = vmatpush3.bf16.msra.mxu0 %v4920_v18  ;;  %4563 = vmatprep.mubr.msk.bf16.mxu0 %vm5041_vm0, %v5040_v1  ;;  %v2063_v18 = vrot.slane %v2061_v63, 6 }
 0x108   : > { %4549 = vmatprep.subr.bf16.mxu0 %v5040_v1  ;;  %v2070_v36 = vshll.u32 %v2035_v13, 16 }
 0x109   : > { %v2067_v35 = vor.u32 %v2066_v19, %v2063_v18 }
 0x10a   : > { %v2072_v16 = vrot.slane %v2070_v36, 7 }
 0x10b   : > { %4550 = vmatpush3.bf16.msra.mxu0 %v4921_v20 }
 0x10c   : > { %4551 = vmatprep.subr.bf16.mxu0 %v5040_v1 }
 0x10f   : > { %4552 = vmatpush3.bf16.msra.mxu0 %v4922_v23 }
 0x110   : > { %4553 = vmatprep.subr.bf16.mxu0 %v5040_v1 }
 0x113   : > { %4554 = vmatpush3.bf16.msra.mxu0 %v4923_v27 }
 0x114   : > { %4555 = vmatprep.subr.bf16.mxu0 %v5040_v1 }
 0x117   : > { %4556 = vmatpush3.bf16.msra.mxu0 %v4924_v30  ;;  %v5566_v30 = vld.sshfl [vmem:[#allocation2 + $0x14] sm:$0x13 pattern:$0x76325410] }
 0x118   : > { %4557 = vmatprep.subr.bf16.mxu0 %v5040_v1  ;;  %v3295_v38 = vshrl.u32 %v5566_v30, 16 }
 0x11a   : > { %v3297_v17 = vrot.slane %v3295_v38, 6 }
 0x11b   : > { %4558 = vmatpush3.bf16.msra.mxu0 %v4925_v33 }
 0x11c   : > { %4559 = vmatprep.subr.bf16.mxu0 %v5040_v1 }
 0x11f   : > { %4560 = vmatpush3.bf16.msra.mxu0 %v4926_v37 }
 0x120   : > { %4561 = vmatprep.subr.bf16.mxu0 %v5040_v1 }
 0x123   : > { %4562 = vmatpush3.bf16.msra.mxu0 %v4927_v40  ;;  %v3298_v40 = vshll.u32 %v5566_v30, 16 }
 0x125   : > { %v3300_v45 = vrot.slane %v3298_v40, 7 }
 0x126   : > { %4564 = vmatmul.mubr.bf16.vlgmr.msra.gmra.mrb[0].mxu0 %v1718_v15  ;;  %v2068_v15 = vrot.slane %v2067_v35, 2 }
 0x128   : > { %v2073_v48 = vsel %vm5215_vm7, %v2068_v15, %v2072_v16 }
 0x1f9   : > { %v1802_v50 = vpop.f32.mrb[0].mxu0 }
 0x1fa   : > { %v1818_v52 = vmul.f32 %v3951_v49, %v1802_v50  ;;  %v4565_v53 = vpop.f32.mrb[1].mxu0 }
 0x1fb   : > { %v1805_v54 = vpop.f32.mrb[2].mxu0  ;;  %v3473_v53 = vcombine.high %v5576_v41, %v5576_v41 }
 0x1fc   : > { %v1827_v55 = vadd.f32 %v3952_v51, %v1818_v52  ;;  %v1819_v56 = vmul.f32 %v3951_v49, %v1805_v54  ;;  %v4566_v57 = vpop.f32.mrb[3].mxu0 }
 0x1fe   : > { %v1829_v58 = vmax.f32 %v1827_v55, 0.0  ;;  %v1828_v59 = vadd.f32 %v3952_v51, %v1819_v56 }
 0x200   : > { %v4207_v61 = vpack.c.bf16 %v1829_v58, %v1829_v58  ;;  %v1830_v62 = vmax.f32 %v1828_v59, 0.0 }
 0x202   : > { %v1954_v2 = vshrl.u32 %v4207_v61, 16  ;;  %v1957_v3 = vshll.u32 %v4207_v61, 16  ;;  %v4208_v4 = vpack.c.bf16 %v1830_v62, %v1830_v62  ;;  %v3251_v61 = vcombine.high %v5566_v30, %v5566_v30 }
 0x204   : > { %v1956_v5 = vrot.slane %v1954_v2, 7  ;;  %v1968_v6 = vrot.slane %v1954_v2, 5  ;;  %v1969_v7 = vrot.slane %v1957_v3, 6  ;;  %v1980_v8 = vshrl.u32 %v4208_v4, 16 }
 0x205   : > { %v1983_v12 = vshll.u32 %v4208_v4, 16 }
 0x206   : > { %v1959_v20 = vor.u32 %v1957_v3, %v1956_v5  ;;  %v1970_v21 = vor.u32 %v1969_v7, %v1968_v6  ;;  %v1982_v22 = vrot.slane %v1980_v8, 7  ;;  %v1991_v23 = vrot.slane %v1980_v8, 5 }
 0x207   : > { %v1992_v26 = vrot.slane %v1983_v12, 6 }
 0x208   : > { %v1966_v27 = vsel %vm5560_vm10, %v1959_v20, %v1965_v10  ;;  %v1971_v28 = vrot.slane %v1970_v21, 4  ;;  %v1985_v29 = vor.u32 %v1983_v12, %v1982_v22  ;;  %v3301_v10 = vor.u32 %v3300_v45, %v3297_v17 }
 0x209   : > { %1967 = vst [vmem:[#allocation2 + $0x4] sm:$0x7] %v1966_v27  ;;  %v1993_v31 = vor.u32 %v1992_v26, %v1991_v23  ;;  %v4175_v12 = vrot.slane %v5576_v41, 9  ;;  %v3488_v21 = vrot.slane %v3473_v53, 7 }
 0x20a   : > { %v1975_v32 = vsel %vm5560_vm10, %v1971_v28, %v1974_v24  ;;  %v1989_v33 = vsel %vm5560_vm10, %v1985_v29, %v1988_v25  ;;  %v3304_v29 = vshll.u32 %v3251_v61, 16 }
 0x20b   : > { %1976 = vst [vmem:[#allocation2 + $0x8] sm:$0x7] %v1975_v32  ;;  %1990 = vst [vmem:[#allocation2 + $0xc] sm:$0x7] %v1989_v33  ;;  %v1994_v37 = vrot.slane %v1993_v31, 4  ;;  %v3302_v33 = vrot.slane %v3301_v10, 2 }
 0x20c   : > { %v4946_v10 = vld [vmem:[%s5976_s6 + $0x10] sm:$0xff]  }
 0x20d   : > { %v1998_v39 = vsel %vm5560_vm10, %v1994_v37, %v1997_v34 }
 0x20e   : > { %1999 = vst [vmem:[#allocation2 + $0x10] sm:$0x7] %v1998_v39 }
 0x210   : > { %v3965_v42 = vld.sshfl [vmem:[#allocation2 + $0x4] sm:$0x13 pattern:$0x76325410] }
 0x211   : > { %v2043_v47 = vcombine.high %v3965_v42, %v3965_v42  ;;  %v2075_v43 = vshrl.u32 %v3965_v42, 16  ;;  %v2078_v44 = vshll.u32 %v3965_v42, 16  ;;  %v4001_v8 = vld.sshfl [vmem:[#allocation2 + $0x4] sm:$0x12 pattern:$0x76325410] }
 0x212   : > { %v3966_v46 = vld.sshfl [vmem:[#allocation2 + $0x8] sm:$0x13 pattern:$0x76325410]  ;;  %v2374_v20 = vcombine.high %v4001_v8, %v4001_v8  ;;  %v4005_v15 = vrot.slane %v4001_v8, 9 }
 0x213   : > { %v3967_v49 = vld.sshfl [vmem:[#allocation2 + $0xc] sm:$0x13 pattern:$0x76325410]  ;;  %v2051_v50 = vcombine.high %v3966_v46, %v3966_v46  ;;  %v2077_v51 = vrot.slane %v2075_v43, 6  ;;  %v2080_v52 = vrot.slane %v2078_v44, 7 }
 0x214   : > { %v2059_v54 = vcombine.high %v3967_v49, %v3967_v49  ;;  %v2084_v55 = vshll.u32 %v2043_v47, 16  ;;  %v2089_v56 = vshrl.u32 %v3966_v46, 16  ;;  %v2092_v57 = vshll.u32 %v3966_v46, 16 }
 0x215   : > { %v2081_v58 = vor.u32 %v2080_v52, %v2077_v51  ;;  %v2103_v59 = vshrl.u32 %v3967_v49, 16  ;;  %v2106_v60 = vshll.u32 %v3967_v49, 16  ;;  %v2098_v2 = vshll.u32 %v2051_v50, 16 }
 0x216   : > { %v2086_v62 = vrot.slane %v2084_v55, 7  ;;  %v2091_v63 = vrot.slane %v2089_v56, 6  ;;  %v2094_v0 = vrot.slane %v2092_v57, 7  ;;  %v2112_v6 = vshll.u32 %v2059_v54, 16 }
 0x217   : > { %v2082_v3 = vrot.slane %v2081_v58, 2  ;;  %v2105_v4 = vrot.slane %v2103_v59, 6  ;;  %v2108_v5 = vrot.slane %v2106_v60, 7  ;;  %v2100_v23 = vrot.slane %v2098_v2, 7 }
 0x218   : > { %v2095_v7 = vor.u32 %v2094_v0, %v2091_v63  ;;  %v4002_v19 = vld.sshfl [vmem:[#allocation2 + $0x8] sm:$0x12 pattern:$0x76325410]  ;;  %v2114_v27 = vrot.slane %v2112_v6, 7  ;;  %v2404_v35 = vrot.slane %v2374_v20, 7  ;;  %v3489_v58 = vsel %vm5605_vm2, %v4175_v12, %v3488_v21 }
 0x219   : > { %v5593_v13 = vsel %vm5215_vm7, %v2082_v3, %v2086_v62  ;;  %v2109_v18 = vor.u32 %v2108_v5, %v2105_v4  ;;  %v4003_v24 = vld.sshfl [vmem:[#allocation2 + $0xc] sm:$0x12 pattern:$0x76325410]  ;;  %v2382_v25 = vcombine.high %v4002_v19, %v4002_v19  ;;  %v4006_v16 = vrot.slane %v4002_v19, 9 }
 0x21a   : > { %v2096_v22 = vrot.slane %v2095_v7, 2  ;;  %v2390_v28 = vcombine.high %v4003_v24, %v4003_v24  ;;  %v2133_v31 = vcombine.low %v2073_v48, %v5593_v13  ;;  %v4059_v37 = vld.sshfl [vmem:[#allocation2 + $0x10] sm:$0x13 pattern:$0x76325410]  ;;  %v4007_v41 = vrot.slane %v4003_v24, 9 }
 0x21b   : > { %v2110_v26 = vrot.slane %v2109_v18, 2  ;;  %v2408_v32 = vrot.slane %v2382_v25, 7  ;;  %v4087_v17 = vld.sshfl [vmem:[#allocation2 + $0x10] sm:$0x12 pattern:$0x76325410]  ;;  %v2713_v42 = vcombine.high %v4059_v37, %v4059_v37  ;;  %v5620_v49 = vsel %vm5605_vm2, %v4005_v15, %v2404_v35 }
 0x21c   : > { %v2101_v30 = vsel %vm5215_vm7, %v2096_v22, %v2100_v23  ;;  %v2412_v36 = vrot.slane %v2390_v28, 7  ;;  %v2757_v47 = vshrl.u32 %v4059_v37, 16  ;;  %v2141_v43 = vrot.slane %v2133_v31, %v5141_v14  ;;  %v4944_v48 = vld [vmem:[%s5976_s6] sm:$0xff]   ;;  %v4945_v63 = vld [vmem:[%s5976_s6 + $0x8] sm:$0xff]   ;;  %v4947_v24 = vld [vmem:[%s5976_s6 + $0x18] sm:$0xff]  }
 0x21d   : > { %v2115_v34 = vsel %vm5215_vm7, %v2110_v26, %v2114_v27  ;;  %v2787_v38 = vcombine.low %v5593_v13, %v2101_v30  ;;  %v2409_v45 = vsel %vm5605_vm2, %v4006_v16, %v2408_v32  ;;  %v2760_v46 = vshll.u32 %v4059_v37, 16  ;;  %v4948_v27 = vld [vmem:[%s5976_s6 + $0x20] sm:$0xff]   ;;  %v4949_v28 = vld [vmem:[%s5976_s6 + $0x28] sm:$0xff]   ;;  %v4951_v32 = vld [vmem:[%s5976_s6 + $0x38] sm:$0xff]   ;;  %v5715_v16 = vpop.f32.mrb[0].mxu1 }
 0x21e   : > { %v2134_v39 = vcombine.low %v2101_v30, %v2115_v34  ;;  %v2413_v50 = vsel %vm5605_vm2, %v4007_v41, %v2412_v36  ;;  %v2759_v51 = vrot.slane %v2757_v47, 6  ;;  %v3306_v52 = vrot.slane %v3304_v29, 7  ;;  %v4950_v29 = vld [vmem:[%s5976_s6 + $0x30] sm:$0xff]   ;;  %v4955_v35 = vld [vmem:[%s5976_s6 + $0x88] sm:$0xff]   ;;  %v4957_v37 = vld [vmem:[%s5976_s6 + $0x98] sm:$0xff]  }
 0x21f   : > { %v2762_v54 = vrot.slane %v2760_v46, 7  ;;  %v2766_v55 = vshll.u32 %v2713_v42, 16  ;;  %v2935_v56 = vcombine.high %v4087_v17, %v4087_v17  ;;  %v2969_v57 = vcombine.low %v5620_v49, %v2409_v45  ;;  %v5026_v30 = vld.sshfl [vmem:[#allocation2 + $0x8] sm:$0xf pattern:$0x76325410] }
 0x220   : > { %v5611_v44 = vrot.slane %v2134_v39, %v5141_v14  ;;  %v2432_v59 = vcombine.low %v2409_v45, %v2413_v50  ;;  %v4091_v61 = vrot.slane %v4087_v17, 9  ;;  %v3307_v4 = vsel %vm5215_vm7, %v3302_v33, %v3306_v52  ;;  %v5027_v31 = vld.sshfl [vmem:[#allocation2] sm:$0xf pattern:$0x76325410]  ;;  %v4956_v36 = vld [vmem:[%s5976_s6 + $0x90] sm:$0xff]  }
 0x221   : > { %v2763_v60 = vor.u32 %v2762_v54, %v2759_v51  ;;  %v2950_v62 = vrot.slane %v2935_v56, 7  ;;  %v2768_v2 = vrot.slane %v2766_v55, 7  ;;  %v5644_v9 = vrot.slane %v2969_v57, %v5141_v14  ;;  %v4954_v33 = vld [vmem:[%s5976_s6 + $0x80] sm:$0xff]   ;;  %v4585_v17 = vpop.f32.mrb[1].mxu1  ;;  %v4959_v41 = vld [vmem:[%s5976_s6 + $0xa8] sm:$0xff]   ;;  %v4960_v46 = vld [vmem:[%s5976_s6 + $0xb0] sm:$0xff]  }
 0x222   : > { %v2149_v53 = vcombine.low %v2141_v43, %v5611_v44  ;;  %v5639_v7 = vrot.slane %v2432_v59, %v5141_v14  ;;  %v5657_v11 = vrot.slane %v2787_v38, %v5141_v14  ;;  %v4000_v38 = vld.sshfl [vmem:[#allocation2] sm:$0x12 pattern:$0x76325410]  ;;  %v5720_v43 = vpop.f32.mrb[2].mxu1  ;;  %v4961_v51 = vld [vmem:[%s5976_s6 + $0xb8] sm:$0xff]  }
 0x223   : > { %v2764_v0 = vrot.slane %v2763_v60, 2  ;;  %v2951_v3 = vsel %vm5605_vm2, %v4091_v61, %v2950_v62  ;;  %v4958_v39 = vld [vmem:[%s5976_s6 + $0xa0] sm:$0xff]   ;;  %v2366_v15 = vcombine.high %v4000_v38, %v4000_v38  ;;  %v4004_v42 = vrot.slane %v4000_v38, 9  ;;  %v4586_v45 = vpop.f32.mrb[3].mxu1  ;;  %v4965_v54 = vld [vmem:[%s5976_s6 + $0xd8] sm:$0xff]   ;;  %v4967_v56 = vld [vmem:[%s5976_s6 + $0xe8] sm:$0xff]  }
 0x224   : > { %4604 = vmatmul.mubr.bf16.vlgmr.msra.gmra.mrb[4].mxu1 %v2149_v53  ;;  %v2970_v5 = vcombine.low %v2413_v50, %v2951_v3  ;;  %v3508_v6 = vcombine.low %v2951_v3, %v3489_v58  ;;  %v4962_v53 = vld [vmem:[%s5976_s6 + $0xc0] sm:$0xff]   ;;  %v4968_v57 = vld [vmem:[%s5976_s6 + $0xf0] sm:$0xff]   ;;  %v4969_v60 = vld [vmem:[%s5976_s6 + $0xf8] sm:$0xff]  }
 0x225   : > { %4608 = vmatpush3.bf16.msra.mxu1 %v4944_v48  ;;  %4623 = vmatprep.mubr.msk.bf16.mxu1 %vm5041_vm0, %v5040_v1  ;;  %v2769_v8 = vsel %vm5215_vm7, %v2764_v0, %v2768_v2  ;;  %v2400_v47 = vrot.slane %v2366_v15, 7  ;;  %v4966_v55 = vld [vmem:[%s5976_s6 + $0xe0] sm:$0xff]   ;;  %v5028_v58 = vld.sshfl [vmem:[#allocation2 + $0xc] sm:$0xf pattern:$0x76325410] }
 0x226   : > { %4609 = vmatprep.subr.bf16.mxu1 %v5040_v1  ;;  %v2788_v12 = vcombine.low %v2115_v34, %v2769_v8  ;;  %v5650_v13 = vrot.slane %v2970_v5, %v5141_v14  ;;  %v3326_v18 = vcombine.low %v2769_v8, %v3307_v4  ;;  %v5653_v19 = vrot.slane %v3508_v6, %v5141_v14  ;;  %v5029_v59 = vld.sshfl [vmem:[#allocation2 + $0x4] sm:$0xf pattern:$0x76325410]  ;;  %v4974_v0 = vld [vmem:[%s5976_s6 + $0x110] sm:$0xff]   ;;  %v4975_v2 = vld [vmem:[%s5976_s6 + $0x118] sm:$0xff]  }
 0x227   : > { %v2260_v34 = vcombine.low %v5027_v31, %v5026_v30  ;;  %v2401_v48 = vsel %vm5605_vm2, %v4004_v42, %v2400_v47  ;;  %v4972_v61 = vld [vmem:[%s5976_s6 + $0x100] sm:$0xff]   ;;  %v2581_v62 = vcombine.low %v5029_v59, %v5028_v58  ;;  %v4977_v4 = vld [vmem:[%s5976_s6 + $0x128] sm:$0xff]   ;;  %v4978_v5 = vld [vmem:[%s5976_s6 + $0x130] sm:$0xff]  }
 0x228   : > { %v5660_v20 = vrot.slane %v2788_v12, %v5141_v14  ;;  %v2985_v21 = vcombine.low %v5644_v9, %v5650_v13  ;;  %v5665_v22 = vrot.slane %v3326_v18, %v5141_v14  ;;  %v3523_v23 = vcombine.low %v5639_v7, %v5653_v19  ;;  %v4976_v3 = vld [vmem:[%s5976_s6 + $0x120] sm:$0xff]   ;;  %v4979_v6 = vld [vmem:[%s5976_s6 + $0x138] sm:$0xff]   ;;  %v4982_v12 = vld [vmem:[%s5976_s6 + $0x150] sm:$0xff]  }
 0x229   : > { %4610 = vmatpush3.bf16.msra.mxu1 %v4945_v63  ;;  %v2431_v50 = vcombine.low %v2401_v48, %v5620_v49  ;;  %v4963_v49 = vld [vmem:[%s5976_s6 + $0xc8] sm:$0xff]   ;;  %v4980_v8 = vld [vmem:[%s5976_s6 + $0x140] sm:$0xff]   ;;  %v4983_v18 = vld [vmem:[%s5976_s6 + $0x158] sm:$0xff]  }
 0x22a   : > { %4611 = vmatprep.subr.bf16.mxu1 %v5040_v1  ;;  %v2803_v25 = vcombine.low %v5657_v11, %v5660_v20  ;;  %v3341_v26 = vcombine.low %v5611_v44, %v5665_v22  ;;  %v4973_v63 = vld [vmem:[%s5976_s6 + $0x108] sm:$0xff]   ;;  %v4984_v11 = vld [vmem:[%s5976_s6 + $0x160] sm:$0xff]   ;;  %v4991_v9 = vld [vmem:[%s5976_s6 + $0x198] sm:$0xff]  }
 0x22b   : > { %v2439_v52 = vrot.slane %v2431_v50, %v5141_v14  ;;  %v4964_v14 = vld [vmem:[%s5976_s6 + $0xd0] sm:$0xff]   ;;  %v4985_v20 = vld [vmem:[%s5976_s6 + $0x168] sm:$0xff]   ;;  %v4992_v13 = vld [vmem:[%s5976_s6 + $0x1a0] sm:$0xff]  }
 0x22c   : > { %v4994_v30 = vld [vmem:[%s5976_s6 + $0x1b0] sm:$0xff]   ;;  %v5001_v38 = vld [vmem:[%s5976_s6 + $0x1d8] sm:$0xff]   ;;  %v5003_v15 = vld [vmem:[%s5976_s6 + $0x1e8] sm:$0xff]  }
 0x22d   : > { %4612 = vmatpush3.bf16.msra.mxu1 %v4946_v10  ;;  %v2447_v40 = vcombine.low %v2439_v52, %v5639_v7  ;;  %v4981_v10 = vld [vmem:[%s5976_s6 + $0x148] sm:$0xff]   ;;  %v5030_v31 = vld.sshfl [vmem:[#allocation2 + $0x10] sm:$0xf pattern:$0x76325410]  ;;  %v5006_v42 = vld [vmem:[%s5976_s6 + $0x200] sm:$0xff]  }
 0x22e   : > { %4613 = vmatprep.subr.bf16.mxu1 %v5040_v1  ;;  %v5004_v17 = vld [vmem:[%s5976_s6 + $0x1f0] sm:$0xff]   ;;  %v5007_v47 = vld [vmem:[%s5976_s6 + $0x208] sm:$0xff]   ;;  %v5009_v44 = vld [vmem:[%s5976_s6 + $0x218] sm:$0xff]  }
 0x22f   : > { %v5008_v45 = vld [vmem:[%s5976_s6 + $0x210] sm:$0xff]   ;;  %v5010_v22 = vld [vmem:[%s5976_s6 + $0x220] sm:$0xff]   ;;  %v5013_v48 = vld [vmem:[%s5976_s6 + $0x238] sm:$0xff]  }
 0x230   : > { %v4200_v50 = vld [vmem:[%s5977_s7] ss:$0 sm:$0xff] }
 0x231   : > { %4614 = vmatpush3.bf16.msra.mxu1 %v4947_v24  ;;  %v4986_v24 = vld [vmem:[%s5976_s6 + $0x170] sm:$0xff]   ;;  %v4201_v52 = vld [vmem:[%s5978_s8] ss:$0 sm:$0xff] }
 0x232   : > { %4615 = vmatprep.subr.bf16.mxu1 %v5040_v1 }
 0x235   : > { %4616 = vmatpush3.bf16.msra.mxu1 %v4948_v27  ;;  %v4988_v27 = vld [vmem:[%s5976_s6 + $0x180] sm:$0xff]  }
 0x236   : > { %4617 = vmatprep.subr.bf16.mxu1 %v5040_v1 }
 0x239   : > { %4618 = vmatpush3.bf16.msra.mxu1 %v4949_v28  ;;  %v4989_v28 = vld [vmem:[%s5976_s6 + $0x188] sm:$0xff]  }
 0x23a   : > { %4619 = vmatprep.subr.bf16.mxu1 %v5040_v1 }
 0x23d   : > { %4620 = vmatpush3.bf16.msra.mxu1 %v4950_v29  ;;  %v4990_v29 = vld [vmem:[%s5976_s6 + $0x190] sm:$0xff]  }
 0x23e   : > { %4621 = vmatprep.subr.bf16.mxu1 %v5040_v1 }
 0x241   : > { %4622 = vmatpush3.bf16.msra.mxu1 %v4951_v32  ;;  %v5031_v32 = vld.sshfl [vmem:[#allocation2 + $0x8] sm:$0xf pattern:$0x76325410] }
 0x242   : > { %4627 = vmatprep.subr.bf16.mxu1 %v5040_v1 }
 0x244   : > { %4624 = vmatmul.mubr.bf16.vlgmr.msra.gmra.mrb[4].mxu1 %v2260_v34  ;;  %v4998_v34 = vld [vmem:[%s5976_s6 + $0x1c0] sm:$0xff]  }
 0x245   : > { %4628 = vmatpush3.bf16.msra.mxu1 %v4954_v33  ;;  %4643 = vmatprep.mubr.msk.bf16.mxu1 %vm5041_vm0, %v5040_v1  ;;  %v4995_v33 = vld [vmem:[%s5976_s6 + $0x1b8] sm:$0xff]  }
 0x246   : > { %4629 = vmatprep.subr.bf16.mxu1 %v5040_v1 }
 0x249   : > { %4630 = vmatpush3.bf16.msra.mxu1 %v4955_v35  ;;  %v3119_v35 = vcombine.low %v5031_v32, %v5030_v31 }
 0x24a   : > { %4631 = vmatprep.subr.bf16.mxu1 %v5040_v1 }
 0x24d   : > { %4632 = vmatpush3.bf16.msra.mxu1 %v4956_v36  ;;  %v4999_v36 = vld [vmem:[%s5976_s6 + $0x1c8] sm:$0xff]  }
 0x24e   : > { %4633 = vmatprep.subr.bf16.mxu1 %v5040_v1 }
 0x251   : > { %4634 = vmatpush3.bf16.msra.mxu1 %v4957_v37  ;;  %v5000_v37 = vld [vmem:[%s5976_s6 + $0x1d0] sm:$0xff]  }
 0x252   : > { %4635 = vmatprep.subr.bf16.mxu1 %v5040_v1 }
 0x255   : > { %4636 = vmatpush3.bf16.msra.mxu1 %v4958_v39  ;;  %v5002_v39 = vld [vmem:[%s5976_s6 + $0x1e0] sm:$0xff]  }
 0x256   : > { %4637 = vmatprep.subr.bf16.mxu1 %v5040_v1 }
 0x259   : > { %4638 = vmatpush3.bf16.msra.mxu1 %v4959_v41  ;;  %v5005_v41 = vld [vmem:[%s5976_s6 + $0x1f8] sm:$0xff]  }
 0x25a   : > { %4639 = vmatprep.subr.bf16.mxu1 %v5040_v1 }
 0x25d   : > { %4640 = vmatpush3.bf16.msra.mxu1 %v4960_v46  ;;  %v5012_v46 = vld [vmem:[%s5976_s6 + $0x230] sm:$0xff]  }
 0x25e   : > { %4641 = vmatprep.subr.bf16.mxu1 %v5040_v1 }
 0x261   : > { %4642 = vmatpush3.bf16.msra.mxu1 %v4961_v51 }
 0x262   : > { %4647 = vmatprep.subr.bf16.mxu1 %v5040_v1 }
 0x264   : > { %4644 = vmatmul.mubr.bf16.vlgmr.msra.gmra.mrb[4].mxu1 %v2447_v40 }
 0x265   : > { %4648 = vmatpush3.bf16.msra.mxu1 %v4962_v53  ;;  %4663 = vmatprep.mubr.msk.bf16.mxu1 %vm5041_vm0, %v5040_v1 }
 0x266   : > { %4649 = vmatprep.subr.bf16.mxu1 %v5040_v1 }
 0x269   : > { %4650 = vmatpush3.bf16.msra.mxu1 %v4963_v49 }
 0x26a   : > { %4651 = vmatprep.subr.bf16.mxu1 %v5040_v1 }
 0x26d   : > { %4652 = vmatpush3.bf16.msra.mxu1 %v4964_v14 }
 0x26e   : > { %4653 = vmatprep.subr.bf16.mxu1 %v5040_v1 }
 0x271   : > { %4654 = vmatpush3.bf16.msra.mxu1 %v4965_v54 }
 0x272   : > { %4655 = vmatprep.subr.bf16.mxu1 %v5040_v1 }
 0x275   : > { %4656 = vmatpush3.bf16.msra.mxu1 %v4966_v55 }
 0x276   : > { %4657 = vmatprep.subr.bf16.mxu1 %v5040_v1 }
 0x279   : > { %4658 = vmatpush3.bf16.msra.mxu1 %v4967_v56 }
 0x27a   : > { %4659 = vmatprep.subr.bf16.mxu1 %v5040_v1 }
 0x27d   : > { %4660 = vmatpush3.bf16.msra.mxu1 %v4968_v57 }
 0x27e   : > { %4661 = vmatprep.subr.bf16.mxu1 %v5040_v1 }
 0x281   : > { %4662 = vmatpush3.bf16.msra.mxu1 %v4969_v60 }
 0x282   : > { %4667 = vmatprep.subr.bf16.mxu1 %v5040_v1 }
 0x284   : > { %4664 = vmatmul.mubr.bf16.vlgmr.msra.gmra.mrb[4].mxu1 %v2581_v62 }
 0x285   : > { %4668 = vmatpush3.bf16.msra.mxu1 %v4972_v61  ;;  %4683 = vmatprep.mubr.msk.bf16.mxu1 %vm5041_vm0, %v5040_v1 }
 0x286   : > { %4669 = vmatprep.subr.bf16.mxu1 %v5040_v1 }
 0x289   : > { %4670 = vmatpush3.bf16.msra.mxu1 %v4973_v63 }
 0x28a   : > { %4671 = vmatprep.subr.bf16.mxu1 %v5040_v1 }
 0x28d   : > { %4672 = vmatpush3.bf16.msra.mxu1 %v4974_v0 }
 0x28e   : > { %4673 = vmatprep.subr.bf16.mxu1 %v5040_v1 }
 0x291   : > { %4674 = vmatpush3.bf16.msra.mxu1 %v4975_v2 }
 0x292   : > { %4675 = vmatprep.subr.bf16.mxu1 %v5040_v1 }
 0x295   : > { %4676 = vmatpush3.bf16.msra.mxu1 %v4976_v3 }
 0x296   : > { %4677 = vmatprep.subr.bf16.mxu1 %v5040_v1 }
 0x299   : > { %4678 = vmatpush3.bf16.msra.mxu1 %v4977_v4 }
 0x29a   : > { %4679 = vmatprep.subr.bf16.mxu1 %v5040_v1 }
 0x29d   : > { %4680 = vmatpush3.bf16.msra.mxu1 %v4978_v5 }
 0x29e   : > { %4681 = vmatprep.subr.bf16.mxu1 %v5040_v1 }
 0x2a1   : > { %4682 = vmatpush3.bf16.msra.mxu1 %v4979_v6 }
 0x2a2   : > { %4687 = vmatprep.subr.bf16.mxu1 %v5040_v1 }
 0x2a4   : > { %4684 = vmatmul.mubr.bf16.vlgmr.msra.gmra.mrb[4].mxu1 %v2803_v25  ;;  %v4987_v25 = vld [vmem:[%s5976_s6 + $0x178] sm:$0xff]  }
 0x2a5   : > { %4688 = vmatpush3.bf16.msra.mxu1 %v4980_v8  ;;  %4703 = vmatprep.mubr.msk.bf16.mxu1 %vm5041_vm0, %v5040_v1 }
 0x2a6   : > { %4689 = vmatprep.subr.bf16.mxu1 %v5040_v1 }
 0x2a9   : > { %4690 = vmatpush3.bf16.msra.mxu1 %v4981_v10 }
 0x2aa   : > { %4691 = vmatprep.subr.bf16.mxu1 %v5040_v1 }
 0x2ad   : > { %4692 = vmatpush3.bf16.msra.mxu1 %v4982_v12 }
 0x2ae   : > { %4693 = vmatprep.subr.bf16.mxu1 %v5040_v1 }
 0x2b1   : > { %4694 = vmatpush3.bf16.msra.mxu1 %v4983_v18 }
 0x2b2   : > { %4695 = vmatprep.subr.bf16.mxu1 %v5040_v1 }
 0x2b5   : > { %4696 = vmatpush3.bf16.msra.mxu1 %v4984_v11 }
 0x2b6   : > { %4697 = vmatprep.subr.bf16.mxu1 %v5040_v1 }
 0x2b9   : > { %4698 = vmatpush3.bf16.msra.mxu1 %v4985_v20 }
 0x2ba   : > { %4699 = vmatprep.subr.bf16.mxu1 %v5040_v1 }
 0x2bd   : > { %4700 = vmatpush3.bf16.msra.mxu1 %v4986_v24 }
 0x2be   : > { %4701 = vmatprep.subr.bf16.mxu1 %v5040_v1 }
 0x2c1   : > { %4702 = vmatpush3.bf16.msra.mxu1 %v4987_v25 }
 0x2c2   : > { %4707 = vmatprep.subr.bf16.mxu1 %v5040_v1 }
 0x2c4   : > { %4704 = vmatmul.mubr.bf16.vlgmr.msra.gmra.mrb[4].mxu1 %v2985_v21  ;;  %v4993_v21 = vld [vmem:[%s5976_s6 + $0x1a8] sm:$0xff]  }
 0x2c5   : > { %4708 = vmatpush3.bf16.msra.mxu1 %v4988_v27  ;;  %4723 = vmatprep.mubr.msk.bf16.mxu1 %vm5041_vm0, %v5040_v1 }
 0x2c6   : > { %4709 = vmatprep.subr.bf16.mxu1 %v5040_v1 }
 0x2c9   : > { %4710 = vmatpush3.bf16.msra.mxu1 %v4989_v28 }
 0x2ca   : > { %4711 = vmatprep.subr.bf16.mxu1 %v5040_v1 }
 0x2cd   : > { %4712 = vmatpush3.bf16.msra.mxu1 %v4990_v29 }
 0x2ce   : > { %4713 = vmatprep.subr.bf16.mxu1 %v5040_v1 }
 0x2d1   : > { %4714 = vmatpush3.bf16.msra.mxu1 %v4991_v9 }
 0x2d2   : > { %4715 = vmatprep.subr.bf16.mxu1 %v5040_v1 }
 0x2d5   : > { %4716 = vmatpush3.bf16.msra.mxu1 %v4992_v13 }
 0x2d6   : > { %4717 = vmatprep.subr.bf16.mxu1 %v5040_v1 }
 0x2d9   : > { %4718 = vmatpush3.bf16.msra.mxu1 %v4993_v21 }
 0x2da   : > { %4719 = vmatprep.subr.bf16.mxu1 %v5040_v1 }
 0x2dd   : > { %4720 = vmatpush3.bf16.msra.mxu1 %v4994_v30 }
 0x2de   : > { %4721 = vmatprep.subr.bf16.mxu1 %v5040_v1 }
 0x2e1   : > { %4722 = vmatpush3.bf16.msra.mxu1 %v4995_v33 }
 0x2e2   : > { %4727 = vmatprep.subr.bf16.mxu1 %v5040_v1 }
 0x2e4   : > { %4724 = vmatmul.mubr.bf16.vlgmr.msra.gmra.mrb[4].mxu1 %v3119_v35 }
 0x2e5   : > { %4728 = vmatpush3.bf16.msra.mxu1 %v4998_v34  ;;  %4743 = vmatprep.mubr.msk.bf16.mxu1 %vm5041_vm0, %v5040_v1 }
 0x2e6   : > { %4729 = vmatprep.subr.bf16.mxu1 %v5040_v1 }
 0x2e9   : > { %4730 = vmatpush3.bf16.msra.mxu1 %v4999_v36 }
 0x2ea   : > { %4731 = vmatprep.subr.bf16.mxu1 %v5040_v1 }
 0x2ed   : > { %4732 = vmatpush3.bf16.msra.mxu1 %v5000_v37 }
 0x2ee   : > { %4733 = vmatprep.subr.bf16.mxu1 %v5040_v1 }
 0x2f1   : > { %4734 = vmatpush3.bf16.msra.mxu1 %v5001_v38 }
 0x2f2   : > { %4735 = vmatprep.subr.bf16.mxu1 %v5040_v1 }
 0x2f5   : > { %4736 = vmatpush3.bf16.msra.mxu1 %v5002_v39 }
 0x2f6   : > { %4737 = vmatprep.subr.bf16.mxu1 %v5040_v1 }
 0x2f9   : > { %4738 = vmatpush3.bf16.msra.mxu1 %v5003_v15 }
 0x2fa   : > { %4739 = vmatprep.subr.bf16.mxu1 %v5040_v1 }
 0x2fd   : > { %4740 = vmatpush3.bf16.msra.mxu1 %v5004_v17 }
 0x2fe   : > { %4741 = vmatprep.subr.bf16.mxu1 %v5040_v1 }
 0x301   : > { %4742 = vmatpush3.bf16.msra.mxu1 %v5005_v41 }
 0x302   : > { %4747 = vmatprep.subr.bf16.mxu1 %v5040_v1 }
 0x304   : > { %4744 = vmatmul.mubr.bf16.vlgmr.msra.gmra.mrb[4].mxu1 %v3341_v26  ;;  %v5011_v26 = vld [vmem:[%s5976_s6 + $0x228] sm:$0xff]  }
 0x305   : > { %4748 = vmatpush3.bf16.msra.mxu1 %v5006_v42  ;;  %4763 = vmatprep.mubr.msk.bf16.mxu1 %vm5041_vm0, %v5040_v1 }
 0x306   : > { %4749 = vmatprep.subr.bf16.mxu1 %v5040_v1 }
 0x309   : > { %4750 = vmatpush3.bf16.msra.mxu1 %v5007_v47 }
 0x30a   : > { %4751 = vmatprep.subr.bf16.mxu1 %v5040_v1 }
 0x30d   : > { %4752 = vmatpush3.bf16.msra.mxu1 %v5008_v45 }
 0x30e   : > { %4753 = vmatprep.subr.bf16.mxu1 %v5040_v1 }
 0x311   : > { %4754 = vmatpush3.bf16.msra.mxu1 %v5009_v44 }
 0x312   : > { %4755 = vmatprep.subr.bf16.mxu1 %v5040_v1 }
 0x315   : > { %4756 = vmatpush3.bf16.msra.mxu1 %v5010_v22 }
 0x316   : > { %4757 = vmatprep.subr.bf16.mxu1 %v5040_v1 }
 0x319   : > { %4758 = vmatpush3.bf16.msra.mxu1 %v5011_v26 }
 0x31a   : > { %4759 = vmatprep.subr.bf16.mxu1 %v5040_v1 }
 0x31d   : > { %4760 = vmatpush3.bf16.msra.mxu1 %v5012_v46 }
 0x31e   : > { %4761 = vmatprep.subr.bf16.mxu1 %v5040_v1  ;;  %v3953_v1 = vld [vmem:[%s5975_s5] ss:$0 sm:$0xff] }
 0x31f   : > { %v1940_v56 = vadd.f32 %v3953_v1, %v5720_v43 }
 0x321   : > { %4762 = vmatpush3.bf16.msra.mxu1 %v5013_v48 }
 0x324   : > { %4764 = vmatmul.mubr.bf16.vlgmr.msra.gmra.mrb[4].mxu1 %v3523_v23  ;;  %v1937_v23 = vadd.f32 %v3953_v1, %v5715_v16 }
 0x3f7   : > { %v3607_v51 = vpop.f32.mrb[4].mxu1 }
 0x3f8   : > { %v3623_v53 = vmul.f32 %v4200_v50, %v3607_v51  ;;  %v4765_v40 = vpop.f32.mrb[5].mxu1 }
 0x3f9   : > { %v3610_v49 = vpop.f32.mrb[6].mxu1 }
 0x3fa   : > { %v3632_v14 = vadd.f32 %v4201_v52, %v3623_v53  ;;  %v3624_v7 = vmul.f32 %v4200_v50, %v3610_v49  ;;  %v4766_v19 = vpop.f32.mrb[7].mxu1 }
 0x3fc   : > { %v3634_v54 = vmax.f32 %v3632_v14, 0.0  ;;  %v3633_v55 = vadd.f32 %v4201_v52, %v3624_v7 }
 0x3fe   : > { %v3636_v57 = vadd.f32 %v3634_v54, %v1937_v23  ;;  %v3635_v58 = vmax.f32 %v3633_v55, 0.0 }
 0x400   : > { %v3637_v59 = vadd.f32 %v3635_v58, %v1940_v56 }
 0x402   : > { %v4214_v60 = vpack.c.bf16 %v3637_v59, %v3636_v57 }
 0x404   : > { %4215 = vst [vmem:[%s332_s16] sm:$0xff] %v4214_v60  }
 0x405 PF: > { %s19_s30 = sadd.s32 1, %s5038_s30  }
 0x406   : > { %p16_p4 = scmp.ge.s32.totalorder %s19_s30, 4  }
 0x408   :  { %18 = sbr.rel (!%p16_p4) target bundleno = 1 (0x1), region = 111 }

// kernel: cnn_forward.5
= control target key start
LH: loop header
LB: loop body
LE: loop exit
PB: predicated region body
PF: predicated region fallthrough
CT: control target
= control target key end

     0   :  { %16 = vsyncpa [#allocation4], 0  ;;  %s8586_s0 = inlined_call_operand.vmem [shape: bf16[2,4,3,3,128], index: 0, kind: input, shape index: {}]   ;;  %s8587_s1 = inlined_call_operand.vmem [shape: bf16[3,3,128,256], index: 1, kind: input, shape index: {}]   ;;  %s8588_s2 = inlined_call_operand.vmem [shape: f32[1,256], index: 2, kind: input, shape index: {}]   ;;  %s8589_s3 = inlined_call_operand.vmem [shape: f32[1,256], index: 3, kind: input, shape index: {}]   ;;  %s8590_s4 = inlined_call_operand.vmem [shape: bf16[128,256], index: 4, kind: input, shape index: {}]   ;;  %s8591_s5 = inlined_call_operand.vmem [shape: f32[1,256], index: 5, kind: input, shape index: {}]   ;;  %s8592_s6 = inlined_call_operand.vmem [shape: bf16[3,3,256,256], index: 6, kind: input, shape index: {}]   ;;  %s8593_s7 = inlined_call_operand.vmem [shape: f32[1,256], index: 7, kind: input, shape index: {}]   ;;  %s8594_s8 = inlined_call_operand.vmem [shape: f32[1,256], index: 8, kind: input, shape index: {}]   ;;  %s8595_s9 = inlined_call_operand.vmem [shape: bf16[256,128], index: 9, kind: input, shape index: {}]   ;;  %s8596_s10 = inlined_call_operand.vmem [shape: f32[1,128], index: 10, kind: input, shape index: {}]   ;;  %s8597_s11 = inlined_call_operand.hbm [shape: f32[2,1,128], index: 11, kind: output, shape index: {}]  }
   0x1   :  { %18 = vsyncpa [#allocation4 + $0x1], 0  ;;  %s6873_s17 = smov 0   ;;  %s6875_s18 = smov 0  }
   0x2   :  { %s6877_s19 = smov 0   ;;  %s6879_s20 = smov 0  }
   0x3 LB: > { %s6894_s21 = sadd.s32 4294967295, %s6807_s20   ;;  %s5020_s22 = sadd.s32 4294967294, %s6807_s20   ;;  %s6807_s20 = sphi %s6879_s20, %s8609_s20   ;;  %s6803_s19 = sphi %s6877_s19, %s8608_s19   ;;  %s6799_s18 = sphi %s6875_s18, %s8607_s18   ;;  %s6795_s17 = sphi %s6873_s17, %s8606_s17  }
   0x4   : > { %s6898_s23 = sadd.s32 1, %s6807_s20   ;;  %s267_s24 = sadd.s32 1, %s6803_s19 }
   0x5   : > { %s264_s25 = ssub.s32 %s6807_s20, %s6898_s23  ;;  %p277_p0 = scmp.ne.s32.totalorder %s6803_s19, %s6799_s18 }
   0x6   : > { %p265_p1 = scmp.eq.s32.totalorder %s264_s25, 0  ;;  %p278_p2 = scmp.eq.s32.totalorder %s6894_s21, 1 }
   0x7   : > { %p283_p3 = scmp.ne.s32.totalorder %s6799_s18, %s6795_s17  ;;  %p284_p4 = scmp.eq.s32.totalorder %s5020_s22, 1 }
   0x8   : > { %s6909_s26 = scalar_select %p265_p1, %s6803_s19, %s267_s24  }
   0x9   : > { %p6911_p5 = por %p278_p2, %p277_p0  ;;  %p6915_p6 = por %p284_p4, %p283_p3 }
   0xa   : > { %8598 = sst [smem:[#allocation6_spill]] %s6909_s26  ;;  %p5023_p7 = scmp.ge.s32.totalorder %s6807_s20, 1 }
   0xb   : > { %p340_p8 = scmp.lt.s32.totalorder %s6807_s20, 3 }
   0xd   : > { %p341_p9 = pnand %p5023_p7, %p340_p8 }
   0xe   : > { %v6057_v0 = vld [vmem:[%s8587_s1 + $0x84] ss:$8 sps:$4 sm:$0xff] (!%p341_p9)   ;;  %v6059_v1 = vld [vmem:[%s8587_s1 + $0x80] ss:$8 sps:$4 sm:$0xff] (!%p341_p9)   ;;  %v6809_v2 = vmov (!%p341_p9), 0   ;;  %p379_p10 = scmp.lt.s32.totalorder (!%p341_p9), %s6894_s21, 1  ;;  %v429_v12 = vlaneseq (!%p341_p9) }
   0xf   : > { %344 = sbr.rel (%p341_p9) target bundleno = 1408 (0x580), region = 64  ;;  %553 = vmatprep.mubr.bf16.mxu0 (!%p341_p9), %v6809_v2  ;;  %2121 = vst [vmem:[#allocation2] sm:$0xf] (!%p341_p9), %v6809_v2  ;;  %2122 = vst [vmem:[#allocation2 + $0x4] sm:$0xf] (!%p341_p9), %v6809_v2  ;;  %2112 = vmatprep.mubr.bf16.mxu1 (!%p341_p9), %v6809_v2  ;;  %vm2146_vm15 = vcmask (!%p341_p9), 1041408  }
  0x10   : > { %2123 = vst [vmem:[#allocation2 + $0x8] sm:$0xf] (!%p341_p9), %v6809_v2  ;;  %2124 = vst [vmem:[#allocation2 + $0xc] sm:$0xf] (!%p341_p9), %v6809_v2  ;;  %521 = vmatprep.subr.bf16.mxu0 (!%p341_p9), %v6057_v0  ;;  %v6060_v3 = vld [vmem:[%s8587_s1 + $0x94] ss:$8 sps:$4 sm:$0xff] (!%p341_p9)  }
  0x11   : > { %522 = vmatpush1.bf16.msra.mxu0 (!%p341_p9), %v6059_v1  ;;  %v6062_v4 = vld [vmem:[%s8587_s1 + $0x90] ss:$8 sps:$4 sm:$0xff] (!%p341_p9)   ;;  %v6063_v5 = vld [vmem:[%s8587_s1 + $0xa4] ss:$8 sps:$4 sm:$0xff] (!%p341_p9)   ;;  %v6065_v6 = vld [vmem:[%s8587_s1 + $0xa0] ss:$8 sps:$4 sm:$0xff] (!%p341_p9)  }
  0x12   : > { %523 = vmatprep.subr.bf16.mxu0 (!%p341_p9), %v6060_v3  ;;  %v6066_v7 = vld [vmem:[%s8587_s1 + $0xb4] ss:$8 sps:$4 sm:$0xff] (!%p341_p9)   ;;  %v6068_v8 = vld [vmem:[%s8587_s1 + $0xb0] ss:$8 sps:$4 sm:$0xff] (!%p341_p9)   ;;  %v6069_v9 = vld [vmem:[%s8587_s1 + $0xc4] ss:$8 sps:$4 sm:$0xff] (!%p341_p9)  }
  0x13   : > { %v6810_v10 = vmov (!%p341_p9), 1966171168   ;;  %v6071_v13 = vld [vmem:[%s8587_s1 + $0xc0] ss:$8 sps:$4 sm:$0xff] (!%p341_p9)   ;;  %v6072_v14 = vld [vmem:[%s8587_s1 + $0xd4] ss:$8 sps:$4 sm:$0xff] (!%p341_p9)  }
  0x14   : > { %v427_v11 = vunpack.c.l.s4 (!%p341_p9), %v6810_v10  ;;  %v6074_v15 = vld [vmem:[%s8587_s1 + $0xd0] ss:$8 sps:$4 sm:$0xff] (!%p341_p9)   ;;  %v6971_v18 = vshrl.u32 (!%p341_p9), %v429_v12, 7  ;;  %v6075_v20 = vld [vmem:[%s8587_s1 + $0xe4] ss:$8 sps:$4 sm:$0xff] (!%p341_p9)   ;;  %s377_s24 = sand.u32 (!%p341_p9), 1, %s6799_s18  }
  0x15   : > { %524 = vmatpush1.bf16.msra.mxu0 (!%p341_p9), %v6062_v4  ;;  %v6077_v23 = vld [vmem:[%s8587_s1 + $0xe0] ss:$8 sps:$4 sm:$0xff] (!%p341_p9)   ;;  %v6078_v24 = vld [vmem:[%s8587_s1 + $0xf4] ss:$8 sps:$4 sm:$0xff] (!%p341_p9)   ;;  %v6080_v26 = vld [vmem:[%s8587_s1 + $0xf0] ss:$8 sps:$4 sm:$0xff] (!%p341_p9)  }
  0x16   : > { %s380_s12 = scalar_select %p379_p10, %s6894_s21, 1  ;;  %525 = vmatprep.subr.bf16.mxu0 %v6063_v5  ;;  %v428_v17 = vunpack.c.0.s8 %v427_v11  ;;  %v6083_v27 = vld [vmem:[%s8587_s1 + $0x4] ss:$8 sps:$4 sm:$0xff]   ;;  %v6081_v29 = vld [vmem:[%s8587_s1] ss:$8 sps:$4 sm:$0xff]  }
  0x17   : > { %v6086_v30 = vld [vmem:[%s8587_s1 + $0x14] ss:$8 sps:$4 sm:$0xff]   ;;  %v6084_v31 = vld [vmem:[%s8587_s1 + $0x10] ss:$8 sps:$4 sm:$0xff]   ;;  %v6089_v32 = vld [vmem:[%s8587_s1 + $0x24] ss:$8 sps:$4 sm:$0xff]  }
  0x18   : > { %s6014_s22 = smul.u32 24, %s380_s12  ;;  %v6978_v22 = vsub.s32 %v428_v17, %v6971_v18  ;;  %v6087_v33 = vld [vmem:[%s8587_s1 + $0x20] ss:$8 sps:$4 sm:$0xff]   ;;  %v6092_v34 = vld [vmem:[%s8587_s1 + $0x34] ss:$8 sps:$4 sm:$0xff]   ;;  %s5927_s29 = sshll.u32 %s6894_s21, 4 }
  0x19   : > { %526 = vmatpush1.bf16.msra.mxu0 %v6065_v6  ;;  %v6090_v35 = vld [vmem:[%s8587_s1 + $0x30] ss:$8 sps:$4 sm:$0xff]   ;;  %v6095_v36 = vld [vmem:[%s8587_s1 + $0x44] ss:$8 sps:$4 sm:$0xff]   ;;  %v6093_v37 = vld [vmem:[%s8587_s1 + $0x40] ss:$8 sps:$4 sm:$0xff]   ;;  %s8544_s12 = scalar_lea.hbm %s8597_s11, %s5927_s29 }
  0x1a   : > { %527 = vmatprep.subr.bf16.mxu0 %v6066_v7  ;;  %s6962_s26 = scalar_lea.vmem %s8586_s0, %s6014_s22  ;;  %v6098_v38 = vld [vmem:[%s8587_s1 + $0x54] ss:$8 sps:$4 sm:$0xff]   ;;  %v6096_v39 = vld [vmem:[%s8587_s1 + $0x50] ss:$8 sps:$4 sm:$0xff]   ;;  %v6101_v42 = vld [vmem:[%s8587_s1 + $0x64] ss:$8 sps:$4 sm:$0xff]  }
  0x1b   : > { %v5025_v16 = vld [vmem:[%s6962_s26 + $0x6] sm:$0x1]  ;;  %v5026_v19 = vld [vmem:[%s6962_s26 + $0x8] sm:$0x1]  ;;  %v385_v40 = vld [vmem:[%s6962_s26] sm:$0x1] }
  0x1c   : > { %v425_v21 = vcombine.low %v5025_v16, %v5026_v19  ;;  %v386_v41 = vld [vmem:[%s6962_s26 + $0x2] sm:$0x1]  ;;  %v6104_v45 = vld [vmem:[%s8587_s1 + $0x74] ss:$8 sps:$4 sm:$0xff]   ;;  %vm721_vm0 = vsmask.f32 256 }
  0x1d   : > { %528 = vmatpush1.bf16.msra.mxu0 %v6068_v8  ;;  %v564_v43 = vcombine.low %v385_v40, %v386_v41  ;;  %v6099_v44 = vld [vmem:[%s8587_s1 + $0x60] ss:$8 sps:$4 sm:$0xff]   ;;  %vm722_vm1 = vsmask.f32 1284  ;;  %v6102_v47 = vld [vmem:[%s8587_s1 + $0x70] ss:$8 sps:$4 sm:$0xff]  }
  0x1e   : > { %529 = vmatprep.subr.bf16.mxu0 %v6069_v9  ;;  %v432_v25 = vrot.slane %v425_v21, %v6978_v22  ;;  %v6107_v48 = vld [vmem:[%s8587_s1 + $0x104] ss:$8 sps:$4 sm:$0xff]   ;;  %vm723_vm2 = vmor %vm721_vm0, %vm722_vm1  ;;  %vm724_vm3 = vsmask.f32 2312  ;;  %v6105_v49 = vld [vmem:[%s8587_s1 + $0x100] ss:$8 sps:$4 sm:$0xff]  }
  0x1f   : > { %v571_v46 = vrot.slane %v564_v43, %v6978_v22  ;;  %vm725_vm4 = vmor %vm723_vm2, %vm724_vm3  ;;  %vm726_vm5 = vsmask.f32 3340  ;;  %v6110_v51 = vld [vmem:[%s8587_s1 + $0x114] ss:$8 sps:$4 sm:$0xff]   ;;  %vm728_vm7 = vsmask.f32 4368 }
  0x20   : > { %v439_v28 = vrot.slane %v432_v25, %v6978_v22  ;;  %vm727_vm6 = vmor %vm725_vm4, %vm726_vm5  ;;  %v6108_v52 = vld [vmem:[%s8587_s1 + $0x110] ss:$8 sps:$4 sm:$0xff]   ;;  %v6113_v53 = vld [vmem:[%s8587_s1 + $0x124] ss:$8 sps:$4 sm:$0xff]   ;;  %vm730_vm9 = vsmask.f32 5396 }
  0x21   : > { %530 = vmatpush1.bf16.msra.mxu0 %v6071_v13  ;;  %v578_v50 = vrot.slane %v571_v46, %v6978_v22  ;;  %vm729_vm8 = vmor %vm727_vm6, %vm728_vm7  ;;  %vm732_vm10 = vsmask.f32 6424  ;;  %v6111_v54 = vld [vmem:[%s8587_s1 + $0x120] ss:$8 sps:$4 sm:$0xff]   ;;  %v6116_v55 = vld [vmem:[%s8587_s1 + $0x134] ss:$8 sps:$4 sm:$0xff]  }
  0x22   : > { %531 = vmatprep.subr.bf16.mxu0 %v6072_v14  ;;  %v5075_v56 = vld.sshfl [vmem:[%s6962_s26] sm:$0x11 pattern:$0x75316420]  ;;  %vm731_vm11 = vmor %vm729_vm8, %vm730_vm9  ;;  %v6114_v58 = vld [vmem:[%s8587_s1 + $0x130] ss:$8 sps:$4 sm:$0xff]  }
  0x23   : > { %v5076_v57 = vld.sshfl [vmem:[%s6962_s26 + $0x2] sm:$0x11 pattern:$0x75316420]  ;;  %v6119_v59 = vld [vmem:[%s8587_s1 + $0x144] ss:$8 sps:$4 sm:$0xff]   ;;  %v712_v60 = vcombine.high %v5075_v56, %v5075_v56  ;;  %vm733_vm12 = vmor %vm731_vm11, %vm732_vm10 }
  0x24   : > { %v720_v61 = vcombine.high %v5076_v57, %v5076_v57  ;;  %vm734_vm13 = vsmask.f32 7452  ;;  %v6117_v62 = vld [vmem:[%s8587_s1 + $0x140] ss:$8 sps:$4 sm:$0xff]   ;;  %v6122_v63 = vld [vmem:[%s8587_s1 + $0x154] ss:$8 sps:$4 sm:$0xff]  }
  0x25   : > { %532 = vmatpush1.bf16.msra.mxu0 %v6074_v15  ;;  %vm7080_vm14 = vmor %vm733_vm12, %vm734_vm13  ;;  %v737_v1 = vshrl.u32 %v5075_v56, 16  ;;  %v742_v3 = vshll.u32 %v712_v60, 16  ;;  %v746_v4 = vshrl.u32 %v5076_v57, 16  ;;  %v6120_v6 = vld [vmem:[%s8587_s1 + $0x150] ss:$8 sps:$4 sm:$0xff]   ;;  %vm2149_vm1 = vcmask 1043458  }
  0x26   : > { %533 = vmatprep.subr.bf16.mxu0 %v6075_v20  ;;  %v751_v5 = vshll.u32 %v720_v61, 16  ;;  %v6125_v7 = vld [vmem:[%s8587_s1 + $0x164] ss:$8 sps:$4 sm:$0xff]   ;;  %v6123_v11 = vld [vmem:[%s8587_s1 + $0x160] ss:$8 sps:$4 sm:$0xff]   ;;  %vm4939_vm6 = vcmask 1043456  }
  0x27   : > { %v744_v8 = vsel %vm7080_vm14, %v737_v1, %v742_v3  ;;  %v6128_v12 = vld [vmem:[%s8587_s1 + $0x174] ss:$8 sps:$4 sm:$0xff]   ;;  %v6126_v14 = vld [vmem:[%s8587_s1 + $0x170] ss:$8 sps:$4 sm:$0xff]   ;;  %v6131_v15 = vld [vmem:[%s8587_s1 + $0x184] ss:$8 sps:$4 sm:$0xff]  }
  0x28   : > { %v7094_v9 = vsel %vm7080_vm14, %v746_v4, %v751_v5  ;;  %v6129_v17 = vld [vmem:[%s8587_s1 + $0x180] ss:$8 sps:$4 sm:$0xff]   ;;  %v6134_v19 = vld [vmem:[%s8587_s1 + $0x194] ss:$8 sps:$4 sm:$0xff]   ;;  %v6132_v20 = vld [vmem:[%s8587_s1 + $0x190] ss:$8 sps:$4 sm:$0xff]  }
  0x29   : > { %534 = vmatpush1.bf16.msra.mxu0 %v6077_v23  ;;  %v771_v10 = vcombine.low %v744_v8, %v7094_v9  ;;  %v6137_v21 = vld [vmem:[%s8587_s1 + $0x1a4] ss:$8 sps:$4 sm:$0xff]   ;;  %v6135_v23 = vld [vmem:[%s8587_s1 + $0x1a0] ss:$8 sps:$4 sm:$0xff]   ;;  %v6138_v25 = vld [vmem:[%s8587_s1 + $0x1b0] ss:$8 sps:$4 sm:$0xff]  }
  0x2a   : > { %535 = vmatprep.subr.bf16.mxu0 %v6078_v24  ;;  %v6140_v24 = vld [vmem:[%s8587_s1 + $0x1b4] ss:$8 sps:$4 sm:$0xff]   ;;  %v6153_v40 = vld [vmem:[%s8587_s1 + $0x200] ss:$8 sps:$4 sm:$0xff]   ;;  %v6161_v43 = vld [vmem:[%s8587_s1 + $0x224] ss:$8 sps:$4 sm:$0xff]  }
  0x2b   : > { %v778_v13 = vrot.slane %v771_v10, %v6978_v22  ;;  %v6158_v41 = vld [vmem:[%s8587_s1 + $0x214] ss:$8 sps:$4 sm:$0xff]   ;;  %v6162_v46 = vld [vmem:[%s8587_s1 + $0x230] ss:$8 sps:$4 sm:$0xff]   ;;  %v6177_v60 = vld [vmem:[%s8587_s1 + $0x280] ss:$8 sps:$4 sm:$0xff]  }
  0x2c   : > { %v6176_v56 = vld [vmem:[%s8587_s1 + $0x274] ss:$8 sps:$4 sm:$0xff]   ;;  %v6275_v1 = vld [vmem:[%s8590_s4] ss:$8 sps:$4 sm:$0xff]   ;;  %v6180_v4 = vld [vmem:[%s8587_s1 + $0x290] ss:$8 sps:$4 sm:$0xff]  }
  0x2d   : > { %536 = vmatpush1.bf16.msra.mxu0 %v6080_v26  ;;  %v785_v16 = vrot.slane %v778_v13, %v6978_v22  ;;  %v6143_v26 = vld [vmem:[%s8587_s1 + $0x1c4] ss:$8 sps:$4 sm:$0xff]   ;;  %v6276_v3 = vld [vmem:[%s8590_s4 + $0x14] ss:$8 sps:$4 sm:$0xff]   ;;  %v6183_v8 = vld [vmem:[%s8587_s1 + $0x2a0] ss:$8 sps:$4 sm:$0xff]  }
  0x2e   : > { %660 = vmatprep.subr.bf16.mxu0 %v6083_v27  ;;  %v6141_v27 = vld [vmem:[%s8587_s1 + $0x1c0] ss:$8 sps:$4 sm:$0xff]   ;;  %v6185_v5 = vld [vmem:[%s8587_s1 + $0x2a4] ss:$8 sps:$4 sm:$0xff]   ;;  %vm2147_vm0 = vsmask.f32 1282 }
  0x2f   : > { %v5181_v10 = vld.sshfl [vmem:[%s6962_s26 + $0xc] sm:$0x11 pattern:$0x75316420]  ;;  %v6281_v13 = vld [vmem:[%s8590_s4 + $0x20] ss:$8 sps:$4 sm:$0xff]   ;;  %vm7699_vm3 = vmand %vm2146_vm15, %vm2147_vm0 }
  0x30   : > { %554 = vmatmul.mubr.bf16.vlgmr.msra.gmra.mrb[0].mxu0 %v439_v28  ;;  %v6146_v28 = vld [vmem:[%s8587_s1 + $0x1d4] ss:$8 sps:$4 sm:$0xff]   ;;  %vm2150_vm2 = vsmask.f32 3338  ;;  %s378_s30 = scalar_lea.vmem [#allocation3], %s377_s24  ;;  %s4953_s15 = scalar_lea.sflag [#allocation4], %s377_s24 }
  0x31   : > { %661 = vmatpush1.bf16.msra.mxu0 %v6081_v29  ;;  %692 = vmatprep.mubr.bf16.mxu0 %v6809_v2  ;;  %v6144_v29 = vld [vmem:[%s8587_s1 + $0x1d0] ss:$8 sps:$4 sm:$0xff]   ;;  %vm2151_vm4 = vmand %vm2149_vm1, %vm2150_vm2  ;;  %v6632_v0 = vld [vmem:[%s8592_s6 + $0x6f4] ss:$8 sps:$4 sm:$0xff]   ;;  %s4965_s13 = sshll.u32 %s378_s30, 4  ;;  %s6812_s21 = smov [#allocation3]   ;;  %s8546_s13 = int_to_ptr.vmem [resolvable:$true] %s4965_s13 }
  0x32   : > { %662 = vmatprep.subr.bf16.mxu0 %v6086_v30  ;;  %v6149_v30 = vld [vmem:[%s8587_s1 + $0x1e4] ss:$8 sps:$4 sm:$0xff]   ;;  %vm2152_vm5 = vmor %vm2151_vm4, %vm7699_vm3  ;;  %s6745_s16 = scalar_lea.vmem %s8546_s13, 16  ;;  %s6749_s22 = sshll.u32 %s6812_s21, 4  ;;  %s6750_s22 = int_to_ptr.vmem [resolvable:$false] %s6749_s22 }
  0x33   : > { %p6746_p11 = scmp.ne.s32.totalorder %s8546_s13, %s6745_s16  ;;  %s6751_s25 = scalar_lea.vmem %s6750_s22, 32 }
  0x34   : > { %p6752_p0 = scmp.lt.s32.totalorder %s8546_s13, %s6750_s22  ;;  %p6753_p1 = scmp.lt.s32.totalorder %s6751_s25, %s6745_s16 }
  0x35   : > { %663 = vmatpush1.bf16.msra.mxu0 %v6084_v31  ;;  %v5111_v31 = vld [vmem:[%s6962_s26 + $0xc] sm:$0x1]  ;;  %p6747_p12 = pnand %p6746_p11, %p6911_p5 }
  0x36   : > { %664 = vmatprep.subr.bf16.mxu0 %v6089_v32  ;;  %v5112_v32 = vld [vmem:[%s6962_s26 + $0xe] sm:$0x1]  ;;  %p6754_p2 = por %p6753_p1, %p6752_p0 }
  0x37   : > { %p6748_p13 = pneg %p6747_p12 }
  0x39   : > { %665 = vmatpush1.bf16.msra.mxu0 %v6087_v33  ;;  %v932_v33 = vcombine.low %v5111_v31, %v5112_v32  ;;  %v6192_v31 = vld [vmem:[%s8587_s1 + $0x2d0] ss:$8 sps:$4 sm:$0xff]   ;;  %v6197_v32 = vld [vmem:[%s8587_s1 + $0x2e4] ss:$8 sps:$4 sm:$0xff]   ;;  %p6755_p3 = pnand %p6754_p2, %p6748_p13 }
  0x3a   : > { %666 = vmatprep.subr.bf16.mxu0 %v6092_v34  ;;  %v6147_v34 = vld [vmem:[%s8587_s1 + $0x1e0] ss:$8 sps:$4 sm:$0xff]  }
  0x3d   : > { %667 = vmatpush1.bf16.msra.mxu0 %v6090_v35  ;;  %v6152_v35 = vld [vmem:[%s8587_s1 + $0x1f4] ss:$8 sps:$4 sm:$0xff]  }
  0x3e   : > { %668 = vmatprep.subr.bf16.mxu0 %v6095_v36  ;;  %v939_v36 = vrot.slane %v932_v33, %v6978_v22 }
  0x41   : > { %669 = vmatpush1.bf16.msra.mxu0 %v6093_v37  ;;  %v6150_v37 = vld [vmem:[%s8587_s1 + $0x1f0] ss:$8 sps:$4 sm:$0xff]  }
  0x42   : > { %670 = vmatprep.subr.bf16.mxu0 %v6098_v38  ;;  %v6155_v38 = vld [vmem:[%s8587_s1 + $0x204] ss:$8 sps:$4 sm:$0xff]  }
  0x45   : > { %671 = vmatpush1.bf16.msra.mxu0 %v6096_v39  ;;  %v946_v39 = vrot.slane %v939_v36, %v6978_v22  ;;  %v6291_v36 = vld [vmem:[%s8590_s4 + $0x64] ss:$8 sps:$4 sm:$0xff]  }
  0x46   : > { %672 = vmatprep.subr.bf16.mxu0 %v6101_v42  ;;  %v6156_v42 = vld [vmem:[%s8587_s1 + $0x210] ss:$8 sps:$4 sm:$0xff]  }
  0x49   : > { %673 = vmatpush1.bf16.msra.mxu0 %v6099_v44  ;;  %v6159_v44 = vld [vmem:[%s8587_s1 + $0x220] ss:$8 sps:$4 sm:$0xff]  }
  0x4a   : > { %674 = vmatprep.subr.bf16.mxu0 %v6104_v45  ;;  %v6164_v45 = vld [vmem:[%s8587_s1 + $0x234] ss:$8 sps:$4 sm:$0xff]  }
  0x4d   : > { %675 = vmatpush1.bf16.msra.mxu0 %v6102_v47  ;;  %v6167_v47 = vld [vmem:[%s8587_s1 + $0x244] ss:$8 sps:$4 sm:$0xff]  }
  0x4e   : > { %867 = vmatprep.subr.bf16.mxu0 %v6107_v48  ;;  %v6165_v48 = vld [vmem:[%s8587_s1 + $0x240] ss:$8 sps:$4 sm:$0xff]  }
  0x50   : > { %693 = vmatmul.mubr.bf16.vlgmr.msra.gmra.mrb[0].mxu0 %v578_v50  ;;  %v6168_v50 = vld [vmem:[%s8587_s1 + $0x250] ss:$8 sps:$4 sm:$0xff]  }
  0x51   : > { %868 = vmatpush1.bf16.msra.mxu0 %v6105_v49  ;;  %899 = vmatprep.mubr.bf16.mxu0 %v6809_v2  ;;  %v6170_v49 = vld [vmem:[%s8587_s1 + $0x254] ss:$8 sps:$4 sm:$0xff]  }
  0x52   : > { %869 = vmatprep.subr.bf16.mxu0 %v6110_v51  ;;  %v6173_v51 = vld [vmem:[%s8587_s1 + $0x264] ss:$8 sps:$4 sm:$0xff]  }
  0x55   : > { %870 = vmatpush1.bf16.msra.mxu0 %v6108_v52  ;;  %v5145_v52 = vld [vmem:[%s6962_s26 + $0x12] sm:$0x1] }
  0x56   : > { %871 = vmatprep.subr.bf16.mxu0 %v6113_v53  ;;  %v5146_v53 = vld [vmem:[%s6962_s26 + $0x14] sm:$0x1] }
  0x59   : > { %872 = vmatpush1.bf16.msra.mxu0 %v6111_v54  ;;  %v1093_v54 = vcombine.low %v5145_v52, %v5146_v53  ;;  %v6204_v52 = vld [vmem:[%s8587_s1 + $0x310] ss:$8 sps:$4 sm:$0xff]   ;;  %v6209_v53 = vld [vmem:[%s8587_s1 + $0x324] ss:$8 sps:$4 sm:$0xff]  }
  0x5a   : > { %873 = vmatprep.subr.bf16.mxu0 %v6116_v55  ;;  %v6171_v55 = vld [vmem:[%s8587_s1 + $0x260] ss:$8 sps:$4 sm:$0xff]  }
  0x5b   : > { %v1100_v57 = vrot.slane %v1093_v54, %v6978_v22  ;;  %v6300_v54 = vld [vmem:[%s8592_s6 + $0x210] ss:$8 sps:$4 sm:$0xff]  }
  0x5d   : > { %874 = vmatpush1.bf16.msra.mxu0 %v6114_v58  ;;  %v6174_v58 = vld [vmem:[%s8587_s1 + $0x270] ss:$8 sps:$4 sm:$0xff]   ;;  %v7220_v61 = vrot.slane %v1100_v57, %v6978_v22  ;;  %v6212_v57 = vld [vmem:[%s8587_s1 + $0x334] ss:$8 sps:$4 sm:$0xff]  }
  0x5e   : > { %875 = vmatprep.subr.bf16.mxu0 %v6119_v59  ;;  %v6179_v59 = vld [vmem:[%s8587_s1 + $0x284] ss:$8 sps:$4 sm:$0xff]  }
  0x61   : > { %876 = vmatpush1.bf16.msra.mxu0 %v6117_v62  ;;  %v6182_v62 = vld [vmem:[%s8587_s1 + $0x294] ss:$8 sps:$4 sm:$0xff]  }
  0x62   : > { %877 = vmatprep.subr.bf16.mxu0 %v6122_v63  ;;  %v6273_v63 = vld [vmem:[%s8590_s4 + $0x4] ss:$8 sps:$4 sm:$0xff]  }
  0x63   : > { %2080 = vmatprep.subr.bf16.mxu1 %v6273_v63  ;;  %v6320_v63 = vld [vmem:[%s8592_s6 + $0x244] ss:$8 sps:$4 sm:$0xff]  }
  0x64   : > { %2081 = vmatpush1.bf16.msra.mxu1 %v6275_v1  ;;  %v6213_v1 = vld [vmem:[%s8587_s1 + $0x340] ss:$8 sps:$4 sm:$0xff]  }
  0x65   : > { %878 = vmatpush1.bf16.msra.mxu0 %v6120_v6  ;;  %v6278_v6 = vld [vmem:[%s8590_s4 + $0x10] ss:$8 sps:$4 sm:$0xff]   ;;  %2082 = vmatprep.subr.bf16.mxu1 %v6276_v3  ;;  %v6218_v3 = vld [vmem:[%s8587_s1 + $0x354] ss:$8 sps:$4 sm:$0xff]  }
  0x66   : > { %879 = vmatprep.subr.bf16.mxu0 %v6125_v7  ;;  %v6279_v7 = vld [vmem:[%s8590_s4 + $0x24] ss:$8 sps:$4 sm:$0xff]  }
  0x68   : > { %2083 = vmatpush1.bf16.msra.mxu1 %v6278_v6  ;;  %v6216_v6 = vld [vmem:[%s8587_s1 + $0x350] ss:$8 sps:$4 sm:$0xff]  }
  0x69   : > { %880 = vmatpush1.bf16.msra.mxu0 %v6123_v11  ;;  %v6188_v11 = vld [vmem:[%s8587_s1 + $0x2b4] ss:$8 sps:$4 sm:$0xff]   ;;  %2084 = vmatprep.subr.bf16.mxu1 %v6279_v7  ;;  %v5217_v7 = vld [vmem:[%s6962_s26 + $0x2] sm:$0x1] }
  0x6a   : > { %881 = vmatprep.subr.bf16.mxu0 %v6128_v12  ;;  %v5182_v12 = vld.sshfl [vmem:[%s6962_s26 + $0xe] sm:$0x11 pattern:$0x75316420] }
  0x6c   : > { %2085 = vmatpush1.bf16.msra.mxu1 %v6281_v13  ;;  %v6219_v13 = vld [vmem:[%s8587_s1 + $0x360] ss:$8 sps:$4 sm:$0xff]  }
  0x6d   : > { %882 = vmatpush1.bf16.msra.mxu0 %v6126_v14  ;;  %v6282_v14 = vld [vmem:[%s8590_s4 + $0x34] ss:$8 sps:$4 sm:$0xff]  }
  0x6e   : > { %1028 = vmatprep.subr.bf16.mxu0 %v6131_v15  ;;  %v6186_v15 = vld [vmem:[%s8587_s1 + $0x2b0] ss:$8 sps:$4 sm:$0xff]   ;;  %2086 = vmatprep.subr.bf16.mxu1 %v6282_v14  ;;  %v6224_v14 = vld [vmem:[%s8587_s1 + $0x374] ss:$8 sps:$4 sm:$0xff]  }
  0x70   : > { %900 = vmatmul.mubr.bf16.vlgmr.msra.gmra.mrb[0].mxu0 %v785_v16  ;;  %v1243_v16 = vcombine.high %v5181_v10, %v5181_v10 }
  0x71   : > { %1029 = vmatpush1.bf16.msra.mxu0 %v6129_v17  ;;  %1060 = vmatprep.mubr.bf16.mxu0 %v6809_v2  ;;  %v1251_v17 = vcombine.high %v5182_v12, %v5182_v12 }
  0x72   : > { %1030 = vmatprep.subr.bf16.mxu0 %v6134_v19  ;;  %v6191_v19 = vld [vmem:[%s8587_s1 + $0x2c4] ss:$8 sps:$4 sm:$0xff]  }
  0x75   : > { %1031 = vmatpush1.bf16.msra.mxu0 %v6132_v20  ;;  %v6284_v20 = vld [vmem:[%s8590_s4 + $0x30] ss:$8 sps:$4 sm:$0xff]  }
  0x76   : > { %1032 = vmatprep.subr.bf16.mxu0 %v6137_v21  ;;  %v6189_v21 = vld [vmem:[%s8587_s1 + $0x2c0] ss:$8 sps:$4 sm:$0xff]   ;;  %2087 = vmatpush1.bf16.msra.mxu1 %v6284_v20  ;;  %v6227_v20 = vld [vmem:[%s8587_s1 + $0x384] ss:$8 sps:$4 sm:$0xff]  }
  0x79   : > { %1033 = vmatpush1.bf16.msra.mxu0 %v6135_v23  ;;  %v6285_v23 = vld [vmem:[%s8590_s4 + $0x44] ss:$8 sps:$4 sm:$0xff]  }
  0x7a   : > { %1034 = vmatprep.subr.bf16.mxu0 %v6140_v24  ;;  %v6194_v24 = vld [vmem:[%s8587_s1 + $0x2d4] ss:$8 sps:$4 sm:$0xff]   ;;  %2088 = vmatprep.subr.bf16.mxu1 %v6285_v23  ;;  %v6336_v23 = vld [vmem:[%s8592_s6 + $0x270] ss:$8 sps:$4 sm:$0xff]  }
  0x7d   : > { %1035 = vmatpush1.bf16.msra.mxu0 %v6138_v25  ;;  %v1253_v25 = vshrl.u32 %v5181_v10, 16  ;;  %v6221_v10 = vld [vmem:[%s8587_s1 + $0x364] ss:$8 sps:$4 sm:$0xff]  }
  0x7e   : > { %1036 = vmatprep.subr.bf16.mxu0 %v6143_v26  ;;  %v1258_v26 = vshll.u32 %v1243_v16, 16  ;;  %v6330_v16 = vld [vmem:[%s8592_s6 + $0x260] ss:$8 sps:$4 sm:$0xff]  }
  0x80   : > { %v1260_v33 = vsel %vm7080_vm14, %v1253_v25, %v1258_v26  ;;  %v6230_v26 = vld [vmem:[%s8587_s1 + $0x394] ss:$8 sps:$4 sm:$0xff]  }
  0x81   : > { %1037 = vmatpush1.bf16.msra.mxu0 %v6141_v27  ;;  %v1262_v27 = vshrl.u32 %v5182_v12, 16  ;;  %v6332_v12 = vld [vmem:[%s8592_s6 + $0x264] ss:$8 sps:$4 sm:$0xff]  }
  0x82   : > { %1038 = vmatprep.subr.bf16.mxu0 %v6146_v28  ;;  %v1267_v28 = vshll.u32 %v1251_v17, 16  ;;  %v6338_v17 = vld [vmem:[%s8592_s6 + $0x274] ss:$8 sps:$4 sm:$0xff]  }
  0x85   : > { %1039 = vmatpush1.bf16.msra.mxu0 %v6144_v29  ;;  %v6287_v29 = vld [vmem:[%s8590_s4 + $0x40] ss:$8 sps:$4 sm:$0xff]  }
  0x86   : > { %1040 = vmatprep.subr.bf16.mxu0 %v6149_v30  ;;  %v6288_v30 = vld [vmem:[%s8590_s4 + $0x54] ss:$8 sps:$4 sm:$0xff]   ;;  %2089 = vmatpush1.bf16.msra.mxu1 %v6287_v29  ;;  %v6231_v29 = vld [vmem:[%s8587_s1 + $0x3a0] ss:$8 sps:$4 sm:$0xff]  }
  0x87   : > { %2090 = vmatprep.subr.bf16.mxu1 %v6288_v30  ;;  %v6236_v30 = vld [vmem:[%s8587_s1 + $0x3b4] ss:$8 sps:$4 sm:$0xff]  }
  0x89   : > { %1041 = vmatpush1.bf16.msra.mxu0 %v6147_v34  ;;  %v1269_v34 = vsel %vm7080_vm14, %v1262_v27, %v1267_v28  ;;  %v6228_v27 = vld [vmem:[%s8587_s1 + $0x390] ss:$8 sps:$4 sm:$0xff]   ;;  %v6233_v28 = vld [vmem:[%s8587_s1 + $0x3a4] ss:$8 sps:$4 sm:$0xff]  }
  0x8a   : > { %1042 = vmatprep.subr.bf16.mxu0 %v6152_v35  ;;  %v6290_v35 = vld [vmem:[%s8590_s4 + $0x50] ss:$8 sps:$4 sm:$0xff]  }
  0x8b   : > { %2091 = vmatpush1.bf16.msra.mxu1 %v6290_v35  ;;  %v6240_v35 = vld [vmem:[%s8587_s1 + $0x3d0] ss:$8 sps:$4 sm:$0xff]  }
  0x8c   : > { %2092 = vmatprep.subr.bf16.mxu1 %v6291_v36  ;;  %v5251_v36 = vld [vmem:[%s6962_s26 + $0x8] sm:$0x1] }
  0x8d   : > { %1043 = vmatpush1.bf16.msra.mxu0 %v6150_v37  ;;  %v6195_v37 = vld [vmem:[%s8587_s1 + $0x2e0] ss:$8 sps:$4 sm:$0xff]  }
  0x8e   : > { %1189 = vmatprep.subr.bf16.mxu0 %v6155_v38  ;;  %v1287_v38 = vcombine.low %v1260_v33, %v1269_v34  ;;  %v6237_v33 = vld [vmem:[%s8587_s1 + $0x3c0] ss:$8 sps:$4 sm:$0xff]   ;;  %v6242_v34 = vld [vmem:[%s8587_s1 + $0x3d4] ss:$8 sps:$4 sm:$0xff]  }
  0x90   : > { %1061 = vmatmul.mubr.bf16.vlgmr.msra.gmra.mrb[0].mxu0 %v946_v39  ;;  %v6200_v39 = vld [vmem:[%s8587_s1 + $0x2f4] ss:$8 sps:$4 sm:$0xff]  }
  0x91   : > { %1190 = vmatpush1.bf16.msra.mxu0 %v6153_v40  ;;  %1221 = vmatprep.mubr.bf16.mxu0 %v6809_v2  ;;  %v6293_v40 = vld [vmem:[%s8590_s4 + $0x60] ss:$8 sps:$4 sm:$0xff]  }
  0x92   : > { %1191 = vmatprep.subr.bf16.mxu0 %v6158_v41  ;;  %v6294_v41 = vld [vmem:[%s8590_s4 + $0x74] ss:$8 sps:$4 sm:$0xff]   ;;  %2093 = vmatpush1.bf16.msra.mxu1 %v6293_v40  ;;  %v6243_v40 = vld [vmem:[%s8587_s1 + $0x3e0] ss:$8 sps:$4 sm:$0xff]  }
  0x93   : > { %2094 = vmatprep.subr.bf16.mxu1 %v6294_v41  ;;  %v6248_v41 = vld [vmem:[%s8587_s1 + $0x3f4] ss:$8 sps:$4 sm:$0xff]  }
  0x95   : > { %1192 = vmatpush1.bf16.msra.mxu0 %v6156_v42  ;;  %v6198_v42 = vld [vmem:[%s8587_s1 + $0x2f0] ss:$8 sps:$4 sm:$0xff]  }
  0x96   : > { %1193 = vmatprep.subr.bf16.mxu0 %v6161_v43  ;;  %v6203_v43 = vld [vmem:[%s8587_s1 + $0x304] ss:$8 sps:$4 sm:$0xff]  }
  0x99   : > { %1194 = vmatpush1.bf16.msra.mxu0 %v6159_v44  ;;  %v1294_v44 = vrot.slane %v1287_v38, %v6978_v22  ;;  %v6245_v38 = vld [vmem:[%s8587_s1 + $0x3e4] ss:$8 sps:$4 sm:$0xff]  }
  0x9a   : > { %1195 = vmatprep.subr.bf16.mxu0 %v6164_v45  ;;  %v6296_v45 = vld [vmem:[%s8590_s4 + $0x70] ss:$8 sps:$4 sm:$0xff]  }
  0x9b   : > { %2095 = vmatpush1.bf16.msra.mxu1 %v6296_v45 }
  0x9d   : > { %1196 = vmatpush1.bf16.msra.mxu0 %v6162_v46  ;;  %v6299_v46 = vld [vmem:[%s8592_s6 + $0x204] ss:$8 sps:$4 sm:$0xff]  }
  0x9e   : > { %1197 = vmatprep.subr.bf16.mxu0 %v6167_v47  ;;  %v6201_v47 = vld [vmem:[%s8587_s1 + $0x300] ss:$8 sps:$4 sm:$0xff]   ;;  %2976 = vmatprep.subr.bf16.mxu1 %v6299_v46 }
  0x9f   : > { %2113 = vmatmul.mubr.bf16.vlgmr.msra.gmra.mrb[0].mxu1 %v7220_v61  ;;  %v6249_v46 = vld [vmem:[%s8587_s1 + $0x400] ss:$8 sps:$4 sm:$0xff]  }
  0xa1   : > { %1198 = vmatpush1.bf16.msra.mxu0 %v6165_v48  ;;  %v1301_v48 = vrot.slane %v1294_v44, %v6978_v22  ;;  %v6251_v44 = vld [vmem:[%s8587_s1 + $0x404] ss:$8 sps:$4 sm:$0xff]  }
  0xa2   : > { %1199 = vmatprep.subr.bf16.mxu0 %v6170_v49  ;;  %v6206_v49 = vld [vmem:[%s8587_s1 + $0x314] ss:$8 sps:$4 sm:$0xff]  }
  0xa5   : > { %1200 = vmatpush1.bf16.msra.mxu0 %v6168_v50  ;;  %v6297_v50 = vld [vmem:[%s8592_s6 + $0x200] ss:$8 sps:$4 sm:$0xff]  }
  0xa6   : > { %1201 = vmatprep.subr.bf16.mxu0 %v6173_v51  ;;  %v6302_v51 = vld [vmem:[%s8592_s6 + $0x214] ss:$8 sps:$4 sm:$0xff]   ;;  %2977 = vmatpush1.bf16.msra.mxu1 %v6297_v50  ;;  %v6255_v50 = vld [vmem:[%s8587_s1 + $0x420] ss:$8 sps:$4 sm:$0xff]  }
  0xa7   : > { %2978 = vmatprep.subr.bf16.mxu1 %v6302_v51  ;;  %v6260_v51 = vld [vmem:[%s8587_s1 + $0x434] ss:$8 sps:$4 sm:$0xff]  }
  0xa9   : > { %1202 = vmatpush1.bf16.msra.mxu0 %v6171_v55  ;;  %v6308_v55 = vld [vmem:[%s8592_s6 + $0x224] ss:$8 sps:$4 sm:$0xff]  }
  0xaa   : > { %1203 = vmatprep.subr.bf16.mxu0 %v6176_v56  ;;  %v6207_v56 = vld [vmem:[%s8587_s1 + $0x320] ss:$8 sps:$4 sm:$0xff]   ;;  %2979 = vmatpush1.bf16.msra.mxu1 %v6300_v54  ;;  %v6263_v54 = vld [vmem:[%s8587_s1 + $0x444] ss:$8 sps:$4 sm:$0xff]  }
  0xab   : > { %2980 = vmatprep.subr.bf16.mxu1 %v6308_v55  ;;  %v6261_v55 = vld [vmem:[%s8587_s1 + $0x440] ss:$8 sps:$4 sm:$0xff]  }
  0xad   : > { %1204 = vmatpush1.bf16.msra.mxu0 %v6174_v58  ;;  %v6306_v58 = vld [vmem:[%s8592_s6 + $0x220] ss:$8 sps:$4 sm:$0xff]  }
  0xae   : > { %1383 = vmatprep.subr.bf16.mxu0 %v6179_v59  ;;  %v6314_v59 = vld [vmem:[%s8592_s6 + $0x234] ss:$8 sps:$4 sm:$0xff]   ;;  %2981 = vmatpush1.bf16.msra.mxu1 %v6306_v58 }
  0xaf   : > { %2982 = vmatprep.subr.bf16.mxu1 %v6314_v59  ;;  %v6266_v58 = vld [vmem:[%s8587_s1 + $0x454] ss:$8 sps:$4 sm:$0xff]   ;;  %v6264_v59 = vld [vmem:[%s8587_s1 + $0x450] ss:$8 sps:$4 sm:$0xff]  }
  0xb0   : > { %1222 = vmatmul.mubr.bf16.vlgmr.msra.gmra.mrb[0].mxu0 %v7220_v61  ;;  %v6215_v61 = vld [vmem:[%s8587_s1 + $0x344] ss:$8 sps:$4 sm:$0xff]  }
  0xb1   : > { %1384 = vmatpush1.bf16.msra.mxu0 %v6177_v60  ;;  %1415 = vmatprep.mubr.bf16.mxu0 %v6809_v2  ;;  %v6210_v60 = vld [vmem:[%s8587_s1 + $0x330] ss:$8 sps:$4 sm:$0xff]  }
  0xb2   : > { %1385 = vmatprep.subr.bf16.mxu0 %v6182_v62  ;;  %v6312_v62 = vld [vmem:[%s8592_s6 + $0x230] ss:$8 sps:$4 sm:$0xff]  }
  0xb3   : > { %2983 = vmatpush1.bf16.msra.mxu1 %v6312_v62 }
  0xb4   : > { %2984 = vmatprep.subr.bf16.mxu1 %v6320_v63  ;;  %v6267_v63 = vld [vmem:[%s8587_s1 + $0x460] ss:$8 sps:$4 sm:$0xff]  }
  0xb5   : > { %1386 = vmatpush1.bf16.msra.mxu0 %v6180_v4  ;;  %v6318_v4 = vld [vmem:[%s8592_s6 + $0x240] ss:$8 sps:$4 sm:$0xff]  }
  0xb6   : > { %1387 = vmatprep.subr.bf16.mxu0 %v6185_v5  ;;  %v6326_v5 = vld [vmem:[%s8592_s6 + $0x254] ss:$8 sps:$4 sm:$0xff]  }
  0xb7   : > { %2985 = vmatpush1.bf16.msra.mxu1 %v6318_v4  ;;  %v6270_v4 = vld [vmem:[%s8587_s1 + $0x470] ss:$8 sps:$4 sm:$0xff]  }
  0xb8   : > { %2986 = vmatprep.subr.bf16.mxu1 %v6326_v5 }
  0xb9   : > { %1388 = vmatpush1.bf16.msra.mxu0 %v6183_v8  ;;  %v5218_v8 = vld [vmem:[%s6962_s26 + $0x4] sm:$0x1] }
  0xba   : > { %1389 = vmatprep.subr.bf16.mxu0 %v6188_v11  ;;  %v6324_v11 = vld [vmem:[%s8592_s6 + $0x250] ss:$8 sps:$4 sm:$0xff]  }
  0xbb   : > { %2987 = vmatpush1.bf16.msra.mxu1 %v6324_v11  ;;  %v6315_v11 = vld [vmem:[%s8592_s6 + $0x120] ss:$8 sps:$4 sm:$0xff]  }
  0xbc   : > { %2988 = vmatprep.subr.bf16.mxu1 %v6332_v12  ;;  %v6323_v12 = vld [vmem:[%s8592_s6 + $0x134] ss:$8 sps:$4 sm:$0xff]  }
  0xbd   : > { %1390 = vmatpush1.bf16.msra.mxu0 %v6186_v15  ;;  %v1448_v15 = vcombine.low %v5217_v7, %v5218_v8  ;;  %v6311_v7 = vld [vmem:[%s8592_s6 + $0x114] ss:$8 sps:$4 sm:$0xff]   ;;  %v6309_v8 = vld [vmem:[%s8592_s6 + $0x110] ss:$8 sps:$4 sm:$0xff]  }
  0xbe   : > { %1391 = vmatprep.subr.bf16.mxu0 %v6191_v19  ;;  %v6222_v19 = vld [vmem:[%s8587_s1 + $0x370] ss:$8 sps:$4 sm:$0xff]  }
  0xbf   : > { %2989 = vmatpush1.bf16.msra.mxu1 %v6330_v16  ;;  %v6335_v16 = vld [vmem:[%s8592_s6 + $0x154] ss:$8 sps:$4 sm:$0xff]  }
  0xc0   : > { %2990 = vmatprep.subr.bf16.mxu1 %v6338_v17  ;;  %v6333_v17 = vld [vmem:[%s8592_s6 + $0x150] ss:$8 sps:$4 sm:$0xff]  }
  0xc1   : > { %1392 = vmatpush1.bf16.msra.mxu0 %v6189_v21  ;;  %v1455_v21 = vrot.slane %v1448_v15, %v6978_v22  ;;  %v6327_v15 = vld [vmem:[%s8592_s6 + $0x140] ss:$8 sps:$4 sm:$0xff]  }
  0xc2   : > { %1393 = vmatprep.subr.bf16.mxu0 %v6194_v24  ;;  %v6225_v24 = vld [vmem:[%s8587_s1 + $0x380] ss:$8 sps:$4 sm:$0xff]  }
  0xc3   : > { %v1462_v25 = vrot.slane %v1455_v21, %v6978_v22  ;;  %2991 = vmatpush1.bf16.msra.mxu1 %v6336_v23  ;;  %v6344_v21 = vld [vmem:[%s8592_s6 + $0x284] ss:$8 sps:$4 sm:$0xff]   ;;  %v6342_v23 = vld [vmem:[%s8592_s6 + $0x280] ss:$8 sps:$4 sm:$0xff]  }
  0xc4   : > { %2992 = vmatprep.subr.bf16.mxu1 %v6344_v21 }
  0xc5   : > { %1394 = vmatpush1.bf16.msra.mxu0 %v6192_v31  ;;  %v6234_v31 = vld [vmem:[%s8587_s1 + $0x3b0] ss:$8 sps:$4 sm:$0xff]  }
  0xc6   : > { %1395 = vmatprep.subr.bf16.mxu0 %v6197_v32  ;;  %v6239_v32 = vld [vmem:[%s8587_s1 + $0x3c4] ss:$8 sps:$4 sm:$0xff]  }
  0xc7   : > { %2993 = vmatpush1.bf16.msra.mxu1 %v6342_v23 }
  0xc9   : > { %1396 = vmatpush1.bf16.msra.mxu0 %v6195_v37  ;;  %v5252_v37 = vld [vmem:[%s6962_s26 + $0xa] sm:$0x1] }
  0xca   : > { %1397 = vmatprep.subr.bf16.mxu0 %v6200_v39  ;;  %v1609_v39 = vcombine.low %v5251_v36, %v5252_v37  ;;  %v6365_v36 = vld [vmem:[%s8592_s6 + $0x1a4] ss:$8 sps:$4 sm:$0xff]   ;;  %v6363_v37 = vld [vmem:[%s8592_s6 + $0x1a0] ss:$8 sps:$4 sm:$0xff]  }
  0xcd   : > { %1398 = vmatpush1.bf16.msra.mxu0 %v6198_v42  ;;  %v1616_v42 = vrot.slane %v1609_v39, %v6978_v22  ;;  %v6366_v39 = vld [vmem:[%s8592_s6 + $0x2c0] ss:$8 sps:$4 sm:$0xff]  }
  0xce   : > { %1544 = vmatprep.subr.bf16.mxu0 %v6203_v43  ;;  %v6246_v43 = vld [vmem:[%s8587_s1 + $0x3f0] ss:$8 sps:$4 sm:$0xff]  }
  0xcf   : > { %v1623_v45 = vrot.slane %v1616_v42, %v6978_v22  ;;  %v6372_v42 = vld [vmem:[%s8592_s6 + $0x2d0] ss:$8 sps:$4 sm:$0xff]  }
  0xd0   : > { %1416 = vmatmul.mubr.bf16.vlgmr.msra.gmra.mrb[0].mxu0 %v1301_v48  ;;  %v6252_v48 = vld [vmem:[%s8587_s1 + $0x410] ss:$8 sps:$4 sm:$0xff]  }
  0xd1   : > { %1545 = vmatpush1.bf16.msra.mxu0 %v6201_v47  ;;  %1576 = vmatprep.mubr.bf16.mxu0 %v6809_v2  ;;  %v6254_v47 = vld [vmem:[%s8587_s1 + $0x414] ss:$8 sps:$4 sm:$0xff]  }
  0xd2   : > { %1546 = vmatprep.subr.bf16.mxu0 %v6206_v49  ;;  %v6257_v49 = vld [vmem:[%s8587_s1 + $0x424] ss:$8 sps:$4 sm:$0xff]  }
  0xd5   : > { %1547 = vmatpush1.bf16.msra.mxu0 %v6204_v52  ;;  %v5288_v52 = vld.sshfl [vmem:[%s6962_s26 + $0x4] sm:$0x11 pattern:$0x75316420] }
  0xd6   : > { %1548 = vmatprep.subr.bf16.mxu0 %v6209_v53  ;;  %v1767_v53 = vcombine.high %v5288_v52, %v5288_v52 }
  0xd9   : > { %1549 = vmatpush1.bf16.msra.mxu0 %v6207_v56  ;;  %v1778_v56 = vshrl.u32 %v5288_v52, 16  ;;  %v6384_v52 = vld [vmem:[%s8592_s6 + $0x2f0] ss:$8 sps:$4 sm:$0xff]  }
  0xda   : > { %1550 = vmatprep.subr.bf16.mxu0 %v6212_v57  ;;  %v1783_v57 = vshll.u32 %v1767_v53, 16  ;;  %v6392_v53 = vld [vmem:[%s8592_s6 + $0x304] ss:$8 sps:$4 sm:$0xff]  }
  0xdd   : > { %1551 = vmatpush1.bf16.msra.mxu0 %v6210_v60  ;;  %v1785_v60 = vsel %vm7080_vm14, %v1778_v56, %v1783_v57  ;;  %v6401_v56 = vld [vmem:[%s8592_s6 + $0x4] ss:$8 sps:$4 sm:$0xff]   ;;  %v7683_v57 = vsub.s32 0, %v6971_v18 }
  0xde   : > { %1552 = vmatprep.subr.bf16.mxu0 %v6215_v61  ;;  %v6269_v61 = vld [vmem:[%s8587_s1 + $0x464] ss:$8 sps:$4 sm:$0xff]   ;;  %v1803_v62 = vcombine.low %v7094_v9, %v1785_v60  ;;  %v1956_v60 = vld [vmem:[%s8589_s3] sm:$0x3] }
  0xdf   : > { %v6305_v9 = vld [vmem:[%s8592_s6 + $0x104] ss:$8 sps:$4 sm:$0xff]  }
  0xe1   : > { %1553 = vmatpush1.bf16.msra.mxu0 %v6213_v1  ;;  %v6272_v1 = vld [vmem:[%s8587_s1 + $0x474] ss:$8 sps:$4 sm:$0xff]  }
  0xe2   : > { %1554 = vmatprep.subr.bf16.mxu0 %v6218_v3  ;;  %v1810_v3 = vrot.slane %v1803_v62, %v6978_v22 }
  0xe4   : > { %v1817_v5 = vrot.slane %v1810_v3, %v6978_v22  ;;  %v1961_v3 = vrot.slane %v1956_v60, %v7683_v57 }
  0xe5   : > { %1555 = vmatpush1.bf16.msra.mxu0 %v6216_v6  ;;  %v6303_v6 = vld [vmem:[%s8592_s6 + $0x100] ss:$8 sps:$4 sm:$0xff]  }
  0xe6   : > { %1556 = vmatprep.subr.bf16.mxu0 %v6221_v10  ;;  %v6317_v10 = vld [vmem:[%s8592_s6 + $0x124] ss:$8 sps:$4 sm:$0xff]  }
  0xe9   : > { %1557 = vmatpush1.bf16.msra.mxu0 %v6219_v13  ;;  %v6321_v13 = vld [vmem:[%s8592_s6 + $0x130] ss:$8 sps:$4 sm:$0xff]  }
  0xea   : > { %1558 = vmatprep.subr.bf16.mxu0 %v6224_v14  ;;  %v6329_v14 = vld [vmem:[%s8592_s6 + $0x144] ss:$8 sps:$4 sm:$0xff]  }
  0xed   : > { %1559 = vmatpush1.bf16.msra.mxu0 %v6222_v19  ;;  %v6341_v19 = vld [vmem:[%s8592_s6 + $0x164] ss:$8 sps:$4 sm:$0xff]  }
  0xee   : > { %1705 = vmatprep.subr.bf16.mxu0 %v6227_v20  ;;  %v6339_v20 = vld [vmem:[%s8592_s6 + $0x160] ss:$8 sps:$4 sm:$0xff]  }
  0xf0   : > { %1577 = vmatmul.mubr.bf16.vlgmr.msra.gmra.mrb[0].mxu0 %v1462_v25  ;;  %v6345_v25 = vld [vmem:[%s8592_s6 + $0x170] ss:$8 sps:$4 sm:$0xff]  }
  0xf1   : > { %1706 = vmatpush1.bf16.msra.mxu0 %v6225_v24  ;;  %1737 = vmatprep.mubr.bf16.mxu0 %v6809_v2  ;;  %v6347_v24 = vld [vmem:[%s8592_s6 + $0x174] ss:$8 sps:$4 sm:$0xff]  }
  0xf2   : > { %1707 = vmatprep.subr.bf16.mxu0 %v6230_v26  ;;  %v6350_v26 = vld [vmem:[%s8592_s6 + $0x294] ss:$8 sps:$4 sm:$0xff]  }
  0xf3   : > { %2994 = vmatprep.subr.bf16.mxu1 %v6350_v26 }
  0xf5   : > { %1708 = vmatpush1.bf16.msra.mxu0 %v6228_v27  ;;  %v6348_v27 = vld [vmem:[%s8592_s6 + $0x290] ss:$8 sps:$4 sm:$0xff]  }
  0xf6   : > { %1709 = vmatprep.subr.bf16.mxu0 %v6233_v28  ;;  %v6353_v28 = vld [vmem:[%s8592_s6 + $0x184] ss:$8 sps:$4 sm:$0xff]   ;;  %2995 = vmatpush1.bf16.msra.mxu1 %v6348_v27 }
  0xf9   : > { %1710 = vmatpush1.bf16.msra.mxu0 %v6231_v29  ;;  %v6351_v29 = vld [vmem:[%s8592_s6 + $0x180] ss:$8 sps:$4 sm:$0xff]  }
  0xfa   : > { %1711 = vmatprep.subr.bf16.mxu0 %v6236_v30  ;;  %v6356_v30 = vld [vmem:[%s8592_s6 + $0x2a4] ss:$8 sps:$4 sm:$0xff]  }
  0xfb   : > { %2996 = vmatprep.subr.bf16.mxu1 %v6356_v30 }
  0xfd   : > { %1712 = vmatpush1.bf16.msra.mxu0 %v6234_v31  ;;  %v6354_v31 = vld [vmem:[%s8592_s6 + $0x2a0] ss:$8 sps:$4 sm:$0xff]  }
  0xfe   : > { %1713 = vmatprep.subr.bf16.mxu0 %v6239_v32  ;;  %v6359_v32 = vld [vmem:[%s8592_s6 + $0x194] ss:$8 sps:$4 sm:$0xff]   ;;  %2997 = vmatpush1.bf16.msra.mxu1 %v6354_v31 }
 0x101   : > { %1714 = vmatpush1.bf16.msra.mxu0 %v6237_v33  ;;  %v6357_v33 = vld [vmem:[%s8592_s6 + $0x190] ss:$8 sps:$4 sm:$0xff]  }
 0x102   : > { %1715 = vmatprep.subr.bf16.mxu0 %v6242_v34  ;;  %v6362_v34 = vld [vmem:[%s8592_s6 + $0x2b4] ss:$8 sps:$4 sm:$0xff]  }
 0x103   : > { %2998 = vmatprep.subr.bf16.mxu1 %v6362_v34  ;;  %v5442_v34 = vld.sshfl [vmem:[#allocation2] sm:$0x30 pattern:$0x75316420] }
 0x105   : > { %1716 = vmatpush1.bf16.msra.mxu0 %v6240_v35  ;;  %v6360_v35 = vld [vmem:[%s8592_s6 + $0x2b0] ss:$8 sps:$4 sm:$0xff]  }
 0x106   : > { %1717 = vmatprep.subr.bf16.mxu0 %v6245_v38  ;;  %2999 = vmatpush1.bf16.msra.mxu1 %v6360_v35  ;;  %v6368_v38 = vld [vmem:[%s8592_s6 + $0x2c4] ss:$8 sps:$4 sm:$0xff]  }
 0x107   : > { %3000 = vmatprep.subr.bf16.mxu1 %v6368_v38 }
 0x109   : > { %1718 = vmatpush1.bf16.msra.mxu0 %v6243_v40  ;;  %v6371_v40 = vld [vmem:[%s8592_s6 + $0x1b4] ss:$8 sps:$4 sm:$0xff]  }
 0x10a   : > { %1719 = vmatprep.subr.bf16.mxu0 %v6248_v41  ;;  %v6369_v41 = vld [vmem:[%s8592_s6 + $0x1b0] ss:$8 sps:$4 sm:$0xff]   ;;  %3001 = vmatpush1.bf16.msra.mxu1 %v6366_v39 }
 0x10d   : > { %1720 = vmatpush1.bf16.msra.mxu0 %v6246_v43  ;;  %v6374_v43 = vld [vmem:[%s8592_s6 + $0x2d4] ss:$8 sps:$4 sm:$0xff]  }
 0x10e   : > { %1899 = vmatprep.subr.bf16.mxu0 %v6251_v44  ;;  %v6375_v44 = vld [vmem:[%s8592_s6 + $0x1c0] ss:$8 sps:$4 sm:$0xff]   ;;  %3002 = vmatprep.subr.bf16.mxu1 %v6374_v43 }
 0x10f   : > { %3003 = vmatpush1.bf16.msra.mxu1 %v6372_v42 }
 0x110   : > { %1738 = vmatmul.mubr.bf16.vlgmr.msra.gmra.mrb[0].mxu0 %v1623_v45  ;;  %v6377_v45 = vld [vmem:[%s8592_s6 + $0x1c4] ss:$8 sps:$4 sm:$0xff]  }
 0x111   : > { %1900 = vmatpush1.bf16.msra.mxu0 %v6249_v46  ;;  %1931 = vmatprep.mubr.bf16.mxu0 %v6809_v2  ;;  %v6258_v2 = vld [vmem:[%s8587_s1 + $0x430] ss:$8 sps:$4 sm:$0xff]   ;;  %v6380_v46 = vld [vmem:[%s8592_s6 + $0x2e4] ss:$8 sps:$4 sm:$0xff]  }
 0x112   : > { %1901 = vmatprep.subr.bf16.mxu0 %v6254_v47  ;;  %v6383_v47 = vld [vmem:[%s8592_s6 + $0x1d4] ss:$8 sps:$4 sm:$0xff]   ;;  %3004 = vmatprep.subr.bf16.mxu1 %v6380_v46 }
 0x115   : > { %1902 = vmatpush1.bf16.msra.mxu0 %v6252_v48  ;;  %v6378_v48 = vld [vmem:[%s8592_s6 + $0x2e0] ss:$8 sps:$4 sm:$0xff]  }
 0x116   : > { %1903 = vmatprep.subr.bf16.mxu0 %v6257_v49  ;;  %v6386_v49 = vld [vmem:[%s8592_s6 + $0x2f4] ss:$8 sps:$4 sm:$0xff]   ;;  %3005 = vmatpush1.bf16.msra.mxu1 %v6378_v48 }
 0x117   : > { %3006 = vmatprep.subr.bf16.mxu1 %v6386_v49 }
 0x119   : > { %1904 = vmatpush1.bf16.msra.mxu0 %v6255_v50  ;;  %v6381_v50 = vld [vmem:[%s8592_s6 + $0x1d0] ss:$8 sps:$4 sm:$0xff]  }
 0x11a   : > { %1905 = vmatprep.subr.bf16.mxu0 %v6260_v51  ;;  %v6389_v51 = vld [vmem:[%s8592_s6 + $0x1e4] ss:$8 sps:$4 sm:$0xff]   ;;  %3007 = vmatpush1.bf16.msra.mxu1 %v6384_v52 }
 0x11b   : > { %3255 = vmatprep.subr.bf16.mxu1 %v6392_v53  ;;  %v6390_v53 = vld [vmem:[%s8592_s6 + $0x300] ss:$8 sps:$4 sm:$0xff]  }
 0x11d   : > { %1906 = vmatpush1.bf16.msra.mxu0 %v6258_v2  ;;  %v6387_v2 = vld [vmem:[%s8592_s6 + $0x1e0] ss:$8 sps:$4 sm:$0xff]  }
 0x11e   : > { %1907 = vmatprep.subr.bf16.mxu0 %v6263_v54  ;;  %v6395_v54 = vld [vmem:[%s8592_s6 + $0x1f4] ss:$8 sps:$4 sm:$0xff]  }
 0x121   : > { %1908 = vmatpush1.bf16.msra.mxu0 %v6261_v55  ;;  %v6393_v55 = vld [vmem:[%s8592_s6 + $0x1f0] ss:$8 sps:$4 sm:$0xff]  }
 0x122   : > { %1909 = vmatprep.subr.bf16.mxu0 %v6266_v58  ;;  %v1942_v58 = vld [vmem:[%s8588_s2] sm:$0x3] }
 0x125   : > { %1910 = vmatpush1.bf16.msra.mxu0 %v6264_v59  ;;  %v7689_v59 = vsub.s32 1, %v6971_v18 }
 0x126   : > { %1911 = vmatprep.subr.bf16.mxu0 %v6269_v61  ;;  %v1947_v61 = vrot.slane %v1942_v58, %v7683_v57 }
 0x127   : > { %v1951_v62 = vrot.slane %v1942_v58, %v7689_v59 }
 0x129   : > { %1912 = vmatpush1.bf16.msra.mxu0 %v6267_v63  ;;  %v6811_v63 = vmov 1983009808  }
 0x12a   : > { %1913 = vmatprep.subr.bf16.mxu0 %v6272_v1  ;;  %v2131_v1 = vunpack.c.l.s4 %v6811_v63  ;;  %v6396_v63 = vld [vmem:[%s8592_s6 + $0x310] ss:$8 sps:$4 sm:$0xff]  }
 0x12d   : > { %1914 = vmatpush1.bf16.msra.mxu0 %v6270_v4 }
 0x12e   : > { %2471 = vmatprep.subr.bf16.mxu0 %v6305_v9  ;;  %v1965_v9 = vrot.slane %v1956_v60, %v7689_v59 }
 0x130   : > { %1932 = vmatmul.mubr.bf16.vlgmr.msra.gmra.mrb[0].mxu0 %v1817_v5 }
 0x131   : > { %2472 = vmatpush1.bf16.msra.mxu0 %v6303_v6 }
 0x132   : > { %2473 = vmatprep.subr.bf16.mxu0 %v6311_v7 }
 0x135   : > { %2474 = vmatpush1.bf16.msra.mxu0 %v6309_v8  ;;  %v2132_v8 = vunpack.c.0.s8 %v2131_v1 }
 0x136   : > { %2475 = vmatprep.subr.bf16.mxu0 %v6317_v10 }
 0x139   : > { %2476 = vmatpush1.bf16.msra.mxu0 %v6315_v11 }
 0x13a   : > { %2477 = vmatprep.subr.bf16.mxu0 %v6323_v12 }
 0x13d   : > { %2478 = vmatpush1.bf16.msra.mxu0 %v6321_v13 }
 0x13e   : > { %2479 = vmatprep.subr.bf16.mxu0 %v6329_v14 }
 0x141   : > { %2480 = vmatpush1.bf16.msra.mxu0 %v6327_v15 }
 0x142   : > { %2481 = vmatprep.subr.bf16.mxu0 %v6335_v16  ;;  %v2135_v16 = vsub.s32 %v2132_v8, %v6971_v18  ;;  %v2153_v18 = vld [vmem:[#allocation2 + $0x4] sm:$0xf]  ;;  %v6402_v8 = vld [vmem:[%s8592_s6 + $0x320] ss:$8 sps:$4 sm:$0xff]  }
 0x145   : > { %2482 = vmatpush1.bf16.msra.mxu0 %v6333_v17 }
 0x146   : > { %2483 = vmatprep.subr.bf16.mxu0 %v6341_v19 }
 0x149   : > { %2484 = vmatpush1.bf16.msra.mxu0 %v6339_v20  ;;  %v6419_v20 = vld [vmem:[%s8592_s6 + $0x34] ss:$8 sps:$4 sm:$0xff]  }
 0x14a   : > { %2485 = vmatprep.subr.bf16.mxu0 %v6347_v24 }
 0x14d   : > { %2486 = vmatpush1.bf16.msra.mxu0 %v6345_v25 }
 0x14e   : > { %2487 = vmatprep.subr.bf16.mxu0 %v6353_v28 }
 0x151   : > { %2488 = vmatpush1.bf16.msra.mxu0 %v6351_v29  ;;  %v2162_v29 = vld [vmem:[#allocation2 + $0x8] sm:$0xf] }
 0x152   : > { %2489 = vmatprep.subr.bf16.mxu0 %v6359_v32 }
 0x155   : > { %2490 = vmatpush1.bf16.msra.mxu0 %v6357_v33  ;;  %v5342_v33 = vld.sshfl [vmem:[#allocation2] sm:$0x33 pattern:$0x75316420] }
 0x156   : > { %2491 = vmatprep.subr.bf16.mxu0 %v6365_v36  ;;  %v2226_v35 = vcombine.high %v5342_v33, %v5342_v33 }
 0x158   : > { %v2241_v42 = vshll.u32 %v2226_v35, 16  ;;  %v6432_v35 = vld [vmem:[%s8592_s6 + $0x370] ss:$8 sps:$4 sm:$0xff]  }
 0x159   : > { %2492 = vmatpush1.bf16.msra.mxu0 %v6363_v37  ;;  %v5340_v37 = vld.sshfl [vmem:[#allocation2] sm:$0x3 pattern:$0x75316420] }
 0x15a   : > { %2493 = vmatprep.subr.bf16.mxu0 %v6371_v40 }
 0x15d   : > { %2494 = vmatpush1.bf16.msra.mxu0 %v6369_v41  ;;  %v2236_v41 = vshrl.u32 %v5342_v33, 16  ;;  %v6434_v33 = vld [vmem:[%s8592_s6 + $0x374] ss:$8 sps:$4 sm:$0xff]  }
 0x15e   : > { %2495 = vmatprep.subr.bf16.mxu0 %v6377_v45 }
 0x161   : > { %2496 = vmatpush1.bf16.msra.mxu0 %v6375_v44 }
 0x162   : > { %2497 = vmatprep.subr.bf16.mxu0 %v6383_v47 }
 0x165   : > { %2498 = vmatpush1.bf16.msra.mxu0 %v6381_v50  ;;  %v2243_v50 = vsel %vm7080_vm14, %v2236_v41, %v2241_v42  ;;  %v6438_v41 = vld [vmem:[%s8592_s6 + $0x380] ss:$8 sps:$4 sm:$0xff]   ;;  %v6443_v42 = vld [vmem:[%s8592_s6 + $0x74] ss:$8 sps:$4 sm:$0xff]  }
 0x166   : > { %2499 = vmatprep.subr.bf16.mxu0 %v6389_v51 }
 0x169   : > { %2500 = vmatpush1.bf16.msra.mxu0 %v6387_v2 }
 0x16a   : > { %2501 = vmatprep.subr.bf16.mxu0 %v6395_v54 }
 0x16d   : > { %2502 = vmatpush1.bf16.msra.mxu0 %v6393_v55 }
 0x16e   : > { %2697 = vmatprep.subr.bf16.mxu0 %v6401_v56  ;;  %v6398_v56 = vld [vmem:[%s8592_s6 + $0x314] ss:$8 sps:$4 sm:$0xff]  }
 0x203   : > { %v1933_v4 = vpop.f32.mrb[0].mxu0 }
 0x204   : > { %v1954_v5 = vmul.f32 %v1947_v61, %v1933_v4  ;;  %v1935_v6 = vpop.f32.mrb[1].mxu0 }
 0x205   : > { %v1955_v7 = vmul.f32 %v1951_v62, %v1935_v6  ;;  %v1937_v10 = vpop.f32.mrb[2].mxu0  ;;  %v6399_v6 = vld [vmem:[%s8592_s6] ss:$8 sps:$4 sm:$0xff]  }
 0x206   : > { %v1968_v11 = vadd.f32 %v1961_v3, %v1954_v5  ;;  %v1938_v12 = vpop.f32.mrb[3].mxu0  ;;  %v6404_v3 = vld [vmem:[%s8592_s6 + $0x324] ss:$8 sps:$4 sm:$0xff]   ;;  %v6407_v10 = vld [vmem:[%s8592_s6 + $0x14] ss:$8 sps:$4 sm:$0xff]  }
 0x207   : > { %v1969_v13 = vadd.f32 %v1965_v9, %v1955_v7  ;;  %v6410_v12 = vld [vmem:[%s8592_s6 + $0x334] ss:$8 sps:$4 sm:$0xff]  }
 0x208   : > { %v1970_v14 = vmax.f32 %v1968_v11, 0.0 }
 0x209   : > { %v1971_v15 = vmax.f32 %v1969_v13, 0.0  ;;  %v6405_v13 = vld [vmem:[%s8592_s6 + $0x10] ss:$8 sps:$4 sm:$0xff]  }
 0x20b   : > { %v5339_v17 = vpack.c.bf16 %v1971_v15, %v1970_v14  ;;  %v6408_v14 = vld [vmem:[%s8592_s6 + $0x330] ss:$8 sps:$4 sm:$0xff]   ;;  %v6413_v15 = vld [vmem:[%s8592_s6 + $0x24] ss:$8 sps:$4 sm:$0xff]  }
 0x20d   : > { %v2136_v19 = vrot.slane %v5339_v17, %v2135_v16  ;;  %v6416_v16 = vld [vmem:[%s8592_s6 + $0x344] ss:$8 sps:$4 sm:$0xff]   ;;  %v6411_v17 = vld [vmem:[%s8592_s6 + $0x20] ss:$8 sps:$4 sm:$0xff]  }
 0x20f   : > { %v2138_v21 = vshrl.u32 %v2136_v19, 16  ;;  %v2141_v23 = vshll.u32 %v2136_v19, 16  ;;  %v6414_v19 = vld [vmem:[%s8592_s6 + $0x340] ss:$8 sps:$4 sm:$0xff]  }
 0x211   : > { %v2140_v24 = vrot.slane %v2138_v21, 7  ;;  %v2156_v25 = vrot.slane %v2138_v21, 6  ;;  %v2157_v26 = vrot.slane %v2141_v23, 7  ;;  %v6422_v21 = vld [vmem:[%s8592_s6 + $0x354] ss:$8 sps:$4 sm:$0xff]  }
 0x213   : > { %v2143_v27 = vor.u32 %v2141_v23, %v2140_v24  ;;  %v2158_v28 = vor.u32 %v2157_v26, %v2156_v25  ;;  %v7784_v23 = vpop.f32.mrb[0].mxu1  ;;  %v6417_v24 = vld [vmem:[%s8592_s6 + $0x30] ss:$8 sps:$4 sm:$0xff]   ;;  %v6425_v26 = vld [vmem:[%s8592_s6 + $0x44] ss:$8 sps:$4 sm:$0xff]  }
 0x214   : > { %v6420_v25 = vld [vmem:[%s8592_s6 + $0x350] ss:$8 sps:$4 sm:$0xff]  }
 0x215   : > { %v2154_v30 = vsel %vm2152_vm5, %v2143_v27, %v2153_v18  ;;  %v2159_v31 = vrot.slane %v2158_v28, 2  ;;  %v7795_v18 = vpop.f32.mrb[1].mxu1  ;;  %v6428_v27 = vld [vmem:[%s8592_s6 + $0x364] ss:$8 sps:$4 sm:$0xff]  }
 0x216   : > { %2155 = vst [vmem:[#allocation2 + $0x4] sm:$0xf] %v2154_v30  ;;  %v2118_v28 = vpop.f32.mrb[2].mxu1  ;;  %v6423_v30 = vld [vmem:[%s8592_s6 + $0x40] ss:$8 sps:$4 sm:$0xff]  }
 0x217   : > { %v2163_v32 = vsel %vm2152_vm5, %v2159_v31, %v2162_v29  ;;  %v2119_v29 = vpop.f32.mrb[3].mxu1  ;;  %v6426_v31 = vld [vmem:[%s8592_s6 + $0x360] ss:$8 sps:$4 sm:$0xff]   ;;  %v6494_v28 = vld [vmem:[%s8592_s6 + $0x414] ss:$8 sps:$4 sm:$0xff]  }
 0x218   : > { %2164 = vst [vmem:[#allocation2 + $0x8] sm:$0xf] %v2163_v32  ;;  %v6431_v32 = vld [vmem:[%s8592_s6 + $0x54] ss:$8 sps:$4 sm:$0xff]   ;;  %v6489_v29 = vld [vmem:[%s8592_s6 + $0xf0] ss:$8 sps:$4 sm:$0xff]  }
 0x21d   : > { %v7705_v36 = vld.sshfl [vmem:[#allocation2 + $0x4] sm:$0x30 pattern:$0x75316420] }
 0x21e   : > { %v5476_v38 = vcombine.high %v5442_v34, %v7705_v36  ;;  %v5509_v39 = vld.sshfl [vmem:[#allocation2 + $0x4] sm:$0x3 pattern:$0x75316420]  ;;  %v6429_v34 = vld [vmem:[%s8592_s6 + $0x50] ss:$8 sps:$4 sm:$0xff]  }
 0x21f   : > { %v7708_v40 = vld.sshfl [vmem:[#allocation2 + $0x8] sm:$0x3 pattern:$0x75316420]  ;;  %v2512_v49 = vcombine.low %v5340_v37, %v5509_v39  ;;  %v6437_v37 = vld [vmem:[%s8592_s6 + $0x64] ss:$8 sps:$4 sm:$0xff]  }
 0x220   : > { %v2798_v43 = vrot.slane %v5476_v38, %v6978_v22  ;;  %v3070_v44 = vcombine.low %v5509_v39, %v7708_v40  ;;  %v5343_v45 = vld.sshfl [vmem:[#allocation2 + $0x4] sm:$0x33 pattern:$0x75316420]  ;;  %v6435_v39 = vld [vmem:[%s8592_s6 + $0x60] ss:$8 sps:$4 sm:$0xff]  }
 0x221   : > { %v2234_v46 = vcombine.high %v5343_v45, %v5343_v45  ;;  %v2245_v51 = vshrl.u32 %v5343_v45, 16  ;;  %v7734_v62 = vrot.slane %v2512_v49, %v6978_v22  ;;  %v6440_v38 = vld [vmem:[%s8592_s6 + $0x384] ss:$8 sps:$4 sm:$0xff]   ;;  %v6444_v45 = vld [vmem:[%s8592_s6 + $0x390] ss:$8 sps:$4 sm:$0xff]  }
 0x222   : > { %v2799_v47 = vcombine.high %v2798_v43, %v2798_v43  ;;  %v7713_v48 = vrot.slane %v3070_v44, %v6978_v22  ;;  %v2806_v55 = vrot.slane %v2798_v43, %v6978_v22  ;;  %v6446_v43 = vld [vmem:[%s8592_s6 + $0x394] ss:$8 sps:$4 sm:$0xff]   ;;  %v6441_v44 = vld [vmem:[%s8592_s6 + $0x70] ss:$8 sps:$4 sm:$0xff]   ;;  %v6447_v49 = vld [vmem:[%s8592_s6 + $0x80] ss:$8 sps:$4 sm:$0xff]  }
 0x223   : > { %v2250_v52 = vshll.u32 %v2234_v46, 16  ;;  %v2520_v9 = vcombine.high %v7734_v62, %v7734_v62  ;;  %v6449_v46 = vld [vmem:[%s8592_s6 + $0x84] ss:$8 sps:$4 sm:$0xff]  }
 0x224   : > { %v2813_v2 = vrot.slane %v2799_v47, %v6978_v22  ;;  %v3078_v54 = vcombine.high %v7713_v48, %v7713_v48  ;;  %v6452_v47 = vld [vmem:[%s8592_s6 + $0x3a4] ss:$8 sps:$4 sm:$0xff]  }
 0x225   : > { %v7729_v58 = vsel %vm7080_vm14, %v2245_v51, %v2250_v52  ;;  %v2534_v11 = vrot.slane %v2520_v9, %v6978_v22  ;;  %v6455_v51 = vld [vmem:[%s8592_s6 + $0x94] ss:$8 sps:$4 sm:$0xff]  }
 0x226   : > { %3008 = vmatprep.mubr.bf16.mxu1 %v2813_v2  ;;  %v3092_v60 = vrot.slane %v3078_v54, %v6978_v22  ;;  %v2286_v61 = vcombine.low %v2243_v50, %v7729_v58  ;;  %v6450_v50 = vld [vmem:[%s8592_s6 + $0x3a0] ss:$8 sps:$4 sm:$0xff]   ;;  %v6458_v52 = vld [vmem:[%s8592_s6 + $0x3b4] ss:$8 sps:$4 sm:$0xff]   ;;  %v6456_v54 = vld [vmem:[%s8592_s6 + $0x3b0] ss:$8 sps:$4 sm:$0xff]  }
 0x227   : > { %3009 = vmatmul.mubr.bf16.vlgmr.msra.gmra.mrb[4].mxu1 %v2806_v55  ;;  %v5576_v2 = vld.sshfl [vmem:[#allocation2 + $0x8] sm:$0x33 pattern:$0x75316420]  ;;  %v6461_v55 = vld [vmem:[%s8592_s6 + $0xa4] ss:$8 sps:$4 sm:$0xff]  }
 0x228   : > { %3256 = vmatpush1.bf16.msra.mxu1 %v6390_v53  ;;  %3287 = vmatprep.mubr.bf16.mxu1 %v3092_v60  ;;  %v2293_v1 = vrot.slane %v2286_v61, %v6978_v22  ;;  %v6453_v53 = vld [vmem:[%s8592_s6 + $0x90] ss:$8 sps:$4 sm:$0xff]   ;;  %v6464_v60 = vld [vmem:[%s8592_s6 + $0x3c4] ss:$8 sps:$4 sm:$0xff]   ;;  %v6459_v61 = vld [vmem:[%s8592_s6 + $0xa0] ss:$8 sps:$4 sm:$0xff]  }
 0x229   : > { %3257 = vmatprep.subr.bf16.mxu1 %v6398_v56  ;;  %v3317_v56 = vcombine.high %v5576_v2, %v5576_v2  ;;  %v3328_v9 = vshrl.u32 %v5576_v2, 16  ;;  %v6522_v2 = vld [vmem:[%s8592_s6 + $0x4b0] ss:$8 sps:$4 sm:$0xff]  }
 0x22a   : > { %v2294_v4 = vcombine.high %v2293_v1, %v2293_v1  ;;  %v2301_v7 = vrot.slane %v2293_v1, %v6978_v22  ;;  %v6467_v1 = vld [vmem:[%s8592_s6 + $0xb4] ss:$8 sps:$4 sm:$0xff]  }
 0x22c   : > { %v2308_v5 = vrot.slane %v2294_v4, %v6978_v22  ;;  %3258 = vmatpush1.bf16.msra.mxu1 %v6396_v63  ;;  %v6462_v63 = vld [vmem:[%s8592_s6 + $0x3c0] ss:$8 sps:$4 sm:$0xff]   ;;  %v6470_v4 = vld [vmem:[%s8592_s6 + $0x3d4] ss:$8 sps:$4 sm:$0xff]  }
 0x22d   : > { %3259 = vmatprep.subr.bf16.mxu1 %v6404_v3  ;;  %v3333_v3 = vshll.u32 %v3317_v56, 16  ;;  %v8023_v56 = vld.sshfl [vmem:[#allocation2 + $0x8] sm:$0x30 pattern:$0x75316420] }
 0x22e   : > { %2503 = vmatprep.mubr.bf16.mxu0 %v2308_v5  ;;  %v6465_v5 = vld [vmem:[%s8592_s6 + $0xb0] ss:$8 sps:$4 sm:$0xff]  }
 0x22f   : > { %2504 = vmatmul.mubr.bf16.vlgmr.msra.gmra.mrb[4].mxu0 %v2301_v7  ;;  %v6473_v7 = vld [vmem:[%s8592_s6 + $0xc4] ss:$8 sps:$4 sm:$0xff]  }
 0x230   : > { %2698 = vmatpush1.bf16.msra.mxu0 %v6399_v6  ;;  %2729 = vmatprep.mubr.bf16.mxu0 %v2534_v11  ;;  %v6468_v6 = vld [vmem:[%s8592_s6 + $0x3d0] ss:$8 sps:$4 sm:$0xff]   ;;  %v6471_v11 = vld [vmem:[%s8592_s6 + $0xc0] ss:$8 sps:$4 sm:$0xff]  }
 0x231   : > { %2699 = vmatprep.subr.bf16.mxu0 %v6407_v10  ;;  %3260 = vmatpush1.bf16.msra.mxu1 %v6402_v8  ;;  %v7895_v8 = vsel %vm7080_vm14, %v3328_v9, %v3333_v3  ;;  %v6476_v10 = vld [vmem:[%s8592_s6 + $0x3e4] ss:$8 sps:$4 sm:$0xff]   ;;  %v6536_v3 = vld [vmem:[%s8592_s6 + $0x4f4] ss:$8 sps:$4 sm:$0xff]   ;;  %v6534_v9 = vld [vmem:[%s8592_s6 + $0x4f0] ss:$8 sps:$4 sm:$0xff]  }
 0x232   : > { %3261 = vmatprep.subr.bf16.mxu1 %v6410_v12  ;;  %v3369_v12 = vcombine.low %v7729_v58, %v7895_v8  ;;  %v6477_v58 = vld [vmem:[%s8592_s6 + $0xd0] ss:$8 sps:$4 sm:$0xff]  }
 0x234   : > { %2700 = vmatpush1.bf16.msra.mxu0 %v6405_v13  ;;  %v6474_v13 = vld [vmem:[%s8592_s6 + $0x3e0] ss:$8 sps:$4 sm:$0xff]  }
 0x235   : > { %2701 = vmatprep.subr.bf16.mxu0 %v6413_v15  ;;  %3262 = vmatpush1.bf16.msra.mxu1 %v6408_v14  ;;  %v6479_v14 = vld [vmem:[%s8592_s6 + $0xd4] ss:$8 sps:$4 sm:$0xff]  }
 0x236   : > { %3263 = vmatprep.subr.bf16.mxu1 %v6416_v16  ;;  %v6482_v15 = vld [vmem:[%s8592_s6 + $0x3f4] ss:$8 sps:$4 sm:$0xff]   ;;  %v7918_v16 = vrot.slane %v3369_v12, %v6978_v22  ;;  %v6540_v12 = vld [vmem:[%s8592_s6 + $0x510] ss:$8 sps:$4 sm:$0xff]  }
 0x238   : > { %2702 = vmatpush1.bf16.msra.mxu0 %v6411_v17  ;;  %v6480_v17 = vld [vmem:[%s8592_s6 + $0x3f0] ss:$8 sps:$4 sm:$0xff]  }
 0x239   : > { %2703 = vmatprep.subr.bf16.mxu0 %v6419_v20  ;;  %3264 = vmatpush1.bf16.msra.mxu1 %v6414_v19  ;;  %v6485_v19 = vld [vmem:[%s8592_s6 + $0xe4] ss:$8 sps:$4 sm:$0xff]  }
 0x23a   : > { %3265 = vmatprep.subr.bf16.mxu1 %v6422_v21  ;;  %v6488_v20 = vld [vmem:[%s8592_s6 + $0x404] ss:$8 sps:$4 sm:$0xff]   ;;  %v6483_v21 = vld [vmem:[%s8592_s6 + $0xe0] ss:$8 sps:$4 sm:$0xff]  }
 0x23c   : > { %2704 = vmatpush1.bf16.msra.mxu0 %v6417_v24  ;;  %v3377_v24 = vcombine.high %v7918_v16, %v7918_v16 }
 0x23d   : > { %2705 = vmatprep.subr.bf16.mxu0 %v6425_v26  ;;  %3266 = vmatpush1.bf16.msra.mxu1 %v6420_v25  ;;  %v6486_v25 = vld [vmem:[%s8592_s6 + $0x400] ss:$8 sps:$4 sm:$0xff]   ;;  %v6491_v26 = vld [vmem:[%s8592_s6 + $0xf4] ss:$8 sps:$4 sm:$0xff]  }
 0x23e   : > { %3267 = vmatprep.subr.bf16.mxu1 %v6428_v27  ;;  %v3085_v27 = vrot.slane %v7713_v48, %v6978_v22  ;;  %v6497_v48 = vld [vmem:[%s8592_s6 + $0x424] ss:$8 sps:$4 sm:$0xff]  }
 0x240   : > { %2706 = vmatpush1.bf16.msra.mxu0 %v6423_v30  ;;  %v3391_v30 = vrot.slane %v3377_v24, %v6978_v22  ;;  %v6555_v24 = vld [vmem:[%s8592_s6 + $0x560] ss:$8 sps:$4 sm:$0xff]  }
 0x241   : > { %2707 = vmatprep.subr.bf16.mxu0 %v6431_v32  ;;  %3268 = vmatpush1.bf16.msra.mxu1 %v6426_v31  ;;  %v6492_v31 = vld [vmem:[%s8592_s6 + $0x410] ss:$8 sps:$4 sm:$0xff]   ;;  %v2527_v32 = vrot.slane %v7734_v62, %v6978_v22  ;;  %v6503_v62 = vld [vmem:[%s8592_s6 + $0x444] ss:$8 sps:$4 sm:$0xff]  }
 0x242   : > { %3269 = vmatprep.subr.bf16.mxu1 %v6434_v33  ;;  %v6495_v33 = vld [vmem:[%s8592_s6 + $0x420] ss:$8 sps:$4 sm:$0xff]  }
 0x244   : > { %2708 = vmatpush1.bf16.msra.mxu0 %v6429_v34  ;;  %v6500_v34 = vld [vmem:[%s8592_s6 + $0x434] ss:$8 sps:$4 sm:$0xff]  }
 0x245   : > { %2709 = vmatprep.subr.bf16.mxu0 %v6437_v37  ;;  %3270 = vmatpush1.bf16.msra.mxu1 %v6432_v35  ;;  %v6498_v35 = vld [vmem:[%s8592_s6 + $0x430] ss:$8 sps:$4 sm:$0xff]   ;;  %v6501_v37 = vld [vmem:[%s8592_s6 + $0x440] ss:$8 sps:$4 sm:$0xff]  }
 0x246   : > { %3271 = vmatprep.subr.bf16.mxu1 %v6440_v38  ;;  %v6506_v38 = vld [vmem:[%s8592_s6 + $0x454] ss:$8 sps:$4 sm:$0xff]  }
 0x248   : > { %2710 = vmatpush1.bf16.msra.mxu0 %v6435_v39  ;;  %v6504_v39 = vld [vmem:[%s8592_s6 + $0x450] ss:$8 sps:$4 sm:$0xff]  }
 0x249   : > { %2711 = vmatprep.subr.bf16.mxu0 %v6443_v42  ;;  %3272 = vmatpush1.bf16.msra.mxu1 %v6438_v41  ;;  %v6509_v41 = vld [vmem:[%s8592_s6 + $0x464] ss:$8 sps:$4 sm:$0xff]   ;;  %v6507_v42 = vld [vmem:[%s8592_s6 + $0x460] ss:$8 sps:$4 sm:$0xff]  }
 0x24a   : > { %3273 = vmatprep.subr.bf16.mxu1 %v6446_v43  ;;  %v6512_v43 = vld [vmem:[%s8592_s6 + $0x474] ss:$8 sps:$4 sm:$0xff]  }
 0x24c   : > { %2712 = vmatpush1.bf16.msra.mxu0 %v6441_v44  ;;  %v6510_v44 = vld [vmem:[%s8592_s6 + $0x470] ss:$8 sps:$4 sm:$0xff]  }
 0x24d   : > { %2713 = vmatprep.subr.bf16.mxu0 %v6449_v46  ;;  %3274 = vmatpush1.bf16.msra.mxu1 %v6444_v45  ;;  %v6515_v45 = vld [vmem:[%s8592_s6 + $0x484] ss:$8 sps:$4 sm:$0xff]   ;;  %v6513_v46 = vld [vmem:[%s8592_s6 + $0x480] ss:$8 sps:$4 sm:$0xff]  }
 0x24e   : > { %3275 = vmatprep.subr.bf16.mxu1 %v6452_v47  ;;  %v6518_v47 = vld [vmem:[%s8592_s6 + $0x494] ss:$8 sps:$4 sm:$0xff]  }
 0x250   : > { %2714 = vmatpush1.bf16.msra.mxu0 %v6447_v49  ;;  %v6516_v49 = vld [vmem:[%s8592_s6 + $0x490] ss:$8 sps:$4 sm:$0xff]  }
 0x251   : > { %2715 = vmatprep.subr.bf16.mxu0 %v6455_v51  ;;  %3276 = vmatpush1.bf16.msra.mxu1 %v6450_v50  ;;  %v6521_v50 = vld [vmem:[%s8592_s6 + $0x4a4] ss:$8 sps:$4 sm:$0xff]   ;;  %v6519_v51 = vld [vmem:[%s8592_s6 + $0x4a0] ss:$8 sps:$4 sm:$0xff]  }
 0x252   : > { %3277 = vmatprep.subr.bf16.mxu1 %v6458_v52  ;;  %v6524_v52 = vld [vmem:[%s8592_s6 + $0x4b4] ss:$8 sps:$4 sm:$0xff]  }
 0x254   : > { %2716 = vmatpush1.bf16.msra.mxu0 %v6453_v53  ;;  %v6527_v53 = vld [vmem:[%s8592_s6 + $0x4c4] ss:$8 sps:$4 sm:$0xff]  }
 0x255   : > { %2717 = vmatprep.subr.bf16.mxu0 %v6461_v55  ;;  %3278 = vmatpush1.bf16.msra.mxu1 %v6456_v54  ;;  %v6525_v54 = vld [vmem:[%s8592_s6 + $0x4c0] ss:$8 sps:$4 sm:$0xff]   ;;  %v6530_v55 = vld [vmem:[%s8592_s6 + $0x4d4] ss:$8 sps:$4 sm:$0xff]  }
 0x256   : > { %3279 = vmatprep.subr.bf16.mxu1 %v6464_v60  ;;  %v6528_v60 = vld [vmem:[%s8592_s6 + $0x4d0] ss:$8 sps:$4 sm:$0xff]  }
 0x258   : > { %2718 = vmatpush1.bf16.msra.mxu0 %v6459_v61  ;;  %v6533_v61 = vld [vmem:[%s8592_s6 + $0x4e4] ss:$8 sps:$4 sm:$0xff]  }
 0x259   : > { %2719 = vmatprep.subr.bf16.mxu0 %v6467_v1  ;;  %3280 = vmatpush1.bf16.msra.mxu1 %v6462_v63  ;;  %v5677_v63 = vcombine.high %v7705_v36, %v8023_v56  ;;  %v6531_v1 = vld [vmem:[%s8592_s6 + $0x4e0] ss:$8 sps:$4 sm:$0xff]   ;;  %v6539_v36 = vld [vmem:[%s8592_s6 + $0x504] ss:$8 sps:$4 sm:$0xff]  }
 0x25a   : > { %3281 = vmatprep.subr.bf16.mxu1 %v6470_v4 }
 0x25b   : > { %v8040_v4 = vrot.slane %v5677_v63, %v6978_v22  ;;  %v6602_v63 = vld [vmem:[%s8592_s6 + $0x654] ss:$8 sps:$4 sm:$0xff]  }
 0x25c   : > { %2720 = vmatpush1.bf16.msra.mxu0 %v6465_v5 }
 0x25d   : > { %2721 = vmatprep.subr.bf16.mxu0 %v6473_v7  ;;  %3282 = vmatpush1.bf16.msra.mxu1 %v6468_v6  ;;  %v3658_v5 = vcombine.high %v8040_v4, %v8040_v4  ;;  %v6537_v6 = vld [vmem:[%s8592_s6 + $0x500] ss:$8 sps:$4 sm:$0xff]   ;;  %v3384_v7 = vrot.slane %v7918_v16, %v6978_v22  ;;  %v6551_v16 = vld [vmem:[%s8592_s6 + $0x544] ss:$8 sps:$4 sm:$0xff]  }
 0x25e   : > { %3283 = vmatprep.subr.bf16.mxu1 %v6476_v10  ;;  %v6542_v10 = vld [vmem:[%s8592_s6 + $0x514] ss:$8 sps:$4 sm:$0xff]  }
 0x260   : > { %2722 = vmatpush1.bf16.msra.mxu0 %v6471_v11  ;;  %v3672_v11 = vrot.slane %v3658_v5, %v6978_v22  ;;  %v6611_v5 = vld [vmem:[%s8592_s6 + $0x684] ss:$8 sps:$4 sm:$0xff]  }
 0x261   : > { %2723 = vmatprep.subr.bf16.mxu0 %v6479_v14  ;;  %3284 = vmatpush1.bf16.msra.mxu1 %v6474_v13  ;;  %v6545_v13 = vld [vmem:[%s8592_s6 + $0x524] ss:$8 sps:$4 sm:$0xff]   ;;  %v6543_v14 = vld [vmem:[%s8592_s6 + $0x520] ss:$8 sps:$4 sm:$0xff]  }
 0x262   : > { %3285 = vmatprep.subr.bf16.mxu1 %v6482_v15  ;;  %v6548_v15 = vld [vmem:[%s8592_s6 + $0x534] ss:$8 sps:$4 sm:$0xff]  }
 0x264   : > { %2724 = vmatpush1.bf16.msra.mxu0 %v6477_v58  ;;  %v6546_v58 = vld [vmem:[%s8592_s6 + $0x530] ss:$8 sps:$4 sm:$0xff]  }
 0x265   : > { %2725 = vmatprep.subr.bf16.mxu0 %v6485_v19  ;;  %3286 = vmatpush1.bf16.msra.mxu1 %v6480_v17  ;;  %v6549_v17 = vld [vmem:[%s8592_s6 + $0x540] ss:$8 sps:$4 sm:$0xff]   ;;  %v6554_v19 = vld [vmem:[%s8592_s6 + $0x554] ss:$8 sps:$4 sm:$0xff]  }
 0x266   : > { %3554 = vmatprep.subr.bf16.mxu1 %v6488_v20  ;;  %v6552_v20 = vld [vmem:[%s8592_s6 + $0x550] ss:$8 sps:$4 sm:$0xff]  }
 0x268   : > { %2726 = vmatpush1.bf16.msra.mxu0 %v6483_v21  ;;  %3288 = vmatmul.mubr.bf16.vlgmr.msra.gmra.mrb[4].mxu1 %v3085_v27  ;;  %v6557_v21 = vld [vmem:[%s8592_s6 + $0x564] ss:$8 sps:$4 sm:$0xff]  }
 0x269   : > { %2727 = vmatprep.subr.bf16.mxu0 %v6491_v26  ;;  %3555 = vmatpush1.bf16.msra.mxu1 %v6486_v25  ;;  %v6560_v25 = vld [vmem:[%s8592_s6 + $0x574] ss:$8 sps:$4 sm:$0xff]   ;;  %v6558_v26 = vld [vmem:[%s8592_s6 + $0x570] ss:$8 sps:$4 sm:$0xff]   ;;  %v6563_v27 = vld [vmem:[%s8592_s6 + $0x584] ss:$8 sps:$4 sm:$0xff]  }
 0x26a   : > { %3586 = vmatprep.mubr.bf16.mxu1 %v3391_v30  ;;  %3556 = vmatprep.subr.bf16.mxu1 %v6494_v28  ;;  %v6561_v28 = vld [vmem:[%s8592_s6 + $0x580] ss:$8 sps:$4 sm:$0xff]   ;;  %v6564_v30 = vld [vmem:[%s8592_s6 + $0x590] ss:$8 sps:$4 sm:$0xff]  }
 0x26c   : > { %2728 = vmatpush1.bf16.msra.mxu0 %v6489_v29  ;;  %v6566_v29 = vld [vmem:[%s8592_s6 + $0x594] ss:$8 sps:$4 sm:$0xff]  }
 0x26d   : > { %3557 = vmatpush1.bf16.msra.mxu1 %v6492_v31  ;;  %v6569_v31 = vld [vmem:[%s8592_s6 + $0x5a4] ss:$8 sps:$4 sm:$0xff]  }
 0x26e   : > { %3558 = vmatprep.subr.bf16.mxu1 %v6497_v48  ;;  %v6567_v48 = vld [vmem:[%s8592_s6 + $0x5a0] ss:$8 sps:$4 sm:$0xff]  }
 0x26f   : > { %2730 = vmatmul.mubr.bf16.vlgmr.msra.gmra.mrb[4].mxu0 %v2527_v32  ;;  %v6572_v32 = vld [vmem:[%s8592_s6 + $0x5b4] ss:$8 sps:$4 sm:$0xff]  }
 0x271   : > { %3559 = vmatpush1.bf16.msra.mxu1 %v6495_v33  ;;  %v6570_v33 = vld [vmem:[%s8592_s6 + $0x5b0] ss:$8 sps:$4 sm:$0xff]  }
 0x272   : > { %3560 = vmatprep.subr.bf16.mxu1 %v6500_v34  ;;  %v6575_v34 = vld [vmem:[%s8592_s6 + $0x5c4] ss:$8 sps:$4 sm:$0xff]  }
 0x275   : > { %3561 = vmatpush1.bf16.msra.mxu1 %v6498_v35  ;;  %v6573_v35 = vld [vmem:[%s8592_s6 + $0x5c0] ss:$8 sps:$4 sm:$0xff]  }
 0x276   : > { %3562 = vmatprep.subr.bf16.mxu1 %v6503_v62  ;;  %v6578_v62 = vld [vmem:[%s8592_s6 + $0x5d4] ss:$8 sps:$4 sm:$0xff]  }
 0x279   : > { %3563 = vmatpush1.bf16.msra.mxu1 %v6501_v37  ;;  %v5711_v37 = vld.sshfl [vmem:[#allocation2 + $0xc] sm:$0x3 pattern:$0x75316420] }
 0x27a   : > { %3564 = vmatprep.subr.bf16.mxu1 %v6506_v38  ;;  %v6576_v38 = vld [vmem:[%s8592_s6 + $0x5d0] ss:$8 sps:$4 sm:$0xff]  }
 0x27d   : > { %3565 = vmatpush1.bf16.msra.mxu1 %v6504_v39  ;;  %v6581_v39 = vld [vmem:[%s8592_s6 + $0x5e4] ss:$8 sps:$4 sm:$0xff]  }
 0x27e   : > { %3566 = vmatprep.subr.bf16.mxu1 %v6509_v41  ;;  %v3929_v41 = vcombine.low %v7708_v40, %v5711_v37  ;;  %v6587_v40 = vld [vmem:[%s8592_s6 + $0x604] ss:$8 sps:$4 sm:$0xff]  }
 0x27f   : > { %v6731_v37 = vld [vmem:[%s8595_s9 + $0x48] sm:$0xff]  }
 0x281   : > { %3567 = vmatpush1.bf16.msra.mxu1 %v6507_v42  ;;  %v6579_v42 = vld [vmem:[%s8592_s6 + $0x5e0] ss:$8 sps:$4 sm:$0xff]  }
 0x282   : > { %3568 = vmatprep.subr.bf16.mxu1 %v6512_v43  ;;  %v6584_v43 = vld [vmem:[%s8592_s6 + $0x5f4] ss:$8 sps:$4 sm:$0xff]  }
 0x285   : > { %3569 = vmatpush1.bf16.msra.mxu1 %v6510_v44  ;;  %v8145_v44 = vrot.slane %v3929_v41, %v6978_v22  ;;  %v6732_v41 = vld [vmem:[%s8595_s9 + $0x8] sm:$0xff]  }
 0x286   : > { %3570 = vmatprep.subr.bf16.mxu1 %v6515_v45  ;;  %v6582_v45 = vld [vmem:[%s8592_s6 + $0x5f0] ss:$8 sps:$4 sm:$0xff]  }
 0x289   : > { %3571 = vmatpush1.bf16.msra.mxu1 %v6513_v46  ;;  %v3937_v46 = vcombine.high %v8145_v44, %v8145_v44 }
 0x28a   : > { %3572 = vmatprep.subr.bf16.mxu1 %v6518_v47  ;;  %v6585_v47 = vld [vmem:[%s8592_s6 + $0x600] ss:$8 sps:$4 sm:$0xff]  }
 0x28d   : > { %3573 = vmatpush1.bf16.msra.mxu1 %v6516_v49  ;;  %v3665_v49 = vrot.slane %v8040_v4, %v6978_v22  ;;  %v6603_v4 = vld [vmem:[%s8592_s6 + $0x660] ss:$8 sps:$4 sm:$0xff]  }
 0x28e   : > { %3574 = vmatprep.subr.bf16.mxu1 %v6521_v50  ;;  %v6590_v50 = vld [vmem:[%s8592_s6 + $0x614] ss:$8 sps:$4 sm:$0xff]  }
 0x291   : > { %3575 = vmatpush1.bf16.msra.mxu1 %v6519_v51  ;;  %v3951_v51 = vrot.slane %v3937_v46, %v6978_v22  ;;  %v6642_v46 = vld [vmem:[%s8592_s6 + $0x730] ss:$8 sps:$4 sm:$0xff]  }
 0x292   : > { %3576 = vmatprep.subr.bf16.mxu1 %v6524_v52  ;;  %v6588_v52 = vld [vmem:[%s8592_s6 + $0x610] ss:$8 sps:$4 sm:$0xff]  }
 0x295   : > { %3577 = vmatpush1.bf16.msra.mxu1 %v6522_v2  ;;  %v6593_v2 = vld [vmem:[%s8592_s6 + $0x624] ss:$8 sps:$4 sm:$0xff]  }
 0x296   : > { %3578 = vmatprep.subr.bf16.mxu1 %v6527_v53  ;;  %v6591_v53 = vld [vmem:[%s8592_s6 + $0x620] ss:$8 sps:$4 sm:$0xff]  }
 0x299   : > { %3579 = vmatpush1.bf16.msra.mxu1 %v6525_v54  ;;  %v6596_v54 = vld [vmem:[%s8592_s6 + $0x634] ss:$8 sps:$4 sm:$0xff]  }
 0x29a   : > { %3580 = vmatprep.subr.bf16.mxu1 %v6530_v55  ;;  %v6594_v55 = vld [vmem:[%s8592_s6 + $0x630] ss:$8 sps:$4 sm:$0xff]  }
 0x29d   : > { %3581 = vmatpush1.bf16.msra.mxu1 %v6528_v60  ;;  %v6599_v60 = vld [vmem:[%s8592_s6 + $0x644] ss:$8 sps:$4 sm:$0xff]  }
 0x29e   : > { %3582 = vmatprep.subr.bf16.mxu1 %v6533_v61  ;;  %v6597_v61 = vld [vmem:[%s8592_s6 + $0x640] ss:$8 sps:$4 sm:$0xff]  }
 0x2a1   : > { %3583 = vmatpush1.bf16.msra.mxu1 %v6531_v1  ;;  %v6600_v1 = vld [vmem:[%s8592_s6 + $0x650] ss:$8 sps:$4 sm:$0xff]  }
 0x2a2   : > { %3584 = vmatprep.subr.bf16.mxu1 %v6536_v3  ;;  %v6605_v3 = vld [vmem:[%s8592_s6 + $0x664] ss:$8 sps:$4 sm:$0xff]  }
 0x2a5   : > { %3585 = vmatpush1.bf16.msra.mxu1 %v6534_v9  ;;  %v6608_v9 = vld [vmem:[%s8592_s6 + $0x674] ss:$8 sps:$4 sm:$0xff]  }
 0x2a6   : > { %3835 = vmatprep.subr.bf16.mxu1 %v6539_v36  ;;  %v6606_v36 = vld [vmem:[%s8592_s6 + $0x670] ss:$8 sps:$4 sm:$0xff]  }
 0x2a8   : > { %3587 = vmatmul.mubr.bf16.vlgmr.msra.gmra.mrb[4].mxu1 %v3384_v7  ;;  %v6614_v7 = vld [vmem:[%s8592_s6 + $0x694] ss:$8 sps:$4 sm:$0xff]  }
 0x2a9   : > { %3836 = vmatpush1.bf16.msra.mxu1 %v6537_v6  ;;  %3867 = vmatprep.mubr.bf16.mxu1 %v3672_v11  ;;  %v6609_v6 = vld [vmem:[%s8592_s6 + $0x680] ss:$8 sps:$4 sm:$0xff]   ;;  %v6617_v11 = vld [vmem:[%s8592_s6 + $0x6a4] ss:$8 sps:$4 sm:$0xff]  }
 0x2aa   : > { %3837 = vmatprep.subr.bf16.mxu1 %v6542_v10  ;;  %v6612_v10 = vld [vmem:[%s8592_s6 + $0x690] ss:$8 sps:$4 sm:$0xff]  }
 0x2ad   : > { %3838 = vmatpush1.bf16.msra.mxu1 %v6540_v12  ;;  %v6615_v12 = vld [vmem:[%s8592_s6 + $0x6a0] ss:$8 sps:$4 sm:$0xff]  }
 0x2ae   : > { %3839 = vmatprep.subr.bf16.mxu1 %v6545_v13  ;;  %v5777_v13 = vld.sshfl [vmem:[#allocation2 + $0xc] sm:$0x33 pattern:$0x75316420] }
 0x2b1   : > { %3840 = vmatpush1.bf16.msra.mxu1 %v6543_v14  ;;  %v6620_v14 = vld [vmem:[%s8592_s6 + $0x6b4] ss:$8 sps:$4 sm:$0xff]  }
 0x2b2   : > { %3841 = vmatprep.subr.bf16.mxu1 %v6548_v15  ;;  %v4176_v15 = vcombine.high %v5777_v13, %v5777_v13 }
 0x2b5   : > { %3842 = vmatpush1.bf16.msra.mxu1 %v6546_v58  ;;  %v6618_v58 = vld [vmem:[%s8592_s6 + $0x6b0] ss:$8 sps:$4 sm:$0xff]  }
 0x2b6   : > { %3843 = vmatprep.subr.bf16.mxu1 %v6551_v16  ;;  %v6623_v16 = vld [vmem:[%s8592_s6 + $0x6c4] ss:$8 sps:$4 sm:$0xff]  }
 0x2b9   : > { %3844 = vmatpush1.bf16.msra.mxu1 %v6549_v17  ;;  %v4187_v17 = vshrl.u32 %v5777_v13, 16  ;;  %v6669_v13 = vld [vmem:[%s8592_s6 + $0x7c0] ss:$8 sps:$4 sm:$0xff]  }
 0x2ba   : > { %3845 = vmatprep.subr.bf16.mxu1 %v6554_v19  ;;  %v4192_v19 = vshll.u32 %v4176_v15, 16  ;;  %v5845_v15 = vld.sshfl [vmem:[#allocation2 + $0xc] sm:$0x30 pattern:$0x75316420] }
 0x2bd   : > { %3846 = vmatpush1.bf16.msra.mxu1 %v6552_v20  ;;  %v6621_v20 = vld [vmem:[%s8592_s6 + $0x6c0] ss:$8 sps:$4 sm:$0xff]  }
 0x2be   : > { %3847 = vmatprep.subr.bf16.mxu1 %v6557_v21  ;;  %v6626_v21 = vld [vmem:[%s8592_s6 + $0x6d4] ss:$8 sps:$4 sm:$0xff]  }
 0x2c1   : > { %3848 = vmatpush1.bf16.msra.mxu1 %v6555_v24  ;;  %v4194_v24 = vsel %vm7080_vm14, %v4187_v17, %v4192_v19  ;;  %v5878_v17 = vcombine.high %v8023_v56, %v5845_v15  ;;  %v6675_v19 = vld [vmem:[%s8592_s6 + $0x7e0] ss:$8 sps:$4 sm:$0xff]   ;;  %v6683_v56 = vld [vmem:[%s8592_s6 + $0x804] ss:$8 sps:$4 sm:$0xff]  }
 0x2c2   : > { %3849 = vmatprep.subr.bf16.mxu1 %v6560_v25  ;;  %v6624_v25 = vld [vmem:[%s8592_s6 + $0x6d0] ss:$8 sps:$4 sm:$0xff]  }
 0x2c5   : > { %3850 = vmatpush1.bf16.msra.mxu1 %v6558_v26  ;;  %v6629_v26 = vld [vmem:[%s8592_s6 + $0x6e4] ss:$8 sps:$4 sm:$0xff]  }
 0x2c6   : > { %3851 = vmatprep.subr.bf16.mxu1 %v6563_v27  ;;  %v4228_v27 = vcombine.low %v7895_v8, %v4194_v24  ;;  %v6635_v8 = vld [vmem:[%s8592_s6 + $0x704] ss:$8 sps:$4 sm:$0xff]   ;;  %v6678_v24 = vld [vmem:[%s8592_s6 + $0x7f0] ss:$8 sps:$4 sm:$0xff]  }
 0x2c9   : > { %3852 = vmatpush1.bf16.msra.mxu1 %v6561_v28  ;;  %v6627_v28 = vld [vmem:[%s8592_s6 + $0x6e0] ss:$8 sps:$4 sm:$0xff]  }
 0x2ca   : > { %3853 = vmatprep.subr.bf16.mxu1 %v6566_v29  ;;  %v8252_v29 = vrot.slane %v4228_v27, %v6978_v22 }
 0x2cc   : > { %v4243_v27 = vrot.slane %v8252_v29, %v6978_v22 }
 0x2cd   : > { %3854 = vmatpush1.bf16.msra.mxu1 %v6564_v30  ;;  %v6630_v30 = vld [vmem:[%s8592_s6 + $0x6f0] ss:$8 sps:$4 sm:$0xff]  }
 0x2ce   : > { %3855 = vmatprep.subr.bf16.mxu1 %v6569_v31  ;;  %v4236_v31 = vcombine.high %v8252_v29, %v8252_v29  ;;  %v6687_v29 = vld [vmem:[%s8592_s6 + $0x820] ss:$8 sps:$4 sm:$0xff]  }
 0x2d1   : > { %3856 = vmatpush1.bf16.msra.mxu1 %v6567_v48  ;;  %v6633_v48 = vld [vmem:[%s8592_s6 + $0x700] ss:$8 sps:$4 sm:$0xff]  }
 0x2d2   : > { %3857 = vmatprep.subr.bf16.mxu1 %v6572_v32  ;;  %v3944_v32 = vrot.slane %v8145_v44, %v6978_v22  ;;  %v6644_v44 = vld [vmem:[%s8592_s6 + $0x734] ss:$8 sps:$4 sm:$0xff]  }
 0x2d5   : > { %3858 = vmatpush1.bf16.msra.mxu1 %v6570_v33  ;;  %v6638_v33 = vld [vmem:[%s8592_s6 + $0x714] ss:$8 sps:$4 sm:$0xff]  }
 0x2d6   : > { %3859 = vmatprep.subr.bf16.mxu1 %v6575_v34  ;;  %v4250_v34 = vrot.slane %v4236_v31, %v6978_v22  ;;  %v6692_v31 = vld [vmem:[%s8592_s6 + $0x834] ss:$8 sps:$4 sm:$0xff]  }
 0x2d9   : > { %3860 = vmatpush1.bf16.msra.mxu1 %v6573_v35  ;;  %v6729_v35 = vld [vmem:[%s8595_s9 + $0x40] sm:$0xff]  }
 0x2da   : > { %3861 = vmatprep.subr.bf16.mxu1 %v6578_v62  ;;  %v6730_v62 = vld [vmem:[%s8595_s9] sm:$0xff]   ;;  %5930 = vmatprep.subr.bf16.mxu0 %v6729_v35  ;;  %v6696_v35 = vld [vmem:[%s8592_s6 + $0x850] ss:$8 sps:$4 sm:$0xff]  }
 0x2db   : > { %5931 = vmatpush3.bf16.msra.mxu0 %v6730_v62  ;;  %v6701_v62 = vld [vmem:[%s8592_s6 + $0x864] ss:$8 sps:$4 sm:$0xff]  }
 0x2dc   : > { %5932 = vmatprep.subr.bf16.mxu0 %v6731_v37  ;;  %v6699_v37 = vld [vmem:[%s8592_s6 + $0x860] ss:$8 sps:$4 sm:$0xff]  }
 0x2dd   : > { %3862 = vmatpush1.bf16.msra.mxu1 %v6576_v38  ;;  %v6636_v38 = vld [vmem:[%s8592_s6 + $0x710] ss:$8 sps:$4 sm:$0xff]  }
 0x2de   : > { %3863 = vmatprep.subr.bf16.mxu1 %v6581_v39  ;;  %v6641_v39 = vld [vmem:[%s8592_s6 + $0x724] ss:$8 sps:$4 sm:$0xff]  }
 0x2df   : > { %5933 = vmatpush3.bf16.msra.mxu0 %v6732_v41  ;;  %v6707_v41 = vld [vmem:[%s8592_s6 + $0x884] ss:$8 sps:$4 sm:$0xff]  }
 0x2e1   : > { %3864 = vmatpush1.bf16.msra.mxu1 %v6579_v42  ;;  %v6733_v42 = vld [vmem:[%s8595_s9 + $0x50] sm:$0xff]  }
 0x2e2   : > { %3865 = vmatprep.subr.bf16.mxu1 %v6584_v43  ;;  %v6639_v43 = vld [vmem:[%s8592_s6 + $0x720] ss:$8 sps:$4 sm:$0xff]   ;;  %5934 = vmatprep.subr.bf16.mxu0 %v6733_v42 }
 0x2e3   : > { %v6705_v42 = vld [vmem:[%s8592_s6 + $0x880] ss:$8 sps:$4 sm:$0xff]  }
 0x2e5   : > { %3866 = vmatpush1.bf16.msra.mxu1 %v6582_v45  ;;  %v6734_v45 = vld [vmem:[%s8595_s9 + $0x10] sm:$0xff]  }
 0x2e6   : > { %4114 = vmatprep.subr.bf16.mxu1 %v6587_v40  ;;  %v6735_v40 = vld [vmem:[%s8595_s9 + $0x58] sm:$0xff]   ;;  %5935 = vmatpush3.bf16.msra.mxu0 %v6734_v45  ;;  %v6713_v45 = vld [vmem:[%s8592_s6 + $0x8a4] ss:$8 sps:$4 sm:$0xff]  }
 0x2e7   : > { %5936 = vmatprep.subr.bf16.mxu0 %v6735_v40  ;;  %v6711_v40 = vld [vmem:[%s8592_s6 + $0x8a0] ss:$8 sps:$4 sm:$0xff]  }
 0x2e8   : > { %3868 = vmatmul.mubr.bf16.vlgmr.msra.gmra.mrb[4].mxu1 %v3665_v49  ;;  %v6736_v49 = vld [vmem:[%s8595_s9 + $0x18] sm:$0xff]  }
 0x2e9   : > { %4115 = vmatpush1.bf16.msra.mxu1 %v6585_v47  ;;  %4146 = vmatprep.mubr.bf16.mxu1 %v3951_v51  ;;  %v6647_v47 = vld [vmem:[%s8592_s6 + $0x744] ss:$8 sps:$4 sm:$0xff]   ;;  %v6645_v51 = vld [vmem:[%s8592_s6 + $0x740] ss:$8 sps:$4 sm:$0xff]  }
 0x2ea   : > { %4116 = vmatprep.subr.bf16.mxu1 %v6590_v50  ;;  %v6737_v50 = vld [vmem:[%s8595_s9 + $0x60] sm:$0xff]   ;;  %5937 = vmatpush3.bf16.msra.mxu0 %v6736_v49 }
 0x2eb   : > { %5938 = vmatprep.subr.bf16.mxu0 %v6737_v50  ;;  %v6719_v49 = vld [vmem:[%s8592_s6 + $0x8c4] ss:$8 sps:$4 sm:$0xff]   ;;  %v6717_v50 = vld [vmem:[%s8592_s6 + $0x8c0] ss:$8 sps:$4 sm:$0xff]  }
 0x2ed   : > { %4117 = vmatpush1.bf16.msra.mxu1 %v6588_v52  ;;  %v6650_v52 = vld [vmem:[%s8592_s6 + $0x754] ss:$8 sps:$4 sm:$0xff]  }
 0x2ee   : > { %4118 = vmatprep.subr.bf16.mxu1 %v6593_v2  ;;  %v6648_v2 = vld [vmem:[%s8592_s6 + $0x750] ss:$8 sps:$4 sm:$0xff]  }
 0x2f1   : > { %4119 = vmatpush1.bf16.msra.mxu1 %v6591_v53  ;;  %v6653_v53 = vld [vmem:[%s8592_s6 + $0x764] ss:$8 sps:$4 sm:$0xff]  }
 0x2f2   : > { %4120 = vmatprep.subr.bf16.mxu1 %v6596_v54  ;;  %v6651_v54 = vld [vmem:[%s8592_s6 + $0x760] ss:$8 sps:$4 sm:$0xff]  }
 0x2f5   : > { %4121 = vmatpush1.bf16.msra.mxu1 %v6594_v55  ;;  %v6656_v55 = vld [vmem:[%s8592_s6 + $0x774] ss:$8 sps:$4 sm:$0xff]  }
 0x2f6   : > { %4122 = vmatprep.subr.bf16.mxu1 %v6599_v60  ;;  %v6654_v60 = vld [vmem:[%s8592_s6 + $0x770] ss:$8 sps:$4 sm:$0xff]  }
 0x2f9   : > { %4123 = vmatpush1.bf16.msra.mxu1 %v6597_v61 }
 0x2fa   : > { %4124 = vmatprep.subr.bf16.mxu1 %v6602_v63  ;;  %v6659_v63 = vld [vmem:[%s8592_s6 + $0x784] ss:$8 sps:$4 sm:$0xff]  }
 0x2fd   : > { %4125 = vmatpush1.bf16.msra.mxu1 %v6600_v1 }
 0x2fe   : > { %4126 = vmatprep.subr.bf16.mxu1 %v6605_v3 }
 0x301   : > { %4127 = vmatpush1.bf16.msra.mxu1 %v6603_v4 }
 0x302   : > { %4128 = vmatprep.subr.bf16.mxu1 %v6608_v9  ;;  %v6657_v9 = vld [vmem:[%s8592_s6 + $0x780] ss:$8 sps:$4 sm:$0xff]  }
 0x305   : > { %4129 = vmatpush1.bf16.msra.mxu1 %v6606_v36  ;;  %v6662_v36 = vld [vmem:[%s8592_s6 + $0x794] ss:$8 sps:$4 sm:$0xff]  }
 0x306   : > { %4130 = vmatprep.subr.bf16.mxu1 %v6611_v5  ;;  %v6660_v5 = vld [vmem:[%s8592_s6 + $0x790] ss:$8 sps:$4 sm:$0xff]  }
 0x309   : > { %4131 = vmatpush1.bf16.msra.mxu1 %v6609_v6  ;;  %v6665_v6 = vld [vmem:[%s8592_s6 + $0x7a4] ss:$8 sps:$4 sm:$0xff]  }
 0x30a   : > { %4132 = vmatprep.subr.bf16.mxu1 %v6614_v7  ;;  %v6663_v7 = vld [vmem:[%s8592_s6 + $0x7a0] ss:$8 sps:$4 sm:$0xff]  }
 0x30d   : > { %4133 = vmatpush1.bf16.msra.mxu1 %v6612_v10  ;;  %v6668_v10 = vld [vmem:[%s8592_s6 + $0x7b4] ss:$8 sps:$4 sm:$0xff]  }
 0x30e   : > { %4134 = vmatprep.subr.bf16.mxu1 %v6617_v11  ;;  %v6666_v11 = vld [vmem:[%s8592_s6 + $0x7b0] ss:$8 sps:$4 sm:$0xff]  }
 0x311   : > { %4135 = vmatpush1.bf16.msra.mxu1 %v6615_v12  ;;  %v6671_v12 = vld [vmem:[%s8592_s6 + $0x7c4] ss:$8 sps:$4 sm:$0xff]  }
 0x312   : > { %4136 = vmatprep.subr.bf16.mxu1 %v6620_v14  ;;  %v6674_v14 = vld [vmem:[%s8592_s6 + $0x7d4] ss:$8 sps:$4 sm:$0xff]  }
 0x315   : > { %4137 = vmatpush1.bf16.msra.mxu1 %v6618_v58  ;;  %v6672_v58 = vld [vmem:[%s8592_s6 + $0x7d0] ss:$8 sps:$4 sm:$0xff]  }
 0x316   : > { %4138 = vmatprep.subr.bf16.mxu1 %v6623_v16  ;;  %v6677_v16 = vld [vmem:[%s8592_s6 + $0x7e4] ss:$8 sps:$4 sm:$0xff]  }
 0x319   : > { %4139 = vmatpush1.bf16.msra.mxu1 %v6621_v20  ;;  %v6680_v20 = vld [vmem:[%s8592_s6 + $0x7f4] ss:$8 sps:$4 sm:$0xff]  }
 0x31a   : > { %4140 = vmatprep.subr.bf16.mxu1 %v6626_v21  ;;  %v8388_v21 = vrot.slane %v5878_v17, %v6978_v22 }
 0x31d   : > { %4141 = vmatpush1.bf16.msra.mxu1 %v6624_v25  ;;  %v4517_v25 = vcombine.high %v8388_v21, %v8388_v21 }
 0x31e   : > { %4142 = vmatprep.subr.bf16.mxu1 %v6629_v26  ;;  %v6681_v26 = vld [vmem:[%s8592_s6 + $0x800] ss:$8 sps:$4 sm:$0xff]  }
 0x321   : > { %4143 = vmatpush1.bf16.msra.mxu1 %v6627_v28  ;;  %v6686_v28 = vld [vmem:[%s8592_s6 + $0x814] ss:$8 sps:$4 sm:$0xff]  }
 0x322   : > { %4144 = vmatprep.subr.bf16.mxu1 %v6632_v0  ;;  %v4531_v0 = vrot.slane %v4517_v25, %v6978_v22 }
 0x325   : > { %4145 = vmatpush1.bf16.msra.mxu1 %v6630_v30  ;;  %v6684_v30 = vld [vmem:[%s8592_s6 + $0x810] ss:$8 sps:$4 sm:$0xff]  }
 0x326   : > { %4413 = vmatprep.subr.bf16.mxu1 %v6635_v8  ;;  %v6689_v8 = vld [vmem:[%s8592_s6 + $0x824] ss:$8 sps:$4 sm:$0xff]  }
 0x328   : > { %4147 = vmatmul.mubr.bf16.vlgmr.msra.gmra.mrb[4].mxu1 %v3944_v32  ;;  %v6695_v32 = vld [vmem:[%s8592_s6 + $0x844] ss:$8 sps:$4 sm:$0xff]  }
 0x329   : > { %4414 = vmatpush1.bf16.msra.mxu1 %v6633_v48  ;;  %4445 = vmatprep.mubr.bf16.mxu1 %v4250_v34  ;;  %v6690_v48 = vld [vmem:[%s8592_s6 + $0x830] ss:$8 sps:$4 sm:$0xff]   ;;  %v6698_v34 = vld [vmem:[%s8592_s6 + $0x854] ss:$8 sps:$4 sm:$0xff]  }
 0x32a   : > { %4415 = vmatprep.subr.bf16.mxu1 %v6638_v33  ;;  %v6693_v33 = vld [vmem:[%s8592_s6 + $0x840] ss:$8 sps:$4 sm:$0xff]  }
 0x32d   : > { %4416 = vmatpush1.bf16.msra.mxu1 %v6636_v38  ;;  %v6704_v38 = vld [vmem:[%s8592_s6 + $0x874] ss:$8 sps:$4 sm:$0xff]  }
 0x32e   : > { %4417 = vmatprep.subr.bf16.mxu1 %v6641_v39  ;;  %v6702_v39 = vld [vmem:[%s8592_s6 + $0x870] ss:$8 sps:$4 sm:$0xff]  }
 0x331   : > { %4418 = vmatpush1.bf16.msra.mxu1 %v6639_v43  ;;  %v6710_v43 = vld [vmem:[%s8592_s6 + $0x894] ss:$8 sps:$4 sm:$0xff]  }
 0x332   : > { %4419 = vmatprep.subr.bf16.mxu1 %v6644_v44  ;;  %v6708_v44 = vld [vmem:[%s8592_s6 + $0x890] ss:$8 sps:$4 sm:$0xff]  }
 0x335   : > { %4420 = vmatpush1.bf16.msra.mxu1 %v6642_v46  ;;  %v6716_v46 = vld [vmem:[%s8592_s6 + $0x8b4] ss:$8 sps:$4 sm:$0xff]  }
 0x336   : > { %4421 = vmatprep.subr.bf16.mxu1 %v6647_v47  ;;  %v6714_v47 = vld [vmem:[%s8592_s6 + $0x8b0] ss:$8 sps:$4 sm:$0xff]  }
 0x339   : > { %4422 = vmatpush1.bf16.msra.mxu1 %v6645_v51  ;;  %v6722_v51 = vld [vmem:[%s8592_s6 + $0x8d4] ss:$8 sps:$4 sm:$0xff]  }
 0x33a   : > { %4423 = vmatprep.subr.bf16.mxu1 %v6650_v52  ;;  %v6720_v52 = vld [vmem:[%s8592_s6 + $0x8d0] ss:$8 sps:$4 sm:$0xff]  }
 0x33d   : > { %4424 = vmatpush1.bf16.msra.mxu1 %v6648_v2  ;;  %v6725_v2 = vld [vmem:[%s8592_s6 + $0x8e4] ss:$8 sps:$4 sm:$0xff]  }
 0x33e   : > { %4425 = vmatprep.subr.bf16.mxu1 %v6653_v53  ;;  %v6723_v53 = vld [vmem:[%s8592_s6 + $0x8e0] ss:$8 sps:$4 sm:$0xff]  }
 0x341   : > { %4426 = vmatpush1.bf16.msra.mxu1 %v6651_v54  ;;  %v6728_v54 = vld [vmem:[%s8592_s6 + $0x8f4] ss:$8 sps:$4 sm:$0xff]  }
 0x342   : > { %v8337_v61 = vpop.f32.mrb[4].mxu0  ;;  %4427 = vmatprep.subr.bf16.mxu1 %v6656_v55  ;;  %v6726_v55 = vld [vmem:[%s8592_s6 + $0x8f0] ss:$8 sps:$4 sm:$0xff]  }
 0x343   : > { %v8342_v1 = vpop.f32.mrb[5].mxu0 }
 0x344   : > { %v2735_v3 = vpop.f32.mrb[6].mxu0 }
 0x345   : > { %v2736_v4 = vpop.f32.mrb[7].mxu0  ;;  %4428 = vmatpush1.bf16.msra.mxu1 %v6654_v60  ;;  %v4524_v60 = vrot.slane %v8388_v21, %v6978_v22  ;;  %v6739_v3 = vld [vmem:[%s8595_s9 + $0x68] sm:$0xff]   ;;  %v6741_v22 = vld [vmem:[%s8595_s9 + $0x70] sm:$0xff]  }
 0x346   : > { %4429 = vmatprep.subr.bf16.mxu1 %v6659_v63  ;;  %v6738_v63 = vld [vmem:[%s8595_s9 + $0x20] sm:$0xff]   ;;  %v6740_v4 = vld [vmem:[%s8595_s9 + $0x28] sm:$0xff]  }
 0x347   : > { %5939 = vmatpush3.bf16.msra.mxu0 %v6738_v63 }
 0x348   : > { %5940 = vmatprep.subr.bf16.mxu0 %v6739_v3 }
 0x349   : > { %4430 = vmatpush1.bf16.msra.mxu1 %v6657_v9  ;;  %v6742_v9 = vld [vmem:[%s8595_s9 + $0x30] sm:$0xff]  }
 0x34a   : > { %4431 = vmatprep.subr.bf16.mxu1 %v6662_v36  ;;  %v6743_v36 = vld [vmem:[%s8595_s9 + $0x78] sm:$0xff]  }
 0x34b   : > { %5941 = vmatpush3.bf16.msra.mxu0 %v6740_v4 }
 0x34c   : > { %5942 = vmatprep.subr.bf16.mxu0 %v6741_v22 }
 0x34d   : > { %4432 = vmatpush1.bf16.msra.mxu1 %v6660_v5  ;;  %v6744_v5 = vld [vmem:[%s8595_s9 + $0x38] sm:$0xff]  }
 0x34e   : > { %4433 = vmatprep.subr.bf16.mxu1 %v6665_v6  ;;  %v4737_v6 = vld [vmem:[%s8593_s7] sm:$0x3] }
 0x34f   : > { %5943 = vmatpush3.bf16.msra.mxu0 %v6742_v9 }
 0x350   : > { %5944 = vmatprep.subr.bf16.mxu0 %v6743_v36 }
 0x351   : > { %4434 = vmatpush1.bf16.msra.mxu1 %v6663_v7  ;;  %v4751_v7 = vld [vmem:[%s8594_s8] sm:$0x3] }
 0x352   : > { %4435 = vmatprep.subr.bf16.mxu1 %v6668_v10  ;;  %v4742_v10 = vrot.slane %v4737_v6, %v7683_v57  ;;  %v4756_v15 = vrot.slane %v4751_v7, %v7683_v57  ;;  %v4760_v17 = vrot.slane %v4751_v7, %v7689_v59 }
 0x353   : > { %5945 = vmatpush3.bf16.msra.mxu0 %v6744_v5 }
 0x355   : > { %4436 = vmatpush1.bf16.msra.mxu1 %v6666_v11  ;;  %v1988_v11 = vld [vmem:[%s8591_s5] sm:$0x3] }
 0x356   : > { %4437 = vmatprep.subr.bf16.mxu1 %v6671_v12 }
 0x359   : > { %4438 = vmatpush1.bf16.msra.mxu1 %v6669_v13  ;;  %v4746_v13 = vrot.slane %v4737_v6, %v7689_v59 }
 0x35a   : > { %4439 = vmatprep.subr.bf16.mxu1 %v6674_v14 }
 0x35d   : > { %4440 = vmatpush1.bf16.msra.mxu1 %v6672_v58 }
 0x35e   : > { %4441 = vmatprep.subr.bf16.mxu1 %v6677_v16 }
 0x361   : > { %4442 = vmatpush1.bf16.msra.mxu1 %v6675_v19 }
 0x362   : > { %4443 = vmatprep.subr.bf16.mxu1 %v6680_v20  ;;  %v1993_v20 = vrot.slane %v1988_v11, %v7683_v57 }
 0x365   : > { %4444 = vmatpush1.bf16.msra.mxu1 %v6678_v24 }
 0x366   : > { %4694 = vmatprep.subr.bf16.mxu1 %v6683_v56  ;;  %v1997_v56 = vrot.slane %v1988_v11, %v7689_v59 }
 0x368   : > { %4446 = vmatmul.mubr.bf16.vlgmr.msra.gmra.mrb[4].mxu1 %v4243_v27 }
 0x369   : > { %4695 = vmatpush1.bf16.msra.mxu1 %v6681_v26  ;;  %4726 = vmatprep.mubr.bf16.mxu1 %v4531_v0  ;;  %v2117_v0 = vadd.f32 %v7795_v18, %v1997_v56 }
 0x36a   : > { %4696 = vmatprep.subr.bf16.mxu1 %v6686_v28  ;;  %v2115_v28 = vadd.f32 %v7784_v23, %v1993_v20 }
 0x36d   : > { %4697 = vmatpush1.bf16.msra.mxu1 %v6684_v30 }
 0x36e   : > { %4698 = vmatprep.subr.bf16.mxu1 %v6689_v8 }
 0x371   : > { %4699 = vmatpush1.bf16.msra.mxu1 %v6687_v29 }
 0x372   : > { %4700 = vmatprep.subr.bf16.mxu1 %v6692_v31 }
 0x375   : > { %4701 = vmatpush1.bf16.msra.mxu1 %v6690_v48 }
 0x376   : > { %4702 = vmatprep.subr.bf16.mxu1 %v6695_v32 }
 0x379   : > { %4703 = vmatpush1.bf16.msra.mxu1 %v6693_v33 }
 0x37a   : > { %4704 = vmatprep.subr.bf16.mxu1 %v6698_v34 }
 0x37d   : > { %4705 = vmatpush1.bf16.msra.mxu1 %v6696_v35 }
 0x37e   : > { %4706 = vmatprep.subr.bf16.mxu1 %v6701_v62 }
 0x381   : > { %4707 = vmatpush1.bf16.msra.mxu1 %v6699_v37 }
 0x382   : > { %4708 = vmatprep.subr.bf16.mxu1 %v6704_v38 }
 0x385   : > { %4709 = vmatpush1.bf16.msra.mxu1 %v6702_v39  ;;  %v4949_v39 = vld [vmem:[%s8596_s10] sm:$0x1] }
 0x386   : > { %4710 = vmatprep.subr.bf16.mxu1 %v6707_v41 }
 0x389   : > { %4711 = vmatpush1.bf16.msra.mxu1 %v6705_v42 }
 0x38a   : > { %4712 = vmatprep.subr.bf16.mxu1 %v6710_v43 }
 0x38d   : > { %4713 = vmatpush1.bf16.msra.mxu1 %v6708_v44 }
 0x38e   : > { %4714 = vmatprep.subr.bf16.mxu1 %v6713_v45 }
 0x391   : > { %4715 = vmatpush1.bf16.msra.mxu1 %v6711_v40 }
 0x392   : > { %4716 = vmatprep.subr.bf16.mxu1 %v6716_v46 }
 0x395   : > { %4717 = vmatpush1.bf16.msra.mxu1 %v6714_v47 }
 0x396   : > { %4718 = vmatprep.subr.bf16.mxu1 %v6719_v49 }
 0x399   : > { %4719 = vmatpush1.bf16.msra.mxu1 %v6717_v50 }
 0x39a   : > { %4720 = vmatprep.subr.bf16.mxu1 %v6722_v51 }
 0x39d   : > { %4721 = vmatpush1.bf16.msra.mxu1 %v6720_v52 }
 0x39e   : > { %4722 = vmatprep.subr.bf16.mxu1 %v6725_v2 }
 0x3a1   : > { %4723 = vmatpush1.bf16.msra.mxu1 %v6723_v53 }
 0x3a2   : > { %4724 = vmatprep.subr.bf16.mxu1 %v6728_v54 }
 0x3a5   : > { %4725 = vmatpush1.bf16.msra.mxu1 %v6726_v55 }
 0x3a8   : > { %4727 = vmatmul.mubr.bf16.vlgmr.msra.gmra.mrb[4].mxu1 %v4524_v60 }
 0x47b   : > { %v4728_v12 = vpop.f32.mrb[4].mxu1 }
 0x47c   : > { %v5952_v14 = vadd.f32 %v4728_v12, %v8337_v61  ;;  %v4730_v58 = vpop.f32.mrb[5].mxu1 }
 0x47d   : > { %v5953_v16 = vadd.f32 %v4730_v58, %v8342_v1  ;;  %v4732_v19 = vpop.f32.mrb[6].mxu1 }
 0x47e   : > { %v4749_v21 = vmul.f32 %v5952_v14, %v4742_v10  ;;  %v4733_v24 = vpop.f32.mrb[7].mxu1 }
 0x47f   : > { %v4750_v25 = vmul.f32 %v5953_v16, %v4746_v13 }
 0x480   : > { %v4763_v26 = vadd.f32 %v4756_v15, %v4749_v21 }
 0x481   : > { %v4764_v27 = vadd.f32 %v4760_v17, %v4750_v25 }
 0x482   : > { %v4765_v61 = vmax.f32 %v4763_v26, 0.0 }
 0x483   : > { %v4766_v30 = vmax.f32 %v4764_v27, 0.0 }
 0x484   : > { %v4767_v8 = vadd.f32 %v4765_v61, %v2115_v28 }
 0x485   : > { %v4768_v1 = vadd.f32 %v4766_v30, %v2117_v0 }
 0x486   : > { %v4769_v31 = vpack.c.bf16 %v4767_v8, %v4767_v8 }
 0x487   : > { %v4770_v29 = vpack.c.bf16 %v4768_v1, %v4768_v1 }
 0x489   : > { %4931 = vmatprep.mubr.bf16.mxu0 %v4770_v29 }
 0x48a   : > { %4932 = vmatmul.mubr.bf16.vlgmr.msra.gmra.mrb[8].mxu0 %v4769_v31 }
 0x55d   : > { %v5946_v57 = vpop.f32.mrb[8].mxu0 }
 0x55e   : > { %v5947_v48 = vpop.f32.mrb[9].mxu0 }
 0x55f   : > { %v5948_v59 = vadd.f32 %v5947_v48, %v5946_v57  ;;  %v5949_v32 = vpop.f32.mrb[10].mxu0 }
 0x560   : > { %v5950_v33 = vpop.f32.mrb[11].mxu0 }
 0x561   : > { %v4940_v34 = vsel %vm4939_vm6, %v5948_v59, 0.0 }
 0x562   : > { %v4941_v23 = vrot.slane %v4940_v34, 4 }
 0x564   : > { %v4942_v35 = vadd.f32 %v4941_v23, %v4940_v34 }
 0x566   : > { %v4943_v62 = vrot.slane %v4942_v35, 2 }
 0x568   : > { %v4944_v18 = vadd.f32 %v4943_v62, %v4942_v35 }
 0x56a   : > { %v4945_v37 = vrot.slane %v4944_v18, 1 }
 0x56c   : > { %v4946_v38 = vadd.f32 %v4945_v37, %v4944_v18 }
 0x56e   : > { %v4948_v41 = vmul.f32 0.25, %v4946_v38 }
 0x570   : > { %v4950_v42 = vadd.f32 %v4949_v39, %v4948_v41 }
 0x572   : > { %4951 = vst [vmem:[%s378_s30] sm:$0x1] %v4950_v42 }
 0x573   : > { %6758 = shalt.err (!%p6755_p3)
}
 0x574   : > { %s6759_s24 = scalar_lea.hbm %s8544_s12, 16  ;;  %s6763_s14 = scalar_lea.hbm %s8597_s11, 32 }
 0x575   : > { %p6760_p4 = scmp.ne.s32.totalorder %s8544_s12, %s6759_s24  ;;  %p6764_p9 = scmp.lt.u32.totalorder %s8544_s12, %s8597_s11 }
 0x576   : > { %p6765_p10 = scmp.lt.u32.totalorder %s6763_s14, %s6759_s24  ;;  %p6767_p12 = scmp.lt.u32.totalorder %s6759_s24, %s8544_s12 }
 0x577   : > { %p6761_p7 = pnand %p6760_p4, %p6911_p5 }
 0x578   : > { %p6766_p11 = por %p6765_p10, %p6764_p9 }
 0x579   : > { %p6762_p8 = pneg %p6761_p7 }
 0x57a   : > { %p6768_p13 = por %p6767_p12, %p6766_p11 }
 0x57c   : > { %p6769_p0 = pnand %p6768_p13, %p6762_p8 }
 0x57e   : > { %6772 = shalt.err (!%p6769_p0)
}
 0x57f   : > { %6015 = dma.vmem_to_hbm [thread:$0]  (%p6911_p5), %s8546_s13, 16, %s8544_s12, %s4953_s15  }
 0x580 PF: > { %p6021_p1 = scmp.ge.s32.totalorder %s6807_s20, 2  ;;  %s4977_s16 = sand.u32 1, %s6795_s17  }
 0x581   : > { %s4978_s22 = scalar_lea.sflag [#allocation4], %s4977_s16 }
 0x582   : > { %p6018_p2 = pnand %p6021_p1, %p6915_p6 }
 0x584   : > { %6790 = dma.done.wait (!%p6018_p2), %s4978_s22, 16  }
 0x585   : > { %6792 = vsyncadd (!%p6018_p2), %s4978_s22, 4294967280  ;;  %s8605_s25 = sld [smem:[#allocation6_spill]]  ;;  %p21_p3 = scmp.ge.s32.totalorder %s6898_s23, 4  }
 0x586   : > { %s8606_s17 = smov %s6799_s18  ;;  %s8607_s18 = smov %s6803_s19 }
 0x587   : > { %s8609_s20 = smov %s6898_s23  ;;  %23 = sbr.rel (!%p21_p3) target bundleno = 3 (0x3), region = 122 }
 0x58b   : > { %s8608_s19 = smov %s8605_s25 }
 0x58e   :  { %4982 = vsyncpa [#allocation4], 1 }
 0x58f   :  { %4984 = vsyncpa [#allocation4 + $0x1], 1 }

</bundles_post_ra>
